<compile_context>
chip_gen: v5e
topology: v5e:2x2
jax: 0.10.0
libtpu: 0.0.40
codegen_flags: <defaults>
</compile_context>

<pallas_src>
import numpy as np
import jax
import jax.numpy as jnp
from jax.experimental import pallas as pl
from jax.experimental.pallas import tpu as pltpu

KSZ = 7                      # kernel size of every 7-tap conv / conv-transpose
STR = 4                      # stride of the strided layers
L0, L1, L2, L3 = 1791, 447, 111, 27   # architecture-mandated lengths (1791->447->111->27)


# --------------------------------------------------------------------------- #
# Fused forward kernel: one grid step == one batch sample.
# --------------------------------------------------------------------------- #
def _ae_fused_kernel(x_ph, w1, b1, w2, b2, w3, b3,
                     l1w, l1b, l2w, l2b,
                     wd1, bd1, wd2, bd2, wd3, bd3, wd4, bd4,
                     s2, s3, t1, t2,
                     out_ph,
                     y_sc, xp1, xp2, xz3):
    f32 = jnp.float32
    F4 = b3.shape[0]                       # 4 * filters

    def mm(a, b):
        return jnp.dot(a, b, preferred_element_type=f32)

    # ----------------------------- Encoder --------------------------------- #
    # conv1 (Cin=1): input arrives phase-split (4, 448) so the stride-4 conv is just
    # 7 shifted broadcast multiply-accumulates (VPU), length stays on lanes.
    xph = x_ph[0]                                           # (4, 448)
    acc = w1[0] * xph[0:1, 0:L1]
    for k in range(1, KSZ):
        acc = acc + w1[k] * xph[k % STR:k % STR + 1, k // STR:k // STR + L1]
    h = jnp.maximum(acc + b1[...], 0.0)                     # (F, 447)

    # conv2: stride-1 shifted matmuls, then "keep every 4th column" selection matmul.
    wid2 = L1 - KSZ + 1                                     # 441
    acc = mm(w2[0], h[:, 0:wid2])
    for k in range(1, KSZ):
        acc = acc + mm(w2[k], h[:, k:k + wid2])
    h = jnp.maximum(mm(acc, s2[...]) + b2[...], 0.0)        # (2F, 111)

    # conv3
    wid3 = L2 - KSZ + 1                                     # 105
    acc = mm(w3[0], h[:, 0:wid3])
    for k in range(1, KSZ):
        acc = acc + mm(w3[k], h[:, k:k + wid3])
    h = jnp.maximum(mm(acc, s3[...]) + b3[...], 0.0)        # (4F, 27)

    # lin1 (bottleneck).  Flatten order is (channel, length), matching torch .view.
    z = l1b[...]                                            # (1, latent)
    for c in range(F4):
        z = z + mm(h[c:c + 1, :], l1w[c])

    # ----------------------------- Decoder --------------------------------- #
    # lin2 -> (4F, 27), assembled row by row into VMEM scratch (no lane relayouts).
    for c in range(F4):
        y_sc[c:c + 1, :] = mm(z, l2w[c]) + l2b[c:c + 1, :]
    y = y_sc[...]                                           # (4F, 27)

    # dconv1: zero-insertion upsample as a selection matmul, then stride-1 conv with
    # flipped / channel-swapped taps (classic conv-transpose identity).
    xp1[...] = jnp.zeros(xp1.shape, f32)
    xp1[:, KSZ - 1:KSZ - 1 + STR * L3 - 3] = mm(y, t1[...])     # (4F, 105) @ offset 6
    xv = xp1[...]
    acc = mm(wd1[0], xv[:, 0:L2])
    for k in range(1, KSZ):
        acc = acc + mm(wd1[k], xv[:, k:k + L2])
    y = jnp.maximum(acc + bd1[...], 0.0)                    # (4F, 111)

    # dconv2
    xp2[...] = jnp.zeros(xp2.shape, f32)
    xp2[:, KSZ - 1:KSZ - 1 + STR * L2 - 3] = mm(y, t2[...])     # (4F, 441) @ offset 6
    xv = xp2[...]
    acc = mm(wd2[0], xv[:, 0:L1])
    for k in range(1, KSZ):
        acc = acc + mm(wd2[k], xv[:, k:k + L1])
    y = jnp.maximum(acc + bd2[...], 0.0)                    # (2F, 447)

    # dconv3 in polyphase form (output phase p holds positions 4*m + p, lane-dense).
    # dconv4 (1x1, Cout=1) is folded into the epilogue as a VPU weighted channel sum.
    xz3[...] = jnp.zeros(xz3.shape, f32)
    xz3[:, 1:1 + L1] = y
    x_cur = xz3[:, 1:L1 + 2]            # x[m]    (zero at m = L1)   (2F, 448)
    x_prv = xz3[:, 0:L1 + 1]            # x[m-1]  (zero at m = 0)    (2F, 448)
    for p in range(STR):
        op = mm(wd3[p], x_cur)
        if p + STR < KSZ:
            op = op + mm(wd3[p + STR], x_prv)
        op = jnp.maximum(op + bd3[...], 0.0)                # relu(dconv3), (F, 448)
        out_ph[0, p:p + 1, :] = jnp.sum(wd4[...] * op, axis=0, keepdims=True) + bd4[...]


# --------------------------------------------------------------------------- #
# Wrapper: layout plumbing (tiny tensors only) + one pallas_call.
# --------------------------------------------------------------------------- #
def _downsample_matrix(width, n_out):
    m = np.zeros((width, n_out), np.float32)
    m[STR * np.arange(n_out), np.arange(n_out)] = 1.0
    return m


def ae_forward(params, x_blue):
    """AE forward: x_blue (B, 1, 1791) float32 -> (B, 1, 1791) float32."""
    p = params
    F = p["conv1_w"].shape[0]              # filters       (static: from shapes)
    latent = p["lin1_w"].shape[0]          # latent_dim    (static: from shapes)
    B = x_blue.shape[0]
    assert x_blue.shape[1:] == (1, L0)
    f32 = jnp.float32

    # Input phase-split along length (pad 1791 -> 1792, split into 4 phases of 448)
    # so the stride-4 first conv needs no gathers inside the kernel.
    xpad = jnp.pad(x_blue[:, 0, :], ((0, 0), (0, STR * (L1 + 1) - L0)))
    x_ph = jnp.transpose(xpad.reshape(B, L1 + 1, STR), (0, 2, 1))        # (B, 4, 448)

    # Conv weights as (K, Cout, Cin); conv-transpose taps flipped + channel-swapped
    # (dconv3 is used in polyphase form -> plain channel swap, no flip).
    w1 = jnp.transpose(p["conv1_w"], (2, 0, 1))
    w2 = jnp.transpose(p["conv2_w"], (2, 0, 1))
    w3 = jnp.transpose(p["conv3_w"], (2, 0, 1))
    wd1 = jnp.transpose(p["dconv1_w"][:, :, ::-1], (2, 1, 0))
    wd2 = jnp.transpose(p["dconv2_w"][:, :, ::-1], (2, 1, 0))
    wd3 = jnp.transpose(p["dconv3_w"], (2, 1, 0))
    wd4 = p["dconv4_w"][:, 0, :]                                         # (F, 1)
    b1 = p["conv1_b"].reshape(F, 1)
    b2 = p["conv2_b"].reshape(2 * F, 1)
    b3 = p["conv3_b"].reshape(4 * F, 1)
    bd1 = p["dconv1_b"].reshape(4 * F, 1)
    bd2 = p["dconv2_b"].reshape(2 * F, 1)
    bd3 = p["dconv3_b"].reshape(F, 1)
    bd4 = p["dconv4_b"].reshape(1, 1)
    # Linear weights grouped per channel row of the (4F, 27) activation map.
    l1w = jnp.transpose(p["lin1_w"].reshape(latent, 4 * F, L3), (1, 2, 0))  # (4F,27,lat)
    l1b = p["lin1_b"].reshape(1, latent)
    l2w = jnp.transpose(p["lin2_w"].reshape(4 * F, L3, latent), (0, 2, 1))  # (4F,lat,27)
    l2b = p["lin2_b"].reshape(4 * F, L3)

    # 0/1 selection matrices (trace-time constants): downsample / zero-insert by 4.
    s2 = jnp.asarray(_downsample_matrix(L1 - KSZ + 1, L2))     # (441, 111)
    s3 = jnp.asarray(_downsample_matrix(L2 - KSZ + 1, L3))     # (105, 27)
    t1 = jnp.asarray(_downsample_matrix(L2 - KSZ + 1, L3).T)   # (27, 105)
    t2 = jnp.asarray(_downsample_matrix(L1 - KSZ + 1, L2).T)   # (111, 441)

    inputs = [x_ph, w1, b1, w2, b2, w3, b3, l1w, l1b, l2w, l2b,
              wd1, bd1, wd2, bd2, wd3, bd3, wd4, bd4, s2, s3, t1, t2]

    def _const_spec(a):
        if a.ndim == 2:
            return pl.BlockSpec(a.shape, lambda b: (0, 0))
        return pl.BlockSpec(a.shape, lambda b: (0, 0, 0))

    in_specs = [pl.BlockSpec((1, STR, L1 + 1), lambda b: (b, 0, 0))]
    in_specs += [_const_spec(a) for a in inputs[1:]]

    out_ph = pl.pallas_call(
        _ae_fused_kernel,
        out_shape=jax.ShapeDtypeStruct((B, STR, L1 + 1), f32),
        grid_spec=pltpu.PrefetchScalarGridSpec(
            num_scalar_prefetch=0,
            grid=(B,),                                   # one step per batch sample
            in_specs=in_specs,
            out_specs=pl.BlockSpec((1, STR, L1 + 1), lambda b: (b, 0, 0)),
            scratch_shapes=[
                pltpu.VMEM((4 * F, L3), f32),                                 # lin2 rows
                pltpu.VMEM((4 * F, STR * L3 - 3 + 2 * (KSZ - 1)), f32),       # dconv1 pad
                pltpu.VMEM((4 * F, STR * L2 - 3 + 2 * (KSZ - 1)), f32),       # dconv2 pad
                pltpu.VMEM((2 * F, L1 + 2), f32),                             # dconv3 shift
            ],
        ),
        compiler_params=pltpu.CompilerParams(
            dimension_semantics=("parallel",),           # shard batch across v7x TCs
        ),
    )(*inputs)

    # Interleave the 4 output phases back to a dense length-1791 signal (plumbing).
    y = jnp.transpose(out_ph, (0, 2, 1)).reshape(B, STR * (L1 + 1))[:, :L0]
    return y.reshape(B, 1, L0)


# --------------------------------------------------------------------------- #
# Plain-XLA reference (same math as the PyTorch module) for a sanity check.
# --------------------------------------------------------------------------- #
def _conv1d_ref(x, w, b, stride):
    y = jax.lax.conv_general_dilated(
        x, w, (stride,), "VALID", dimension_numbers=("NCH", "OIH", "NCH"),
        precision=jax.lax.Precision.HIGHEST)
    return y + b[None, :, None]


def _conv_transpose1d_ref(x, w, b, stride):
    k = w.shape[-1]
    w_conv = jnp.transpose(w, (1, 0, 2))[:, :, ::-1]
    y = jax.lax.conv_general_dilated(
        x, w_conv, (1,), [(k - 1, k - 1)], lhs_dilation=(stride,),
        dimension_numbers=("NCH", "OIH", "NCH"),
        precision=jax.lax.Precision.HIGHEST)
    return y + b[None, :, None]


def ae_reference(params, x):
    p = params
    F = p["conv1_w"].shape[0]
    B = x.shape[0]
    h = jax.nn.relu(_conv1d_ref(x, p["conv1_w"], p["conv1_b"], STR))
    h = jax.nn.relu(_conv1d_ref(h, p["conv2_w"], p["conv2_b"], STR))
    h = jax.nn.relu(_conv1d_ref(h, p["conv3_w"], p["conv3_b"], STR))
    h = h.reshape(B, 4 * F * L3)
    z = jnp.dot(h, p["lin1_w"].T, precision=jax.lax.Precision.HIGHEST) + p["lin1_b"]
    y = jnp.dot(z, p["lin2_w"].T, precision=jax.lax.Precision.HIGHEST) + p["lin2_b"]
    y = y.reshape(B, 4 * F, L3)
    y = jax.nn.relu(_conv_transpose1d_ref(y, p["dconv1_w"], p["dconv1_b"], STR))
    y = jax.nn.relu(_conv_transpose1d_ref(y, p["dconv2_w"], p["dconv2_b"], STR))
    y = jax.nn.relu(_conv_transpose1d_ref(y, p["dconv3_w"], p["dconv3_b"], STR))
    return _conv_transpose1d_ref(y, p["dconv4_w"], p["dconv4_b"], 1)


# --------------------------------------------------------------------------- #
# Deterministic PyTorch-layout parameter init (shapes from AE.__init__).
# --------------------------------------------------------------------------- #
def init_params(key, filters, latent_dim):
    F = filters
    shapes = {
        "conv1_w": (F, 1, KSZ), "conv1_b": (F,),
        "conv2_w": (2 * F, F, KSZ), "conv2_b": (2 * F,),
        "conv3_w": (4 * F, 2 * F, KSZ), "conv3_b": (4 * F,),
        "lin1_w": (latent_dim, 4 * F * L3), "lin1_b": (latent_dim,),
        "lin2_w": (4 * F * L3, latent_dim), "lin2_b": (4 * F * L3,),
        "dconv1_w": (4 * F, 4 * F, KSZ), "dconv1_b": (4 * F,),
        "dconv2_w": (4 * F, 2 * F, KSZ), "dconv2_b": (2 * F,),
        "dconv3_w": (2 * F, F, KSZ), "dconv3_b": (F,),
        "dconv4_w": (F, 1, 1), "dconv4_b": (1,),
    }
    params = {}
    keys = jax.random.split(key, len(shapes))
    for k, (name, shape) in zip(keys, sorted(shapes.items())):
        fan_in = int(np.prod(shape[1:])) if len(shape) > 1 else int(shape[0])
        scale = 1.0 / float(np.sqrt(max(fan_in, 1)))
        params[name] = jax.random.normal(k, shape, jnp.float32) * scale
    return params


if __name__ == "__main__":
    # Input length 1791 is architecture-mandated (conv3 output length must be 27).
    filters, latent_dim, batch = 4, 32, 2

    key = jax.random.PRNGKey(0)
    kx, kp = jax.random.split(key)
    x_blue = jax.random.normal(kx, (batch, 1, L0), jnp.float32)
    params = init_params(kp, filters, latent_dim)

    fwd = jax.jit(ae_forward)
    y = jax.block_until_ready(fwd(params, x_blue))

    assert y.shape == (batch, 1, L0), y.shape
    assert bool(jnp.all(jnp.isfinite(y)))

    # Cross-check against the plain-XLA reference of the same module.
    y_ref = jax.jit(ae_reference)(params, x_blue)
    assert float(jnp.max(jnp.abs(y - y_ref))) < 5e-2

    print("KERNEL_OK")
</pallas_src>

<mosaic_0001>
module attributes {stable_mosaic.version = 11 : i64} {
  func.func @_ae_fused_kernel(%arg0: i32, %arg1: memref<1x4x448xf32, #tpu.memory_space<vmem>>, %arg2: memref<7x4x1xf32, #tpu.memory_space<vmem>>, %arg3: memref<4x1xf32, #tpu.memory_space<vmem>>, %arg4: memref<7x8x4xf32, #tpu.memory_space<vmem>>, %arg5: memref<8x1xf32, #tpu.memory_space<vmem>>, %arg6: memref<7x16x8xf32, #tpu.memory_space<vmem>>, %arg7: memref<16x1xf32, #tpu.memory_space<vmem>>, %arg8: memref<16x27x32xf32, #tpu.memory_space<vmem>>, %arg9: memref<1x32xf32, #tpu.memory_space<vmem>>, %arg10: memref<16x32x27xf32, #tpu.memory_space<vmem>>, %arg11: memref<16x27xf32, #tpu.memory_space<vmem>>, %arg12: memref<7x16x16xf32, #tpu.memory_space<vmem>>, %arg13: memref<16x1xf32, #tpu.memory_space<vmem>>, %arg14: memref<7x8x16xf32, #tpu.memory_space<vmem>>, %arg15: memref<8x1xf32, #tpu.memory_space<vmem>>, %arg16: memref<7x4x8xf32, #tpu.memory_space<vmem>>, %arg17: memref<4x1xf32, #tpu.memory_space<vmem>>, %arg18: memref<4x1xf32, #tpu.memory_space<vmem>>, %arg19: memref<1x1xf32, #tpu.memory_space<vmem>>, %arg20: memref<441x111xf32, #tpu.memory_space<vmem>>, %arg21: memref<105x27xf32, #tpu.memory_space<vmem>>, %arg22: memref<27x105xf32, #tpu.memory_space<vmem>>, %arg23: memref<111x441xf32, #tpu.memory_space<vmem>>, %arg24: memref<1x4x448xf32, #tpu.memory_space<vmem>>, %arg25: memref<16x27xf32, #tpu.memory_space<vmem>>, %arg26: memref<16x117xf32, #tpu.memory_space<vmem>>, %arg27: memref<16x453xf32, #tpu.memory_space<vmem>>, %arg28: memref<8x449xf32, #tpu.memory_space<vmem>>) attributes {dimension_semantics = [#tpu.dimension_semantics<parallel>], iteration_bounds = array<i64: 2>, scalar_prefetch = 0 : i64, scratch_operands = 4 : i64, tpu.core_type = #tpu.core_type<tc>, window_params = [{transform_indices = @transform_0, window_bounds = array<i64: 1, 4, 448>}, {pipeline_mode = #tpu.pipeline_mode<synchronous>, transform_indices = @transform_1, window_bounds = array<i64: 7, 4, 1>}, {pipeline_mode = #tpu.pipeline_mode<synchronous>, transform_indices = @transform_2, window_bounds = array<i64: 4, 1>}, {pipeline_mode = #tpu.pipeline_mode<synchronous>, transform_indices = @transform_3, window_bounds = array<i64: 7, 8, 4>}, {pipeline_mode = #tpu.pipeline_mode<synchronous>, transform_indices = @transform_4, window_bounds = array<i64: 8, 1>}, {pipeline_mode = #tpu.pipeline_mode<synchronous>, transform_indices = @transform_5, window_bounds = array<i64: 7, 16, 8>}, {pipeline_mode = #tpu.pipeline_mode<synchronous>, transform_indices = @transform_6, window_bounds = array<i64: 16, 1>}, {pipeline_mode = #tpu.pipeline_mode<synchronous>, transform_indices = @transform_7, window_bounds = array<i64: 16, 27, 32>}, {pipeline_mode = #tpu.pipeline_mode<synchronous>, transform_indices = @transform_8, window_bounds = array<i64: 1, 32>}, {pipeline_mode = #tpu.pipeline_mode<synchronous>, transform_indices = @transform_9, window_bounds = array<i64: 16, 32, 27>}, {pipeline_mode = #tpu.pipeline_mode<synchronous>, transform_indices = @transform_10, window_bounds = array<i64: 16, 27>}, {pipeline_mode = #tpu.pipeline_mode<synchronous>, transform_indices = @transform_11, window_bounds = array<i64: 7, 16, 16>}, {pipeline_mode = #tpu.pipeline_mode<synchronous>, transform_indices = @transform_12, window_bounds = array<i64: 16, 1>}, {pipeline_mode = #tpu.pipeline_mode<synchronous>, transform_indices = @transform_13, window_bounds = array<i64: 7, 8, 16>}, {pipeline_mode = #tpu.pipeline_mode<synchronous>, transform_indices = @transform_14, window_bounds = array<i64: 8, 1>}, {pipeline_mode = #tpu.pipeline_mode<synchronous>, transform_indices = @transform_15, window_bounds = array<i64: 7, 4, 8>}, {pipeline_mode = #tpu.pipeline_mode<synchronous>, transform_indices = @transform_16, window_bounds = array<i64: 4, 1>}, {pipeline_mode = #tpu.pipeline_mode<synchronous>, transform_indices = @transform_17, window_bounds = array<i64: 4, 1>}, {pipeline_mode = #tpu.pipeline_mode<synchronous>, transform_indices = @transform_18, window_bounds = array<i64: 1, 1>}, {pipeline_mode = #tpu.pipeline_mode<synchronous>, transform_indices = @transform_19, window_bounds = array<i64: 441, 111>}, {pipeline_mode = #tpu.pipeline_mode<synchronous>, transform_indices = @transform_20, window_bounds = array<i64: 105, 27>}, {pipeline_mode = #tpu.pipeline_mode<synchronous>, transform_indices = @transform_21, window_bounds = array<i64: 27, 105>}, {pipeline_mode = #tpu.pipeline_mode<synchronous>, transform_indices = @transform_22, window_bounds = array<i64: 111, 441>}, {transform_indices = @transform_23, window_bounds = array<i64: 1, 4, 448>}]} {
    %c0 = arith.constant 0 : index
    %c0_0 = arith.constant 0 : index
    %c0_1 = arith.constant 0 : index
    %0 = vector.load %arg1[%c0, %c0_0, %c0_1] : memref<1x4x448xf32, #tpu.memory_space<vmem>>, vector<1x4x448xf32>
    %1 = vector.shape_cast %0 : vector<1x4x448xf32> to vector<4x448xf32>
    %c0_2 = arith.constant 0 : index
    %c0_3 = arith.constant 0 : index
    %c0_4 = arith.constant 0 : index
    %2 = vector.load %arg2[%c0_2, %c0_3, %c0_4] : memref<7x4x1xf32, #tpu.memory_space<vmem>>, vector<1x4x1xf32>
    %3 = vector.shape_cast %2 : vector<1x4x1xf32> to vector<4x1xf32>
    %4 = vector.extract_strided_slice %1 {offsets = [0, 0], sizes = [1, 447], strides = [1, 1]} : vector<4x448xf32> to vector<1x447xf32>
    %5 = vector.broadcast %3 : vector<4x1xf32> to vector<4x447xf32>
    %6 = vector.broadcast %4 : vector<1x447xf32> to vector<4x447xf32>
    %7 = arith.mulf %5, %6 : vector<4x447xf32>
    %c1 = arith.constant 1 : index
    %c0_5 = arith.constant 0 : index
    %c0_6 = arith.constant 0 : index
    %8 = vector.load %arg2[%c1, %c0_5, %c0_6] : memref<7x4x1xf32, #tpu.memory_space<vmem>>, vector<1x4x1xf32>
    %9 = vector.shape_cast %8 : vector<1x4x1xf32> to vector<4x1xf32>
    %10 = vector.extract_strided_slice %1 {offsets = [1, 0], sizes = [1, 447], strides = [1, 1]} : vector<4x448xf32> to vector<1x447xf32>
    %11 = vector.broadcast %9 : vector<4x1xf32> to vector<4x447xf32>
    %12 = vector.broadcast %10 : vector<1x447xf32> to vector<4x447xf32>
    %13 = arith.mulf %11, %12 : vector<4x447xf32>
    %14 = arith.addf %7, %13 : vector<4x447xf32>
    %c2 = arith.constant 2 : index
    %c0_7 = arith.constant 0 : index
    %c0_8 = arith.constant 0 : index
    %15 = vector.load %arg2[%c2, %c0_7, %c0_8] : memref<7x4x1xf32, #tpu.memory_space<vmem>>, vector<1x4x1xf32>
    %16 = vector.shape_cast %15 : vector<1x4x1xf32> to vector<4x1xf32>
    %17 = vector.extract_strided_slice %1 {offsets = [2, 0], sizes = [1, 447], strides = [1, 1]} : vector<4x448xf32> to vector<1x447xf32>
    %18 = vector.broadcast %16 : vector<4x1xf32> to vector<4x447xf32>
    %19 = vector.broadcast %17 : vector<1x447xf32> to vector<4x447xf32>
    %20 = arith.mulf %18, %19 : vector<4x447xf32>
    %21 = arith.addf %14, %20 : vector<4x447xf32>
    %c3 = arith.constant 3 : index
    %c0_9 = arith.constant 0 : index
    %c0_10 = arith.constant 0 : index
    %22 = vector.load %arg2[%c3, %c0_9, %c0_10] : memref<7x4x1xf32, #tpu.memory_space<vmem>>, vector<1x4x1xf32>
    %23 = vector.shape_cast %22 : vector<1x4x1xf32> to vector<4x1xf32>
    %24 = vector.extract_strided_slice %1 {offsets = [3, 0], sizes = [1, 447], strides = [1, 1]} : vector<4x448xf32> to vector<1x447xf32>
    %25 = vector.broadcast %23 : vector<4x1xf32> to vector<4x447xf32>
    %26 = vector.broadcast %24 : vector<1x447xf32> to vector<4x447xf32>
    %27 = arith.mulf %25, %26 : vector<4x447xf32>
    %28 = arith.addf %21, %27 : vector<4x447xf32>
    %c4 = arith.constant 4 : index
    %c0_11 = arith.constant 0 : index
    %c0_12 = arith.constant 0 : index
    %29 = vector.load %arg2[%c4, %c0_11, %c0_12] : memref<7x4x1xf32, #tpu.memory_space<vmem>>, vector<1x4x1xf32>
    %30 = vector.shape_cast %29 : vector<1x4x1xf32> to vector<4x1xf32>
    %31 = vector.extract_strided_slice %1 {offsets = [0, 1], sizes = [1, 447], strides = [1, 1]} : vector<4x448xf32> to vector<1x447xf32>
    %32 = vector.broadcast %30 : vector<4x1xf32> to vector<4x447xf32>
    %33 = vector.broadcast %31 : vector<1x447xf32> to vector<4x447xf32>
    %34 = arith.mulf %32, %33 : vector<4x447xf32>
    %35 = arith.addf %28, %34 : vector<4x447xf32>
    %c5 = arith.constant 5 : index
    %c0_13 = arith.constant 0 : index
    %c0_14 = arith.constant 0 : index
    %36 = vector.load %arg2[%c5, %c0_13, %c0_14] : memref<7x4x1xf32, #tpu.memory_space<vmem>>, vector<1x4x1xf32>
    %37 = vector.shape_cast %36 : vector<1x4x1xf32> to vector<4x1xf32>
    %38 = vector.extract_strided_slice %1 {offsets = [1, 1], sizes = [1, 447], strides = [1, 1]} : vector<4x448xf32> to vector<1x447xf32>
    %39 = vector.broadcast %37 : vector<4x1xf32> to vector<4x447xf32>
    %40 = vector.broadcast %38 : vector<1x447xf32> to vector<4x447xf32>
    %41 = arith.mulf %39, %40 : vector<4x447xf32>
    %42 = arith.addf %35, %41 : vector<4x447xf32>
    %c6 = arith.constant 6 : index
    %c0_15 = arith.constant 0 : index
    %c0_16 = arith.constant 0 : index
    %43 = vector.load %arg2[%c6, %c0_15, %c0_16] : memref<7x4x1xf32, #tpu.memory_space<vmem>>, vector<1x4x1xf32>
    %44 = vector.shape_cast %43 : vector<1x4x1xf32> to vector<4x1xf32>
    %45 = vector.extract_strided_slice %1 {offsets = [2, 1], sizes = [1, 447], strides = [1, 1]} : vector<4x448xf32> to vector<1x447xf32>
    %46 = vector.broadcast %44 : vector<4x1xf32> to vector<4x447xf32>
    %47 = vector.broadcast %45 : vector<1x447xf32> to vector<4x447xf32>
    %48 = arith.mulf %46, %47 : vector<4x447xf32>
    %49 = arith.addf %42, %48 : vector<4x447xf32>
    %c0_17 = arith.constant 0 : index
    %c0_18 = arith.constant 0 : index
    %50 = vector.load %arg3[%c0_17, %c0_18] : memref<4x1xf32, #tpu.memory_space<vmem>>, vector<4x1xf32>
    %51 = vector.broadcast %50 : vector<4x1xf32> to vector<4x447xf32>
    %52 = arith.addf %49, %51 : vector<4x447xf32>
    %cst = arith.constant 0.000000e+00 : f32
    %53 = vector.broadcast %cst : f32 to vector<4x447xf32>
    %54 = arith.maximumf %52, %53 : vector<4x447xf32>
    %c0_19 = arith.constant 0 : index
    %c0_20 = arith.constant 0 : index
    %c0_21 = arith.constant 0 : index
    %55 = vector.load %arg4[%c0_19, %c0_20, %c0_21] : memref<7x8x4xf32, #tpu.memory_space<vmem>>, vector<1x8x4xf32>
    %56 = vector.shape_cast %55 : vector<1x8x4xf32> to vector<8x4xf32>
    %57 = vector.extract_strided_slice %54 {offsets = [0, 0], sizes = [4, 441], strides = [1, 1]} : vector<4x447xf32> to vector<4x441xf32>
    %cst_22 = arith.constant dense<0.000000e+00> : vector<8x441xf32>
    %58 = tpu.matmul %56, %57, %cst_22 {dimension_numbers = #tpu.dot_dimension_numbers<[1], [0], [0], [1], [0, 0, 1, 1], [], []>} : vector<8x4xf32>, vector<4x441xf32>, vector<8x441xf32> -> vector<8x441xf32>
    %c1_23 = arith.constant 1 : index
    %c0_24 = arith.constant 0 : index
    %c0_25 = arith.constant 0 : index
    %59 = vector.load %arg4[%c1_23, %c0_24, %c0_25] : memref<7x8x4xf32, #tpu.memory_space<vmem>>, vector<1x8x4xf32>
    %60 = vector.shape_cast %59 : vector<1x8x4xf32> to vector<8x4xf32>
    %61 = vector.extract_strided_slice %54 {offsets = [0, 1], sizes = [4, 441], strides = [1, 1]} : vector<4x447xf32> to vector<4x441xf32>
    %cst_26 = arith.constant dense<0.000000e+00> : vector<8x441xf32>
    %62 = tpu.matmul %60, %61, %cst_26 {dimension_numbers = #tpu.dot_dimension_numbers<[1], [0], [0], [1], [0, 0, 1, 1], [], []>} : vector<8x4xf32>, vector<4x441xf32>, vector<8x441xf32> -> vector<8x441xf32>
    %63 = arith.addf %58, %62 : vector<8x441xf32>
    %c2_27 = arith.constant 2 : index
    %c0_28 = arith.constant 0 : index
    %c0_29 = arith.constant 0 : index
    %64 = vector.load %arg4[%c2_27, %c0_28, %c0_29] : memref<7x8x4xf32, #tpu.memory_space<vmem>>, vector<1x8x4xf32>
    %65 = vector.shape_cast %64 : vector<1x8x4xf32> to vector<8x4xf32>
    %66 = vector.extract_strided_slice %54 {offsets = [0, 2], sizes = [4, 441], strides = [1, 1]} : vector<4x447xf32> to vector<4x441xf32>
    %cst_30 = arith.constant dense<0.000000e+00> : vector<8x441xf32>
    %67 = tpu.matmul %65, %66, %cst_30 {dimension_numbers = #tpu.dot_dimension_numbers<[1], [0], [0], [1], [0, 0, 1, 1], [], []>} : vector<8x4xf32>, vector<4x441xf32>, vector<8x441xf32> -> vector<8x441xf32>
    %68 = arith.addf %63, %67 : vector<8x441xf32>
    %c3_31 = arith.constant 3 : index
    %c0_32 = arith.constant 0 : index
    %c0_33 = arith.constant 0 : index
    %69 = vector.load %arg4[%c3_31, %c0_32, %c0_33] : memref<7x8x4xf32, #tpu.memory_space<vmem>>, vector<1x8x4xf32>
    %70 = vector.shape_cast %69 : vector<1x8x4xf32> to vector<8x4xf32>
    %71 = vector.extract_strided_slice %54 {offsets = [0, 3], sizes = [4, 441], strides = [1, 1]} : vector<4x447xf32> to vector<4x441xf32>
    %cst_34 = arith.constant dense<0.000000e+00> : vector<8x441xf32>
    %72 = tpu.matmul %70, %71, %cst_34 {dimension_numbers = #tpu.dot_dimension_numbers<[1], [0], [0], [1], [0, 0, 1, 1], [], []>} : vector<8x4xf32>, vector<4x441xf32>, vector<8x441xf32> -> vector<8x441xf32>
    %73 = arith.addf %68, %72 : vector<8x441xf32>
    %c4_35 = arith.constant 4 : index
    %c0_36 = arith.constant 0 : index
    %c0_37 = arith.constant 0 : index
    %74 = vector.load %arg4[%c4_35, %c0_36, %c0_37] : memref<7x8x4xf32, #tpu.memory_space<vmem>>, vector<1x8x4xf32>
    %75 = vector.shape_cast %74 : vector<1x8x4xf32> to vector<8x4xf32>
    %76 = vector.extract_strided_slice %54 {offsets = [0, 4], sizes = [4, 441], strides = [1, 1]} : vector<4x447xf32> to vector<4x441xf32>
    %cst_38 = arith.constant dense<0.000000e+00> : vector<8x441xf32>
    %77 = tpu.matmul %75, %76, %cst_38 {dimension_numbers = #tpu.dot_dimension_numbers<[1], [0], [0], [1], [0, 0, 1, 1], [], []>} : vector<8x4xf32>, vector<4x441xf32>, vector<8x441xf32> -> vector<8x441xf32>
    %78 = arith.addf %73, %77 : vector<8x441xf32>
    %c5_39 = arith.constant 5 : index
    %c0_40 = arith.constant 0 : index
    %c0_41 = arith.constant 0 : index
    %79 = vector.load %arg4[%c5_39, %c0_40, %c0_41] : memref<7x8x4xf32, #tpu.memory_space<vmem>>, vector<1x8x4xf32>
    %80 = vector.shape_cast %79 : vector<1x8x4xf32> to vector<8x4xf32>
    %81 = vector.extract_strided_slice %54 {offsets = [0, 5], sizes = [4, 441], strides = [1, 1]} : vector<4x447xf32> to vector<4x441xf32>
    %cst_42 = arith.constant dense<0.000000e+00> : vector<8x441xf32>
    %82 = tpu.matmul %80, %81, %cst_42 {dimension_numbers = #tpu.dot_dimension_numbers<[1], [0], [0], [1], [0, 0, 1, 1], [], []>} : vector<8x4xf32>, vector<4x441xf32>, vector<8x441xf32> -> vector<8x441xf32>
    %83 = arith.addf %78, %82 : vector<8x441xf32>
    %c6_43 = arith.constant 6 : index
    %c0_44 = arith.constant 0 : index
    %c0_45 = arith.constant 0 : index
    %84 = vector.load %arg4[%c6_43, %c0_44, %c0_45] : memref<7x8x4xf32, #tpu.memory_space<vmem>>, vector<1x8x4xf32>
    %85 = vector.shape_cast %84 : vector<1x8x4xf32> to vector<8x4xf32>
    %86 = vector.extract_strided_slice %54 {offsets = [0, 6], sizes = [4, 441], strides = [1, 1]} : vector<4x447xf32> to vector<4x441xf32>
    %cst_46 = arith.constant dense<0.000000e+00> : vector<8x441xf32>
    %87 = tpu.matmul %85, %86, %cst_46 {dimension_numbers = #tpu.dot_dimension_numbers<[1], [0], [0], [1], [0, 0, 1, 1], [], []>} : vector<8x4xf32>, vector<4x441xf32>, vector<8x441xf32> -> vector<8x441xf32>
    %88 = arith.addf %83, %87 : vector<8x441xf32>
    %c0_47 = arith.constant 0 : index
    %c0_48 = arith.constant 0 : index
    %89 = vector.load %arg20[%c0_47, %c0_48] : memref<441x111xf32, #tpu.memory_space<vmem>>, vector<441x111xf32>
    %cst_49 = arith.constant dense<0.000000e+00> : vector<8x111xf32>
    %90 = tpu.matmul %88, %89, %cst_49 {dimension_numbers = #tpu.dot_dimension_numbers<[1], [0], [0], [1], [0, 0, 1, 1], [], []>} : vector<8x441xf32>, vector<441x111xf32>, vector<8x111xf32> -> vector<8x111xf32>
    %c0_50 = arith.constant 0 : index
    %c0_51 = arith.constant 0 : index
    %91 = vector.load %arg5[%c0_50, %c0_51] : memref<8x1xf32, #tpu.memory_space<vmem>>, vector<8x1xf32>
    %92 = vector.broadcast %91 : vector<8x1xf32> to vector<8x111xf32>
    %93 = arith.addf %90, %92 : vector<8x111xf32>
    %cst_52 = arith.constant 0.000000e+00 : f32
    %94 = vector.broadcast %cst_52 : f32 to vector<8x111xf32>
    %95 = arith.maximumf %93, %94 : vector<8x111xf32>
    %c0_53 = arith.constant 0 : index
    %c0_54 = arith.constant 0 : index
    %c0_55 = arith.constant 0 : index
    %96 = vector.load %arg6[%c0_53, %c0_54, %c0_55] : memref<7x16x8xf32, #tpu.memory_space<vmem>>, vector<1x16x8xf32>
    %97 = vector.shape_cast %96 : vector<1x16x8xf32> to vector<16x8xf32>
    %98 = vector.extract_strided_slice %95 {offsets = [0, 0], sizes = [8, 105], strides = [1, 1]} : vector<8x111xf32> to vector<8x105xf32>
    %cst_56 = arith.constant dense<0.000000e+00> : vector<16x105xf32>
    %99 = tpu.matmul %97, %98, %cst_56 {dimension_numbers = #tpu.dot_dimension_numbers<[1], [0], [0], [1], [0, 0, 1, 1], [], []>} : vector<16x8xf32>, vector<8x105xf32>, vector<16x105xf32> -> vector<16x105xf32>
    %c1_57 = arith.constant 1 : index
    %c0_58 = arith.constant 0 : index
    %c0_59 = arith.constant 0 : index
    %100 = vector.load %arg6[%c1_57, %c0_58, %c0_59] : memref<7x16x8xf32, #tpu.memory_space<vmem>>, vector<1x16x8xf32>
    %101 = vector.shape_cast %100 : vector<1x16x8xf32> to vector<16x8xf32>
    %102 = vector.extract_strided_slice %95 {offsets = [0, 1], sizes = [8, 105], strides = [1, 1]} : vector<8x111xf32> to vector<8x105xf32>
    %cst_60 = arith.constant dense<0.000000e+00> : vector<16x105xf32>
    %103 = tpu.matmul %101, %102, %cst_60 {dimension_numbers = #tpu.dot_dimension_numbers<[1], [0], [0], [1], [0, 0, 1, 1], [], []>} : vector<16x8xf32>, vector<8x105xf32>, vector<16x105xf32> -> vector<16x105xf32>
    %104 = arith.addf %99, %103 : vector<16x105xf32>
    %c2_61 = arith.constant 2 : index
    %c0_62 = arith.constant 0 : index
    %c0_63 = arith.constant 0 : index
    %105 = vector.load %arg6[%c2_61, %c0_62, %c0_63] : memref<7x16x8xf32, #tpu.memory_space<vmem>>, vector<1x16x8xf32>
    %106 = vector.shape_cast %105 : vector<1x16x8xf32> to vector<16x8xf32>
    %107 = vector.extract_strided_slice %95 {offsets = [0, 2], sizes = [8, 105], strides = [1, 1]} : vector<8x111xf32> to vector<8x105xf32>
    %cst_64 = arith.constant dense<0.000000e+00> : vector<16x105xf32>
    %108 = tpu.matmul %106, %107, %cst_64 {dimension_numbers = #tpu.dot_dimension_numbers<[1], [0], [0], [1], [0, 0, 1, 1], [], []>} : vector<16x8xf32>, vector<8x105xf32>, vector<16x105xf32> -> vector<16x105xf32>
    %109 = arith.addf %104, %108 : vector<16x105xf32>
    %c3_65 = arith.constant 3 : index
    %c0_66 = arith.constant 0 : index
    %c0_67 = arith.constant 0 : index
    %110 = vector.load %arg6[%c3_65, %c0_66, %c0_67] : memref<7x16x8xf32, #tpu.memory_space<vmem>>, vector<1x16x8xf32>
    %111 = vector.shape_cast %110 : vector<1x16x8xf32> to vector<16x8xf32>
    %112 = vector.extract_strided_slice %95 {offsets = [0, 3], sizes = [8, 105], strides = [1, 1]} : vector<8x111xf32> to vector<8x105xf32>
    %cst_68 = arith.constant dense<0.000000e+00> : vector<16x105xf32>
    %113 = tpu.matmul %111, %112, %cst_68 {dimension_numbers = #tpu.dot_dimension_numbers<[1], [0], [0], [1], [0, 0, 1, 1], [], []>} : vector<16x8xf32>, vector<8x105xf32>, vector<16x105xf32> -> vector<16x105xf32>
    %114 = arith.addf %109, %113 : vector<16x105xf32>
    %c4_69 = arith.constant 4 : index
    %c0_70 = arith.constant 0 : index
    %c0_71 = arith.constant 0 : index
    %115 = vector.load %arg6[%c4_69, %c0_70, %c0_71] : memref<7x16x8xf32, #tpu.memory_space<vmem>>, vector<1x16x8xf32>
    %116 = vector.shape_cast %115 : vector<1x16x8xf32> to vector<16x8xf32>
    %117 = vector.extract_strided_slice %95 {offsets = [0, 4], sizes = [8, 105], strides = [1, 1]} : vector<8x111xf32> to vector<8x105xf32>
    %cst_72 = arith.constant dense<0.000000e+00> : vector<16x105xf32>
    %118 = tpu.matmul %116, %117, %cst_72 {dimension_numbers = #tpu.dot_dimension_numbers<[1], [0], [0], [1], [0, 0, 1, 1], [], []>} : vector<16x8xf32>, vector<8x105xf32>, vector<16x105xf32> -> vector<16x105xf32>
    %119 = arith.addf %114, %118 : vector<16x105xf32>
    %c5_73 = arith.constant 5 : index
    %c0_74 = arith.constant 0 : index
    %c0_75 = arith.constant 0 : index
    %120 = vector.load %arg6[%c5_73, %c0_74, %c0_75] : memref<7x16x8xf32, #tpu.memory_space<vmem>>, vector<1x16x8xf32>
    %121 = vector.shape_cast %120 : vector<1x16x8xf32> to vector<16x8xf32>
    %122 = vector.extract_strided_slice %95 {offsets = [0, 5], sizes = [8, 105], strides = [1, 1]} : vector<8x111xf32> to vector<8x105xf32>
    %cst_76 = arith.constant dense<0.000000e+00> : vector<16x105xf32>
    %123 = tpu.matmul %121, %122, %cst_76 {dimension_numbers = #tpu.dot_dimension_numbers<[1], [0], [0], [1], [0, 0, 1, 1], [], []>} : vector<16x8xf32>, vector<8x105xf32>, vector<16x105xf32> -> vector<16x105xf32>
    %124 = arith.addf %119, %123 : vector<16x105xf32>
    %c6_77 = arith.constant 6 : index
    %c0_78 = arith.constant 0 : index
    %c0_79 = arith.constant 0 : index
    %125 = vector.load %arg6[%c6_77, %c0_78, %c0_79] : memref<7x16x8xf32, #tpu.memory_space<vmem>>, vector<1x16x8xf32>
    %126 = vector.shape_cast %125 : vector<1x16x8xf32> to vector<16x8xf32>
    %127 = vector.extract_strided_slice %95 {offsets = [0, 6], sizes = [8, 105], strides = [1, 1]} : vector<8x111xf32> to vector<8x105xf32>
    %cst_80 = arith.constant dense<0.000000e+00> : vector<16x105xf32>
    %128 = tpu.matmul %126, %127, %cst_80 {dimension_numbers = #tpu.dot_dimension_numbers<[1], [0], [0], [1], [0, 0, 1, 1], [], []>} : vector<16x8xf32>, vector<8x105xf32>, vector<16x105xf32> -> vector<16x105xf32>
    %129 = arith.addf %124, %128 : vector<16x105xf32>
    %c0_81 = arith.constant 0 : index
    %c0_82 = arith.constant 0 : index
    %130 = vector.load %arg21[%c0_81, %c0_82] : memref<105x27xf32, #tpu.memory_space<vmem>>, vector<105x27xf32>
    %cst_83 = arith.constant dense<0.000000e+00> : vector<16x27xf32>
    %131 = tpu.matmul %129, %130, %cst_83 {dimension_numbers = #tpu.dot_dimension_numbers<[1], [0], [0], [1], [0, 0, 1, 1], [], []>} : vector<16x105xf32>, vector<105x27xf32>, vector<16x27xf32> -> vector<16x27xf32>
    %c0_84 = arith.constant 0 : index
    %c0_85 = arith.constant 0 : index
    %132 = vector.load %arg7[%c0_84, %c0_85] : memref<16x1xf32, #tpu.memory_space<vmem>>, vector<16x1xf32>
    %133 = vector.broadcast %132 : vector<16x1xf32> to vector<16x27xf32>
    %134 = arith.addf %131, %133 : vector<16x27xf32>
    %cst_86 = arith.constant 0.000000e+00 : f32
    %135 = vector.broadcast %cst_86 : f32 to vector<16x27xf32>
    %136 = arith.maximumf %134, %135 : vector<16x27xf32>
    %c0_87 = arith.constant 0 : index
    %c0_88 = arith.constant 0 : index
    %137 = vector.load %arg9[%c0_87, %c0_88] : memref<1x32xf32, #tpu.memory_space<vmem>>, vector<1x32xf32>
    %138 = vector.extract_strided_slice %136 {offsets = [0, 0], sizes = [1, 27], strides = [1, 1]} : vector<16x27xf32> to vector<1x27xf32>
    %c0_89 = arith.constant 0 : index
    %c0_90 = arith.constant 0 : index
    %c0_91 = arith.constant 0 : index
    %139 = vector.load %arg8[%c0_89, %c0_90, %c0_91] : memref<16x27x32xf32, #tpu.memory_space<vmem>>, vector<1x27x32xf32>
    %140 = vector.shape_cast %139 : vector<1x27x32xf32> to vector<27x32xf32>
    %cst_92 = arith.constant dense<0.000000e+00> : vector<1x32xf32>
    %141 = tpu.matmul %138, %140, %cst_92 {dimension_numbers = #tpu.dot_dimension_numbers<[1], [0], [0], [1], [0, 0, 1, 1], [], []>} : vector<1x27xf32>, vector<27x32xf32>, vector<1x32xf32> -> vector<1x32xf32>
    %142 = arith.addf %137, %141 : vector<1x32xf32>
    %143 = vector.extract_strided_slice %136 {offsets = [1, 0], sizes = [1, 27], strides = [1, 1]} : vector<16x27xf32> to vector<1x27xf32>
    %c1_93 = arith.constant 1 : index
    %c0_94 = arith.constant 0 : index
    %c0_95 = arith.constant 0 : index
    %144 = vector.load %arg8[%c1_93, %c0_94, %c0_95] : memref<16x27x32xf32, #tpu.memory_space<vmem>>, vector<1x27x32xf32>
    %145 = vector.shape_cast %144 : vector<1x27x32xf32> to vector<27x32xf32>
    %cst_96 = arith.constant dense<0.000000e+00> : vector<1x32xf32>
    %146 = tpu.matmul %143, %145, %cst_96 {dimension_numbers = #tpu.dot_dimension_numbers<[1], [0], [0], [1], [0, 0, 1, 1], [], []>} : vector<1x27xf32>, vector<27x32xf32>, vector<1x32xf32> -> vector<1x32xf32>
    %147 = arith.addf %142, %146 : vector<1x32xf32>
    %148 = vector.extract_strided_slice %136 {offsets = [2, 0], sizes = [1, 27], strides = [1, 1]} : vector<16x27xf32> to vector<1x27xf32>
    %c2_97 = arith.constant 2 : index
    %c0_98 = arith.constant 0 : index
    %c0_99 = arith.constant 0 : index
    %149 = vector.load %arg8[%c2_97, %c0_98, %c0_99] : memref<16x27x32xf32, #tpu.memory_space<vmem>>, vector<1x27x32xf32>
    %150 = vector.shape_cast %149 : vector<1x27x32xf32> to vector<27x32xf32>
    %cst_100 = arith.constant dense<0.000000e+00> : vector<1x32xf32>
    %151 = tpu.matmul %148, %150, %cst_100 {dimension_numbers = #tpu.dot_dimension_numbers<[1], [0], [0], [1], [0, 0, 1, 1], [], []>} : vector<1x27xf32>, vector<27x32xf32>, vector<1x32xf32> -> vector<1x32xf32>
    %152 = arith.addf %147, %151 : vector<1x32xf32>
    %153 = vector.extract_strided_slice %136 {offsets = [3, 0], sizes = [1, 27], strides = [1, 1]} : vector<16x27xf32> to vector<1x27xf32>
    %c3_101 = arith.constant 3 : index
    %c0_102 = arith.constant 0 : index
    %c0_103 = arith.constant 0 : index
    %154 = vector.load %arg8[%c3_101, %c0_102, %c0_103] : memref<16x27x32xf32, #tpu.memory_space<vmem>>, vector<1x27x32xf32>
    %155 = vector.shape_cast %154 : vector<1x27x32xf32> to vector<27x32xf32>
    %cst_104 = arith.constant dense<0.000000e+00> : vector<1x32xf32>
    %156 = tpu.matmul %153, %155, %cst_104 {dimension_numbers = #tpu.dot_dimension_numbers<[1], [0], [0], [1], [0, 0, 1, 1], [], []>} : vector<1x27xf32>, vector<27x32xf32>, vector<1x32xf32> -> vector<1x32xf32>
    %157 = arith.addf %152, %156 : vector<1x32xf32>
    %158 = vector.extract_strided_slice %136 {offsets = [4, 0], sizes = [1, 27], strides = [1, 1]} : vector<16x27xf32> to vector<1x27xf32>
    %c4_105 = arith.constant 4 : index
    %c0_106 = arith.constant 0 : index
    %c0_107 = arith.constant 0 : index
    %159 = vector.load %arg8[%c4_105, %c0_106, %c0_107] : memref<16x27x32xf32, #tpu.memory_space<vmem>>, vector<1x27x32xf32>
    %160 = vector.shape_cast %159 : vector<1x27x32xf32> to vector<27x32xf32>
    %cst_108 = arith.constant dense<0.000000e+00> : vector<1x32xf32>
    %161 = tpu.matmul %158, %160, %cst_108 {dimension_numbers = #tpu.dot_dimension_numbers<[1], [0], [0], [1], [0, 0, 1, 1], [], []>} : vector<1x27xf32>, vector<27x32xf32>, vector<1x32xf32> -> vector<1x32xf32>
    %162 = arith.addf %157, %161 : vector<1x32xf32>
    %163 = vector.extract_strided_slice %136 {offsets = [5, 0], sizes = [1, 27], strides = [1, 1]} : vector<16x27xf32> to vector<1x27xf32>
    %c5_109 = arith.constant 5 : index
    %c0_110 = arith.constant 0 : index
    %c0_111 = arith.constant 0 : index
    %164 = vector.load %arg8[%c5_109, %c0_110, %c0_111] : memref<16x27x32xf32, #tpu.memory_space<vmem>>, vector<1x27x32xf32>
    %165 = vector.shape_cast %164 : vector<1x27x32xf32> to vector<27x32xf32>
    %cst_112 = arith.constant dense<0.000000e+00> : vector<1x32xf32>
    %166 = tpu.matmul %163, %165, %cst_112 {dimension_numbers = #tpu.dot_dimension_numbers<[1], [0], [0], [1], [0, 0, 1, 1], [], []>} : vector<1x27xf32>, vector<27x32xf32>, vector<1x32xf32> -> vector<1x32xf32>
    %167 = arith.addf %162, %166 : vector<1x32xf32>
    %168 = vector.extract_strided_slice %136 {offsets = [6, 0], sizes = [1, 27], strides = [1, 1]} : vector<16x27xf32> to vector<1x27xf32>
    %c6_113 = arith.constant 6 : index
    %c0_114 = arith.constant 0 : index
    %c0_115 = arith.constant 0 : index
    %169 = vector.load %arg8[%c6_113, %c0_114, %c0_115] : memref<16x27x32xf32, #tpu.memory_space<vmem>>, vector<1x27x32xf32>
    %170 = vector.shape_cast %169 : vector<1x27x32xf32> to vector<27x32xf32>
    %cst_116 = arith.constant dense<0.000000e+00> : vector<1x32xf32>
    %171 = tpu.matmul %168, %170, %cst_116 {dimension_numbers = #tpu.dot_dimension_numbers<[1], [0], [0], [1], [0, 0, 1, 1], [], []>} : vector<1x27xf32>, vector<27x32xf32>, vector<1x32xf32> -> vector<1x32xf32>
    %172 = arith.addf %167, %171 : vector<1x32xf32>
    %173 = vector.extract_strided_slice %136 {offsets = [7, 0], sizes = [1, 27], strides = [1, 1]} : vector<16x27xf32> to vector<1x27xf32>
    %c7 = arith.constant 7 : index
    %c0_117 = arith.constant 0 : index
    %c0_118 = arith.constant 0 : index
    %174 = vector.load %arg8[%c7, %c0_117, %c0_118] : memref<16x27x32xf32, #tpu.memory_space<vmem>>, vector<1x27x32xf32>
    %175 = vector.shape_cast %174 : vector<1x27x32xf32> to vector<27x32xf32>
    %cst_119 = arith.constant dense<0.000000e+00> : vector<1x32xf32>
    %176 = tpu.matmul %173, %175, %cst_119 {dimension_numbers = #tpu.dot_dimension_numbers<[1], [0], [0], [1], [0, 0, 1, 1], [], []>} : vector<1x27xf32>, vector<27x32xf32>, vector<1x32xf32> -> vector<1x32xf32>
    %177 = arith.addf %172, %176 : vector<1x32xf32>
    %178 = vector.extract_strided_slice %136 {offsets = [8, 0], sizes = [1, 27], strides = [1, 1]} : vector<16x27xf32> to vector<1x27xf32>
    %c8 = arith.constant 8 : index
    %c0_120 = arith.constant 0 : index
    %c0_121 = arith.constant 0 : index
    %179 = vector.load %arg8[%c8, %c0_120, %c0_121] : memref<16x27x32xf32, #tpu.memory_space<vmem>>, vector<1x27x32xf32>
    %180 = vector.shape_cast %179 : vector<1x27x32xf32> to vector<27x32xf32>
    %cst_122 = arith.constant dense<0.000000e+00> : vector<1x32xf32>
    %181 = tpu.matmul %178, %180, %cst_122 {dimension_numbers = #tpu.dot_dimension_numbers<[1], [0], [0], [1], [0, 0, 1, 1], [], []>} : vector<1x27xf32>, vector<27x32xf32>, vector<1x32xf32> -> vector<1x32xf32>
    %182 = arith.addf %177, %181 : vector<1x32xf32>
    %183 = vector.extract_strided_slice %136 {offsets = [9, 0], sizes = [1, 27], strides = [1, 1]} : vector<16x27xf32> to vector<1x27xf32>
    %c9 = arith.constant 9 : index
    %c0_123 = arith.constant 0 : index
    %c0_124 = arith.constant 0 : index
    %184 = vector.load %arg8[%c9, %c0_123, %c0_124] : memref<16x27x32xf32, #tpu.memory_space<vmem>>, vector<1x27x32xf32>
    %185 = vector.shape_cast %184 : vector<1x27x32xf32> to vector<27x32xf32>
    %cst_125 = arith.constant dense<0.000000e+00> : vector<1x32xf32>
    %186 = tpu.matmul %183, %185, %cst_125 {dimension_numbers = #tpu.dot_dimension_numbers<[1], [0], [0], [1], [0, 0, 1, 1], [], []>} : vector<1x27xf32>, vector<27x32xf32>, vector<1x32xf32> -> vector<1x32xf32>
    %187 = arith.addf %182, %186 : vector<1x32xf32>
    %188 = vector.extract_strided_slice %136 {offsets = [10, 0], sizes = [1, 27], strides = [1, 1]} : vector<16x27xf32> to vector<1x27xf32>
    %c10 = arith.constant 10 : index
    %c0_126 = arith.constant 0 : index
    %c0_127 = arith.constant 0 : index
    %189 = vector.load %arg8[%c10, %c0_126, %c0_127] : memref<16x27x32xf32, #tpu.memory_space<vmem>>, vector<1x27x32xf32>
    %190 = vector.shape_cast %189 : vector<1x27x32xf32> to vector<27x32xf32>
    %cst_128 = arith.constant dense<0.000000e+00> : vector<1x32xf32>
    %191 = tpu.matmul %188, %190, %cst_128 {dimension_numbers = #tpu.dot_dimension_numbers<[1], [0], [0], [1], [0, 0, 1, 1], [], []>} : vector<1x27xf32>, vector<27x32xf32>, vector<1x32xf32> -> vector<1x32xf32>
    %192 = arith.addf %187, %191 : vector<1x32xf32>
    %193 = vector.extract_strided_slice %136 {offsets = [11, 0], sizes = [1, 27], strides = [1, 1]} : vector<16x27xf32> to vector<1x27xf32>
    %c11 = arith.constant 11 : index
    %c0_129 = arith.constant 0 : index
    %c0_130 = arith.constant 0 : index
    %194 = vector.load %arg8[%c11, %c0_129, %c0_130] : memref<16x27x32xf32, #tpu.memory_space<vmem>>, vector<1x27x32xf32>
    %195 = vector.shape_cast %194 : vector<1x27x32xf32> to vector<27x32xf32>
    %cst_131 = arith.constant dense<0.000000e+00> : vector<1x32xf32>
    %196 = tpu.matmul %193, %195, %cst_131 {dimension_numbers = #tpu.dot_dimension_numbers<[1], [0], [0], [1], [0, 0, 1, 1], [], []>} : vector<1x27xf32>, vector<27x32xf32>, vector<1x32xf32> -> vector<1x32xf32>
    %197 = arith.addf %192, %196 : vector<1x32xf32>
    %198 = vector.extract_strided_slice %136 {offsets = [12, 0], sizes = [1, 27], strides = [1, 1]} : vector<16x27xf32> to vector<1x27xf32>
    %c12 = arith.constant 12 : index
    %c0_132 = arith.constant 0 : index
    %c0_133 = arith.constant 0 : index
    %199 = vector.load %arg8[%c12, %c0_132, %c0_133] : memref<16x27x32xf32, #tpu.memory_space<vmem>>, vector<1x27x32xf32>
    %200 = vector.shape_cast %199 : vector<1x27x32xf32> to vector<27x32xf32>
    %cst_134 = arith.constant dense<0.000000e+00> : vector<1x32xf32>
    %201 = tpu.matmul %198, %200, %cst_134 {dimension_numbers = #tpu.dot_dimension_numbers<[1], [0], [0], [1], [0, 0, 1, 1], [], []>} : vector<1x27xf32>, vector<27x32xf32>, vector<1x32xf32> -> vector<1x32xf32>
    %202 = arith.addf %197, %201 : vector<1x32xf32>
    %203 = vector.extract_strided_slice %136 {offsets = [13, 0], sizes = [1, 27], strides = [1, 1]} : vector<16x27xf32> to vector<1x27xf32>
    %c13 = arith.constant 13 : index
    %c0_135 = arith.constant 0 : index
    %c0_136 = arith.constant 0 : index
    %204 = vector.load %arg8[%c13, %c0_135, %c0_136] : memref<16x27x32xf32, #tpu.memory_space<vmem>>, vector<1x27x32xf32>
    %205 = vector.shape_cast %204 : vector<1x27x32xf32> to vector<27x32xf32>
    %cst_137 = arith.constant dense<0.000000e+00> : vector<1x32xf32>
    %206 = tpu.matmul %203, %205, %cst_137 {dimension_numbers = #tpu.dot_dimension_numbers<[1], [0], [0], [1], [0, 0, 1, 1], [], []>} : vector<1x27xf32>, vector<27x32xf32>, vector<1x32xf32> -> vector<1x32xf32>
    %207 = arith.addf %202, %206 : vector<1x32xf32>
    %208 = vector.extract_strided_slice %136 {offsets = [14, 0], sizes = [1, 27], strides = [1, 1]} : vector<16x27xf32> to vector<1x27xf32>
    %c14 = arith.constant 14 : index
    %c0_138 = arith.constant 0 : index
    %c0_139 = arith.constant 0 : index
    %209 = vector.load %arg8[%c14, %c0_138, %c0_139] : memref<16x27x32xf32, #tpu.memory_space<vmem>>, vector<1x27x32xf32>
    %210 = vector.shape_cast %209 : vector<1x27x32xf32> to vector<27x32xf32>
    %cst_140 = arith.constant dense<0.000000e+00> : vector<1x32xf32>
    %211 = tpu.matmul %208, %210, %cst_140 {dimension_numbers = #tpu.dot_dimension_numbers<[1], [0], [0], [1], [0, 0, 1, 1], [], []>} : vector<1x27xf32>, vector<27x32xf32>, vector<1x32xf32> -> vector<1x32xf32>
    %212 = arith.addf %207, %211 : vector<1x32xf32>
    %213 = vector.extract_strided_slice %136 {offsets = [15, 0], sizes = [1, 27], strides = [1, 1]} : vector<16x27xf32> to vector<1x27xf32>
    %c15 = arith.constant 15 : index
    %c0_141 = arith.constant 0 : index
    %c0_142 = arith.constant 0 : index
    %214 = vector.load %arg8[%c15, %c0_141, %c0_142] : memref<16x27x32xf32, #tpu.memory_space<vmem>>, vector<1x27x32xf32>
    %215 = vector.shape_cast %214 : vector<1x27x32xf32> to vector<27x32xf32>
    %cst_143 = arith.constant dense<0.000000e+00> : vector<1x32xf32>
    %216 = tpu.matmul %213, %215, %cst_143 {dimension_numbers = #tpu.dot_dimension_numbers<[1], [0], [0], [1], [0, 0, 1, 1], [], []>} : vector<1x27xf32>, vector<27x32xf32>, vector<1x32xf32> -> vector<1x32xf32>
    %217 = arith.addf %212, %216 : vector<1x32xf32>
    %c0_144 = arith.constant 0 : index
    %c0_145 = arith.constant 0 : index
    %c0_146 = arith.constant 0 : index
    %218 = vector.load %arg10[%c0_144, %c0_145, %c0_146] : memref<16x32x27xf32, #tpu.memory_space<vmem>>, vector<1x32x27xf32>
    %219 = vector.shape_cast %218 : vector<1x32x27xf32> to vector<32x27xf32>
    %cst_147 = arith.constant dense<0.000000e+00> : vector<1x27xf32>
    %220 = tpu.matmul %217, %219, %cst_147 {dimension_numbers = #tpu.dot_dimension_numbers<[1], [0], [0], [1], [0, 0, 1, 1], [], []>} : vector<1x32xf32>, vector<32x27xf32>, vector<1x27xf32> -> vector<1x27xf32>
    %c0_148 = arith.constant 0 : index
    %c0_149 = arith.constant 0 : index
    %221 = vector.load %arg11[%c0_148, %c0_149] : memref<16x27xf32, #tpu.memory_space<vmem>>, vector<1x27xf32>
    %222 = arith.addf %220, %221 : vector<1x27xf32>
    %c0_150 = arith.constant 0 : index
    %c0_151 = arith.constant 0 : index
    %223 = vector.load %arg25[%c0_150, %c0_151] : memref<16x27xf32, #tpu.memory_space<vmem>>, vector<1x27xf32>
    tpu.vector_store %arg25[%c0_150, %c0_151], %222 {strides = array<i32>} : memref<16x27xf32, #tpu.memory_space<vmem>>, vector<1x27xf32>,
    %c1_152 = arith.constant 1 : index
    %c0_153 = arith.constant 0 : index
    %c0_154 = arith.constant 0 : index
    %224 = vector.load %arg10[%c1_152, %c0_153, %c0_154] : memref<16x32x27xf32, #tpu.memory_space<vmem>>, vector<1x32x27xf32>
    %225 = vector.shape_cast %224 : vector<1x32x27xf32> to vector<32x27xf32>
    %cst_155 = arith.constant dense<0.000000e+00> : vector<1x27xf32>
    %226 = tpu.matmul %217, %225, %cst_155 {dimension_numbers = #tpu.dot_dimension_numbers<[1], [0], [0], [1], [0, 0, 1, 1], [], []>} : vector<1x32xf32>, vector<32x27xf32>, vector<1x27xf32> -> vector<1x27xf32>
    %c1_156 = arith.constant 1 : index
    %c0_157 = arith.constant 0 : index
    %227 = vector.load %arg11[%c1_156, %c0_157] : memref<16x27xf32, #tpu.memory_space<vmem>>, vector<1x27xf32>
    %228 = arith.addf %226, %227 : vector<1x27xf32>
    %c1_158 = arith.constant 1 : index
    %c0_159 = arith.constant 0 : index
    %229 = vector.load %arg25[%c1_158, %c0_159] : memref<16x27xf32, #tpu.memory_space<vmem>>, vector<1x27xf32>
    tpu.vector_store %arg25[%c1_158, %c0_159], %228 {strides = array<i32>} : memref<16x27xf32, #tpu.memory_space<vmem>>, vector<1x27xf32>,
    %c2_160 = arith.constant 2 : index
    %c0_161 = arith.constant 0 : index
    %c0_162 = arith.constant 0 : index
    %230 = vector.load %arg10[%c2_160, %c0_161, %c0_162] : memref<16x32x27xf32, #tpu.memory_space<vmem>>, vector<1x32x27xf32>
    %231 = vector.shape_cast %230 : vector<1x32x27xf32> to vector<32x27xf32>
    %cst_163 = arith.constant dense<0.000000e+00> : vector<1x27xf32>
    %232 = tpu.matmul %217, %231, %cst_163 {dimension_numbers = #tpu.dot_dimension_numbers<[1], [0], [0], [1], [0, 0, 1, 1], [], []>} : vector<1x32xf32>, vector<32x27xf32>, vector<1x27xf32> -> vector<1x27xf32>
    %c2_164 = arith.constant 2 : index
    %c0_165 = arith.constant 0 : index
    %233 = vector.load %arg11[%c2_164, %c0_165] : memref<16x27xf32, #tpu.memory_space<vmem>>, vector<1x27xf32>
    %234 = arith.addf %232, %233 : vector<1x27xf32>
    %c2_166 = arith.constant 2 : index
    %c0_167 = arith.constant 0 : index
    %235 = vector.load %arg25[%c2_166, %c0_167] : memref<16x27xf32, #tpu.memory_space<vmem>>, vector<1x27xf32>
    tpu.vector_store %arg25[%c2_166, %c0_167], %234 {strides = array<i32>} : memref<16x27xf32, #tpu.memory_space<vmem>>, vector<1x27xf32>,
    %c3_168 = arith.constant 3 : index
    %c0_169 = arith.constant 0 : index
    %c0_170 = arith.constant 0 : index
    %236 = vector.load %arg10[%c3_168, %c0_169, %c0_170] : memref<16x32x27xf32, #tpu.memory_space<vmem>>, vector<1x32x27xf32>
    %237 = vector.shape_cast %236 : vector<1x32x27xf32> to vector<32x27xf32>
    %cst_171 = arith.constant dense<0.000000e+00> : vector<1x27xf32>
    %238 = tpu.matmul %217, %237, %cst_171 {dimension_numbers = #tpu.dot_dimension_numbers<[1], [0], [0], [1], [0, 0, 1, 1], [], []>} : vector<1x32xf32>, vector<32x27xf32>, vector<1x27xf32> -> vector<1x27xf32>
    %c3_172 = arith.constant 3 : index
    %c0_173 = arith.constant 0 : index
    %239 = vector.load %arg11[%c3_172, %c0_173] : memref<16x27xf32, #tpu.memory_space<vmem>>, vector<1x27xf32>
    %240 = arith.addf %238, %239 : vector<1x27xf32>
    %c3_174 = arith.constant 3 : index
    %c0_175 = arith.constant 0 : index
    %241 = vector.load %arg25[%c3_174, %c0_175] : memref<16x27xf32, #tpu.memory_space<vmem>>, vector<1x27xf32>
    tpu.vector_store %arg25[%c3_174, %c0_175], %240 {strides = array<i32>} : memref<16x27xf32, #tpu.memory_space<vmem>>, vector<1x27xf32>,
    %c4_176 = arith.constant 4 : index
    %c0_177 = arith.constant 0 : index
    %c0_178 = arith.constant 0 : index
    %242 = vector.load %arg10[%c4_176, %c0_177, %c0_178] : memref<16x32x27xf32, #tpu.memory_space<vmem>>, vector<1x32x27xf32>
    %243 = vector.shape_cast %242 : vector<1x32x27xf32> to vector<32x27xf32>
    %cst_179 = arith.constant dense<0.000000e+00> : vector<1x27xf32>
    %244 = tpu.matmul %217, %243, %cst_179 {dimension_numbers = #tpu.dot_dimension_numbers<[1], [0], [0], [1], [0, 0, 1, 1], [], []>} : vector<1x32xf32>, vector<32x27xf32>, vector<1x27xf32> -> vector<1x27xf32>
    %c4_180 = arith.constant 4 : index
    %c0_181 = arith.constant 0 : index
    %245 = vector.load %arg11[%c4_180, %c0_181] : memref<16x27xf32, #tpu.memory_space<vmem>>, vector<1x27xf32>
    %246 = arith.addf %244, %245 : vector<1x27xf32>
    %c4_182 = arith.constant 4 : index
    %c0_183 = arith.constant 0 : index
    %247 = vector.load %arg25[%c4_182, %c0_183] : memref<16x27xf32, #tpu.memory_space<vmem>>, vector<1x27xf32>
    tpu.vector_store %arg25[%c4_182, %c0_183], %246 {strides = array<i32>} : memref<16x27xf32, #tpu.memory_space<vmem>>, vector<1x27xf32>,
    %c5_184 = arith.constant 5 : index
    %c0_185 = arith.constant 0 : index
    %c0_186 = arith.constant 0 : index
    %248 = vector.load %arg10[%c5_184, %c0_185, %c0_186] : memref<16x32x27xf32, #tpu.memory_space<vmem>>, vector<1x32x27xf32>
    %249 = vector.shape_cast %248 : vector<1x32x27xf32> to vector<32x27xf32>
    %cst_187 = arith.constant dense<0.000000e+00> : vector<1x27xf32>
    %250 = tpu.matmul %217, %249, %cst_187 {dimension_numbers = #tpu.dot_dimension_numbers<[1], [0], [0], [1], [0, 0, 1, 1], [], []>} : vector<1x32xf32>, vector<32x27xf32>, vector<1x27xf32> -> vector<1x27xf32>
    %c5_188 = arith.constant 5 : index
    %c0_189 = arith.constant 0 : index
    %251 = vector.load %arg11[%c5_188, %c0_189] : memref<16x27xf32, #tpu.memory_space<vmem>>, vector<1x27xf32>
    %252 = arith.addf %250, %251 : vector<1x27xf32>
    %c5_190 = arith.constant 5 : index
    %c0_191 = arith.constant 0 : index
    %253 = vector.load %arg25[%c5_190, %c0_191] : memref<16x27xf32, #tpu.memory_space<vmem>>, vector<1x27xf32>
    tpu.vector_store %arg25[%c5_190, %c0_191], %252 {strides = array<i32>} : memref<16x27xf32, #tpu.memory_space<vmem>>, vector<1x27xf32>,
    %c6_192 = arith.constant 6 : index
    %c0_193 = arith.constant 0 : index
    %c0_194 = arith.constant 0 : index
    %254 = vector.load %arg10[%c6_192, %c0_193, %c0_194] : memref<16x32x27xf32, #tpu.memory_space<vmem>>, vector<1x32x27xf32>
    %255 = vector.shape_cast %254 : vector<1x32x27xf32> to vector<32x27xf32>
    %cst_195 = arith.constant dense<0.000000e+00> : vector<1x27xf32>
    %256 = tpu.matmul %217, %255, %cst_195 {dimension_numbers = #tpu.dot_dimension_numbers<[1], [0], [0], [1], [0, 0, 1, 1], [], []>} : vector<1x32xf32>, vector<32x27xf32>, vector<1x27xf32> -> vector<1x27xf32>
    %c6_196 = arith.constant 6 : index
    %c0_197 = arith.constant 0 : index
    %257 = vector.load %arg11[%c6_196, %c0_197] : memref<16x27xf32, #tpu.memory_space<vmem>>, vector<1x27xf32>
    %258 = arith.addf %256, %257 : vector<1x27xf32>
    %c6_198 = arith.constant 6 : index
    %c0_199 = arith.constant 0 : index
    %259 = vector.load %arg25[%c6_198, %c0_199] : memref<16x27xf32, #tpu.memory_space<vmem>>, vector<1x27xf32>
    tpu.vector_store %arg25[%c6_198, %c0_199], %258 {strides = array<i32>} : memref<16x27xf32, #tpu.memory_space<vmem>>, vector<1x27xf32>,
    %c7_200 = arith.constant 7 : index
    %c0_201 = arith.constant 0 : index
    %c0_202 = arith.constant 0 : index
    %260 = vector.load %arg10[%c7_200, %c0_201, %c0_202] : memref<16x32x27xf32, #tpu.memory_space<vmem>>, vector<1x32x27xf32>
    %261 = vector.shape_cast %260 : vector<1x32x27xf32> to vector<32x27xf32>
    %cst_203 = arith.constant dense<0.000000e+00> : vector<1x27xf32>
    %262 = tpu.matmul %217, %261, %cst_203 {dimension_numbers = #tpu.dot_dimension_numbers<[1], [0], [0], [1], [0, 0, 1, 1], [], []>} : vector<1x32xf32>, vector<32x27xf32>, vector<1x27xf32> -> vector<1x27xf32>
    %c7_204 = arith.constant 7 : index
    %c0_205 = arith.constant 0 : index
    %263 = vector.load %arg11[%c7_204, %c0_205] : memref<16x27xf32, #tpu.memory_space<vmem>>, vector<1x27xf32>
    %264 = arith.addf %262, %263 : vector<1x27xf32>
    %c7_206 = arith.constant 7 : index
    %c0_207 = arith.constant 0 : index
    %265 = vector.load %arg25[%c7_206, %c0_207] : memref<16x27xf32, #tpu.memory_space<vmem>>, vector<1x27xf32>
    tpu.vector_store %arg25[%c7_206, %c0_207], %264 {strides = array<i32>} : memref<16x27xf32, #tpu.memory_space<vmem>>, vector<1x27xf32>,
    %c8_208 = arith.constant 8 : index
    %c0_209 = arith.constant 0 : index
    %c0_210 = arith.constant 0 : index
    %266 = vector.load %arg10[%c8_208, %c0_209, %c0_210] : memref<16x32x27xf32, #tpu.memory_space<vmem>>, vector<1x32x27xf32>
    %267 = vector.shape_cast %266 : vector<1x32x27xf32> to vector<32x27xf32>
    %cst_211 = arith.constant dense<0.000000e+00> : vector<1x27xf32>
    %268 = tpu.matmul %217, %267, %cst_211 {dimension_numbers = #tpu.dot_dimension_numbers<[1], [0], [0], [1], [0, 0, 1, 1], [], []>} : vector<1x32xf32>, vector<32x27xf32>, vector<1x27xf32> -> vector<1x27xf32>
    %c8_212 = arith.constant 8 : index
    %c0_213 = arith.constant 0 : index
    %269 = vector.load %arg11[%c8_212, %c0_213] : memref<16x27xf32, #tpu.memory_space<vmem>>, vector<1x27xf32>
    %270 = arith.addf %268, %269 : vector<1x27xf32>
    %c8_214 = arith.constant 8 : index
    %c0_215 = arith.constant 0 : index
    %271 = vector.load %arg25[%c8_214, %c0_215] : memref<16x27xf32, #tpu.memory_space<vmem>>, vector<1x27xf32>
    tpu.vector_store %arg25[%c8_214, %c0_215], %270 {strides = array<i32>} : memref<16x27xf32, #tpu.memory_space<vmem>>, vector<1x27xf32>,
    %c9_216 = arith.constant 9 : index
    %c0_217 = arith.constant 0 : index
    %c0_218 = arith.constant 0 : index
    %272 = vector.load %arg10[%c9_216, %c0_217, %c0_218] : memref<16x32x27xf32, #tpu.memory_space<vmem>>, vector<1x32x27xf32>
    %273 = vector.shape_cast %272 : vector<1x32x27xf32> to vector<32x27xf32>
    %cst_219 = arith.constant dense<0.000000e+00> : vector<1x27xf32>
    %274 = tpu.matmul %217, %273, %cst_219 {dimension_numbers = #tpu.dot_dimension_numbers<[1], [0], [0], [1], [0, 0, 1, 1], [], []>} : vector<1x32xf32>, vector<32x27xf32>, vector<1x27xf32> -> vector<1x27xf32>
    %c9_220 = arith.constant 9 : index
    %c0_221 = arith.constant 0 : index
    %275 = vector.load %arg11[%c9_220, %c0_221] : memref<16x27xf32, #tpu.memory_space<vmem>>, vector<1x27xf32>
    %276 = arith.addf %274, %275 : vector<1x27xf32>
    %c9_222 = arith.constant 9 : index
    %c0_223 = arith.constant 0 : index
    %277 = vector.load %arg25[%c9_222, %c0_223] : memref<16x27xf32, #tpu.memory_space<vmem>>, vector<1x27xf32>
    tpu.vector_store %arg25[%c9_222, %c0_223], %276 {strides = array<i32>} : memref<16x27xf32, #tpu.memory_space<vmem>>, vector<1x27xf32>,
    %c10_224 = arith.constant 10 : index
    %c0_225 = arith.constant 0 : index
    %c0_226 = arith.constant 0 : index
    %278 = vector.load %arg10[%c10_224, %c0_225, %c0_226] : memref<16x32x27xf32, #tpu.memory_space<vmem>>, vector<1x32x27xf32>
    %279 = vector.shape_cast %278 : vector<1x32x27xf32> to vector<32x27xf32>
    %cst_227 = arith.constant dense<0.000000e+00> : vector<1x27xf32>
    %280 = tpu.matmul %217, %279, %cst_227 {dimension_numbers = #tpu.dot_dimension_numbers<[1], [0], [0], [1], [0, 0, 1, 1], [], []>} : vector<1x32xf32>, vector<32x27xf32>, vector<1x27xf32> -> vector<1x27xf32>
    %c10_228 = arith.constant 10 : index
    %c0_229 = arith.constant 0 : index
    %281 = vector.load %arg11[%c10_228, %c0_229] : memref<16x27xf32, #tpu.memory_space<vmem>>, vector<1x27xf32>
    %282 = arith.addf %280, %281 : vector<1x27xf32>
    %c10_230 = arith.constant 10 : index
    %c0_231 = arith.constant 0 : index
    %283 = vector.load %arg25[%c10_230, %c0_231] : memref<16x27xf32, #tpu.memory_space<vmem>>, vector<1x27xf32>
    tpu.vector_store %arg25[%c10_230, %c0_231], %282 {strides = array<i32>} : memref<16x27xf32, #tpu.memory_space<vmem>>, vector<1x27xf32>,
    %c11_232 = arith.constant 11 : index
    %c0_233 = arith.constant 0 : index
    %c0_234 = arith.constant 0 : index
    %284 = vector.load %arg10[%c11_232, %c0_233, %c0_234] : memref<16x32x27xf32, #tpu.memory_space<vmem>>, vector<1x32x27xf32>
    %285 = vector.shape_cast %284 : vector<1x32x27xf32> to vector<32x27xf32>
    %cst_235 = arith.constant dense<0.000000e+00> : vector<1x27xf32>
    %286 = tpu.matmul %217, %285, %cst_235 {dimension_numbers = #tpu.dot_dimension_numbers<[1], [0], [0], [1], [0, 0, 1, 1], [], []>} : vector<1x32xf32>, vector<32x27xf32>, vector<1x27xf32> -> vector<1x27xf32>
    %c11_236 = arith.constant 11 : index
    %c0_237 = arith.constant 0 : index
    %287 = vector.load %arg11[%c11_236, %c0_237] : memref<16x27xf32, #tpu.memory_space<vmem>>, vector<1x27xf32>
    %288 = arith.addf %286, %287 : vector<1x27xf32>
    %c11_238 = arith.constant 11 : index
    %c0_239 = arith.constant 0 : index
    %289 = vector.load %arg25[%c11_238, %c0_239] : memref<16x27xf32, #tpu.memory_space<vmem>>, vector<1x27xf32>
    tpu.vector_store %arg25[%c11_238, %c0_239], %288 {strides = array<i32>} : memref<16x27xf32, #tpu.memory_space<vmem>>, vector<1x27xf32>,
    %c12_240 = arith.constant 12 : index
    %c0_241 = arith.constant 0 : index
    %c0_242 = arith.constant 0 : index
    %290 = vector.load %arg10[%c12_240, %c0_241, %c0_242] : memref<16x32x27xf32, #tpu.memory_space<vmem>>, vector<1x32x27xf32>
    %291 = vector.shape_cast %290 : vector<1x32x27xf32> to vector<32x27xf32>
    %cst_243 = arith.constant dense<0.000000e+00> : vector<1x27xf32>
    %292 = tpu.matmul %217, %291, %cst_243 {dimension_numbers = #tpu.dot_dimension_numbers<[1], [0], [0], [1], [0, 0, 1, 1], [], []>} : vector<1x32xf32>, vector<32x27xf32>, vector<1x27xf32> -> vector<1x27xf32>
    %c12_244 = arith.constant 12 : index
    %c0_245 = arith.constant 0 : index
    %293 = vector.load %arg11[%c12_244, %c0_245] : memref<16x27xf32, #tpu.memory_space<vmem>>, vector<1x27xf32>
    %294 = arith.addf %292, %293 : vector<1x27xf32>
    %c12_246 = arith.constant 12 : index
    %c0_247 = arith.constant 0 : index
    %295 = vector.load %arg25[%c12_246, %c0_247] : memref<16x27xf32, #tpu.memory_space<vmem>>, vector<1x27xf32>
    tpu.vector_store %arg25[%c12_246, %c0_247], %294 {strides = array<i32>} : memref<16x27xf32, #tpu.memory_space<vmem>>, vector<1x27xf32>,
    %c13_248 = arith.constant 13 : index
    %c0_249 = arith.constant 0 : index
    %c0_250 = arith.constant 0 : index
    %296 = vector.load %arg10[%c13_248, %c0_249, %c0_250] : memref<16x32x27xf32, #tpu.memory_space<vmem>>, vector<1x32x27xf32>
    %297 = vector.shape_cast %296 : vector<1x32x27xf32> to vector<32x27xf32>
    %cst_251 = arith.constant dense<0.000000e+00> : vector<1x27xf32>
    %298 = tpu.matmul %217, %297, %cst_251 {dimension_numbers = #tpu.dot_dimension_numbers<[1], [0], [0], [1], [0, 0, 1, 1], [], []>} : vector<1x32xf32>, vector<32x27xf32>, vector<1x27xf32> -> vector<1x27xf32>
    %c13_252 = arith.constant 13 : index
    %c0_253 = arith.constant 0 : index
    %299 = vector.load %arg11[%c13_252, %c0_253] : memref<16x27xf32, #tpu.memory_space<vmem>>, vector<1x27xf32>
    %300 = arith.addf %298, %299 : vector<1x27xf32>
    %c13_254 = arith.constant 13 : index
    %c0_255 = arith.constant 0 : index
    %301 = vector.load %arg25[%c13_254, %c0_255] : memref<16x27xf32, #tpu.memory_space<vmem>>, vector<1x27xf32>
    tpu.vector_store %arg25[%c13_254, %c0_255], %300 {strides = array<i32>} : memref<16x27xf32, #tpu.memory_space<vmem>>, vector<1x27xf32>,
    %c14_256 = arith.constant 14 : index
    %c0_257 = arith.constant 0 : index
    %c0_258 = arith.constant 0 : index
    %302 = vector.load %arg10[%c14_256, %c0_257, %c0_258] : memref<16x32x27xf32, #tpu.memory_space<vmem>>, vector<1x32x27xf32>
    %303 = vector.shape_cast %302 : vector<1x32x27xf32> to vector<32x27xf32>
    %cst_259 = arith.constant dense<0.000000e+00> : vector<1x27xf32>
    %304 = tpu.matmul %217, %303, %cst_259 {dimension_numbers = #tpu.dot_dimension_numbers<[1], [0], [0], [1], [0, 0, 1, 1], [], []>} : vector<1x32xf32>, vector<32x27xf32>, vector<1x27xf32> -> vector<1x27xf32>
    %c14_260 = arith.constant 14 : index
    %c0_261 = arith.constant 0 : index
    %305 = vector.load %arg11[%c14_260, %c0_261] : memref<16x27xf32, #tpu.memory_space<vmem>>, vector<1x27xf32>
    %306 = arith.addf %304, %305 : vector<1x27xf32>
    %c14_262 = arith.constant 14 : index
    %c0_263 = arith.constant 0 : index
    %307 = vector.load %arg25[%c14_262, %c0_263] : memref<16x27xf32, #tpu.memory_space<vmem>>, vector<1x27xf32>
    tpu.vector_store %arg25[%c14_262, %c0_263], %306 {strides = array<i32>} : memref<16x27xf32, #tpu.memory_space<vmem>>, vector<1x27xf32>,
    %c15_264 = arith.constant 15 : index
    %c0_265 = arith.constant 0 : index
    %c0_266 = arith.constant 0 : index
    %308 = vector.load %arg10[%c15_264, %c0_265, %c0_266] : memref<16x32x27xf32, #tpu.memory_space<vmem>>, vector<1x32x27xf32>
    %309 = vector.shape_cast %308 : vector<1x32x27xf32> to vector<32x27xf32>
    %cst_267 = arith.constant dense<0.000000e+00> : vector<1x27xf32>
    %310 = tpu.matmul %217, %309, %cst_267 {dimension_numbers = #tpu.dot_dimension_numbers<[1], [0], [0], [1], [0, 0, 1, 1], [], []>} : vector<1x32xf32>, vector<32x27xf32>, vector<1x27xf32> -> vector<1x27xf32>
    %c15_268 = arith.constant 15 : index
    %c0_269 = arith.constant 0 : index
    %311 = vector.load %arg11[%c15_268, %c0_269] : memref<16x27xf32, #tpu.memory_space<vmem>>, vector<1x27xf32>
    %312 = arith.addf %310, %311 : vector<1x27xf32>
    %c15_270 = arith.constant 15 : index
    %c0_271 = arith.constant 0 : index
    %313 = vector.load %arg25[%c15_270, %c0_271] : memref<16x27xf32, #tpu.memory_space<vmem>>, vector<1x27xf32>
    tpu.vector_store %arg25[%c15_270, %c0_271], %312 {strides = array<i32>} : memref<16x27xf32, #tpu.memory_space<vmem>>, vector<1x27xf32>,
    %c0_272 = arith.constant 0 : index
    %c0_273 = arith.constant 0 : index
    %314 = vector.load %arg25[%c0_272, %c0_273] : memref<16x27xf32, #tpu.memory_space<vmem>>, vector<16x27xf32>
    %cst_274 = arith.constant 0.000000e+00 : f32
    %315 = vector.broadcast %cst_274 : f32 to vector<16x117xf32>
    %c0_275 = arith.constant 0 : index
    %c0_276 = arith.constant 0 : index
    %316 = vector.load %arg26[%c0_275, %c0_276] : memref<16x117xf32, #tpu.memory_space<vmem>>, vector<16x117xf32>
    tpu.vector_store %arg26[%c0_275, %c0_276], %315 {strides = array<i32>} : memref<16x117xf32, #tpu.memory_space<vmem>>, vector<16x117xf32>,
    %c0_277 = arith.constant 0 : index
    %c0_278 = arith.constant 0 : index
    %317 = vector.load %arg22[%c0_277, %c0_278] : memref<27x105xf32, #tpu.memory_space<vmem>>, vector<27x105xf32>
    %cst_279 = arith.constant dense<0.000000e+00> : vector<16x105xf32>
    %318 = tpu.matmul %314, %317, %cst_279 {dimension_numbers = #tpu.dot_dimension_numbers<[1], [0], [0], [1], [0, 0, 1, 1], [], []>} : vector<16x27xf32>, vector<27x105xf32>, vector<16x105xf32> -> vector<16x105xf32>
    %c0_280 = arith.constant 0 : index
    %c6_281 = arith.constant 6 : index
    %319 = vector.load %arg26[%c0_280, %c6_281] : memref<16x117xf32, #tpu.memory_space<vmem>>, vector<16x105xf32>
    tpu.vector_store %arg26[%c0_280, %c6_281], %318 {strides = array<i32>} : memref<16x117xf32, #tpu.memory_space<vmem>>, vector<16x105xf32>,
    %c0_282 = arith.constant 0 : index
    %c0_283 = arith.constant 0 : index
    %320 = vector.load %arg26[%c0_282, %c0_283] : memref<16x117xf32, #tpu.memory_space<vmem>>, vector<16x117xf32>
    %c0_284 = arith.constant 0 : index
    %c0_285 = arith.constant 0 : index
    %c0_286 = arith.constant 0 : index
    %321 = vector.load %arg12[%c0_284, %c0_285, %c0_286] : memref<7x16x16xf32, #tpu.memory_space<vmem>>, vector<1x16x16xf32>
    %322 = vector.shape_cast %321 : vector<1x16x16xf32> to vector<16x16xf32>
    %323 = vector.extract_strided_slice %320 {offsets = [0, 0], sizes = [16, 111], strides = [1, 1]} : vector<16x117xf32> to vector<16x111xf32>
    %cst_287 = arith.constant dense<0.000000e+00> : vector<16x111xf32>
    %324 = tpu.matmul %322, %323, %cst_287 {dimension_numbers = #tpu.dot_dimension_numbers<[1], [0], [0], [1], [0, 0, 1, 1], [], []>} : vector<16x16xf32>, vector<16x111xf32>, vector<16x111xf32> -> vector<16x111xf32>
    %c1_288 = arith.constant 1 : index
    %c0_289 = arith.constant 0 : index
    %c0_290 = arith.constant 0 : index
    %325 = vector.load %arg12[%c1_288, %c0_289, %c0_290] : memref<7x16x16xf32, #tpu.memory_space<vmem>>, vector<1x16x16xf32>
    %326 = vector.shape_cast %325 : vector<1x16x16xf32> to vector<16x16xf32>
    %327 = vector.extract_strided_slice %320 {offsets = [0, 1], sizes = [16, 111], strides = [1, 1]} : vector<16x117xf32> to vector<16x111xf32>
    %cst_291 = arith.constant dense<0.000000e+00> : vector<16x111xf32>
    %328 = tpu.matmul %326, %327, %cst_291 {dimension_numbers = #tpu.dot_dimension_numbers<[1], [0], [0], [1], [0, 0, 1, 1], [], []>} : vector<16x16xf32>, vector<16x111xf32>, vector<16x111xf32> -> vector<16x111xf32>
    %329 = arith.addf %324, %328 : vector<16x111xf32>
    %c2_292 = arith.constant 2 : index
    %c0_293 = arith.constant 0 : index
    %c0_294 = arith.constant 0 : index
    %330 = vector.load %arg12[%c2_292, %c0_293, %c0_294] : memref<7x16x16xf32, #tpu.memory_space<vmem>>, vector<1x16x16xf32>
    %331 = vector.shape_cast %330 : vector<1x16x16xf32> to vector<16x16xf32>
    %332 = vector.extract_strided_slice %320 {offsets = [0, 2], sizes = [16, 111], strides = [1, 1]} : vector<16x117xf32> to vector<16x111xf32>
    %cst_295 = arith.constant dense<0.000000e+00> : vector<16x111xf32>
    %333 = tpu.matmul %331, %332, %cst_295 {dimension_numbers = #tpu.dot_dimension_numbers<[1], [0], [0], [1], [0, 0, 1, 1], [], []>} : vector<16x16xf32>, vector<16x111xf32>, vector<16x111xf32> -> vector<16x111xf32>
    %334 = arith.addf %329, %333 : vector<16x111xf32>
    %c3_296 = arith.constant 3 : index
    %c0_297 = arith.constant 0 : index
    %c0_298 = arith.constant 0 : index
    %335 = vector.load %arg12[%c3_296, %c0_297, %c0_298] : memref<7x16x16xf32, #tpu.memory_space<vmem>>, vector<1x16x16xf32>
    %336 = vector.shape_cast %335 : vector<1x16x16xf32> to vector<16x16xf32>
    %337 = vector.extract_strided_slice %320 {offsets = [0, 3], sizes = [16, 111], strides = [1, 1]} : vector<16x117xf32> to vector<16x111xf32>
    %cst_299 = arith.constant dense<0.000000e+00> : vector<16x111xf32>
    %338 = tpu.matmul %336, %337, %cst_299 {dimension_numbers = #tpu.dot_dimension_numbers<[1], [0], [0], [1], [0, 0, 1, 1], [], []>} : vector<16x16xf32>, vector<16x111xf32>, vector<16x111xf32> -> vector<16x111xf32>
    %339 = arith.addf %334, %338 : vector<16x111xf32>
    %c4_300 = arith.constant 4 : index
    %c0_301 = arith.constant 0 : index
    %c0_302 = arith.constant 0 : index
    %340 = vector.load %arg12[%c4_300, %c0_301, %c0_302] : memref<7x16x16xf32, #tpu.memory_space<vmem>>, vector<1x16x16xf32>
    %341 = vector.shape_cast %340 : vector<1x16x16xf32> to vector<16x16xf32>
    %342 = vector.extract_strided_slice %320 {offsets = [0, 4], sizes = [16, 111], strides = [1, 1]} : vector<16x117xf32> to vector<16x111xf32>
    %cst_303 = arith.constant dense<0.000000e+00> : vector<16x111xf32>
    %343 = tpu.matmul %341, %342, %cst_303 {dimension_numbers = #tpu.dot_dimension_numbers<[1], [0], [0], [1], [0, 0, 1, 1], [], []>} : vector<16x16xf32>, vector<16x111xf32>, vector<16x111xf32> -> vector<16x111xf32>
    %344 = arith.addf %339, %343 : vector<16x111xf32>
    %c5_304 = arith.constant 5 : index
    %c0_305 = arith.constant 0 : index
    %c0_306 = arith.constant 0 : index
    %345 = vector.load %arg12[%c5_304, %c0_305, %c0_306] : memref<7x16x16xf32, #tpu.memory_space<vmem>>, vector<1x16x16xf32>
    %346 = vector.shape_cast %345 : vector<1x16x16xf32> to vector<16x16xf32>
    %347 = vector.extract_strided_slice %320 {offsets = [0, 5], sizes = [16, 111], strides = [1, 1]} : vector<16x117xf32> to vector<16x111xf32>
    %cst_307 = arith.constant dense<0.000000e+00> : vector<16x111xf32>
    %348 = tpu.matmul %346, %347, %cst_307 {dimension_numbers = #tpu.dot_dimension_numbers<[1], [0], [0], [1], [0, 0, 1, 1], [], []>} : vector<16x16xf32>, vector<16x111xf32>, vector<16x111xf32> -> vector<16x111xf32>
    %349 = arith.addf %344, %348 : vector<16x111xf32>
    %c6_308 = arith.constant 6 : index
    %c0_309 = arith.constant 0 : index
    %c0_310 = arith.constant 0 : index
    %350 = vector.load %arg12[%c6_308, %c0_309, %c0_310] : memref<7x16x16xf32, #tpu.memory_space<vmem>>, vector<1x16x16xf32>
    %351 = vector.shape_cast %350 : vector<1x16x16xf32> to vector<16x16xf32>
    %352 = vector.extract_strided_slice %320 {offsets = [0, 6], sizes = [16, 111], strides = [1, 1]} : vector<16x117xf32> to vector<16x111xf32>
    %cst_311 = arith.constant dense<0.000000e+00> : vector<16x111xf32>
    %353 = tpu.matmul %351, %352, %cst_311 {dimension_numbers = #tpu.dot_dimension_numbers<[1], [0], [0], [1], [0, 0, 1, 1], [], []>} : vector<16x16xf32>, vector<16x111xf32>, vector<16x111xf32> -> vector<16x111xf32>
    %354 = arith.addf %349, %353 : vector<16x111xf32>
    %c0_312 = arith.constant 0 : index
    %c0_313 = arith.constant 0 : index
    %355 = vector.load %arg13[%c0_312, %c0_313] : memref<16x1xf32, #tpu.memory_space<vmem>>, vector<16x1xf32>
    %356 = vector.broadcast %355 : vector<16x1xf32> to vector<16x111xf32>
    %357 = arith.addf %354, %356 : vector<16x111xf32>
    %cst_314 = arith.constant 0.000000e+00 : f32
    %358 = vector.broadcast %cst_314 : f32 to vector<16x111xf32>
    %359 = arith.maximumf %357, %358 : vector<16x111xf32>
    %cst_315 = arith.constant 0.000000e+00 : f32
    %360 = vector.broadcast %cst_315 : f32 to vector<16x453xf32>
    %c0_316 = arith.constant 0 : index
    %c0_317 = arith.constant 0 : index
    %361 = vector.load %arg27[%c0_316, %c0_317] : memref<16x453xf32, #tpu.memory_space<vmem>>, vector<16x453xf32>
    tpu.vector_store %arg27[%c0_316, %c0_317], %360 {strides = array<i32>} : memref<16x453xf32, #tpu.memory_space<vmem>>, vector<16x453xf32>,
    %c0_318 = arith.constant 0 : index
    %c0_319 = arith.constant 0 : index
    %362 = vector.load %arg23[%c0_318, %c0_319] : memref<111x441xf32, #tpu.memory_space<vmem>>, vector<111x441xf32>
    %cst_320 = arith.constant dense<0.000000e+00> : vector<16x441xf32>
    %363 = tpu.matmul %359, %362, %cst_320 {dimension_numbers = #tpu.dot_dimension_numbers<[1], [0], [0], [1], [0, 0, 1, 1], [], []>} : vector<16x111xf32>, vector<111x441xf32>, vector<16x441xf32> -> vector<16x441xf32>
    %c0_321 = arith.constant 0 : index
    %c6_322 = arith.constant 6 : index
    %364 = vector.load %arg27[%c0_321, %c6_322] : memref<16x453xf32, #tpu.memory_space<vmem>>, vector<16x441xf32>
    tpu.vector_store %arg27[%c0_321, %c6_322], %363 {strides = array<i32>} : memref<16x453xf32, #tpu.memory_space<vmem>>, vector<16x441xf32>,
    %c0_323 = arith.constant 0 : index
    %c0_324 = arith.constant 0 : index
    %365 = vector.load %arg27[%c0_323, %c0_324] : memref<16x453xf32, #tpu.memory_space<vmem>>, vector<16x453xf32>
    %c0_325 = arith.constant 0 : index
    %c0_326 = arith.constant 0 : index
    %c0_327 = arith.constant 0 : index
    %366 = vector.load %arg14[%c0_325, %c0_326, %c0_327] : memref<7x8x16xf32, #tpu.memory_space<vmem>>, vector<1x8x16xf32>
    %367 = vector.shape_cast %366 : vector<1x8x16xf32> to vector<8x16xf32>
    %368 = vector.extract_strided_slice %365 {offsets = [0, 0], sizes = [16, 447], strides = [1, 1]} : vector<16x453xf32> to vector<16x447xf32>
    %cst_328 = arith.constant dense<0.000000e+00> : vector<8x447xf32>
    %369 = tpu.matmul %367, %368, %cst_328 {dimension_numbers = #tpu.dot_dimension_numbers<[1], [0], [0], [1], [0, 0, 1, 1], [], []>} : vector<8x16xf32>, vector<16x447xf32>, vector<8x447xf32> -> vector<8x447xf32>
    %c1_329 = arith.constant 1 : index
    %c0_330 = arith.constant 0 : index
    %c0_331 = arith.constant 0 : index
    %370 = vector.load %arg14[%c1_329, %c0_330, %c0_331] : memref<7x8x16xf32, #tpu.memory_space<vmem>>, vector<1x8x16xf32>
    %371 = vector.shape_cast %370 : vector<1x8x16xf32> to vector<8x16xf32>
    %372 = vector.extract_strided_slice %365 {offsets = [0, 1], sizes = [16, 447], strides = [1, 1]} : vector<16x453xf32> to vector<16x447xf32>
    %cst_332 = arith.constant dense<0.000000e+00> : vector<8x447xf32>
    %373 = tpu.matmul %371, %372, %cst_332 {dimension_numbers = #tpu.dot_dimension_numbers<[1], [0], [0], [1], [0, 0, 1, 1], [], []>} : vector<8x16xf32>, vector<16x447xf32>, vector<8x447xf32> -> vector<8x447xf32>
    %374 = arith.addf %369, %373 : vector<8x447xf32>
    %c2_333 = arith.constant 2 : index
    %c0_334 = arith.constant 0 : index
    %c0_335 = arith.constant 0 : index
    %375 = vector.load %arg14[%c2_333, %c0_334, %c0_335] : memref<7x8x16xf32, #tpu.memory_space<vmem>>, vector<1x8x16xf32>
    %376 = vector.shape_cast %375 : vector<1x8x16xf32> to vector<8x16xf32>
    %377 = vector.extract_strided_slice %365 {offsets = [0, 2], sizes = [16, 447], strides = [1, 1]} : vector<16x453xf32> to vector<16x447xf32>
    %cst_336 = arith.constant dense<0.000000e+00> : vector<8x447xf32>
    %378 = tpu.matmul %376, %377, %cst_336 {dimension_numbers = #tpu.dot_dimension_numbers<[1], [0], [0], [1], [0, 0, 1, 1], [], []>} : vector<8x16xf32>, vector<16x447xf32>, vector<8x447xf32> -> vector<8x447xf32>
    %379 = arith.addf %374, %378 : vector<8x447xf32>
    %c3_337 = arith.constant 3 : index
    %c0_338 = arith.constant 0 : index
    %c0_339 = arith.constant 0 : index
    %380 = vector.load %arg14[%c3_337, %c0_338, %c0_339] : memref<7x8x16xf32, #tpu.memory_space<vmem>>, vector<1x8x16xf32>
    %381 = vector.shape_cast %380 : vector<1x8x16xf32> to vector<8x16xf32>
    %382 = vector.extract_strided_slice %365 {offsets = [0, 3], sizes = [16, 447], strides = [1, 1]} : vector<16x453xf32> to vector<16x447xf32>
    %cst_340 = arith.constant dense<0.000000e+00> : vector<8x447xf32>
    %383 = tpu.matmul %381, %382, %cst_340 {dimension_numbers = #tpu.dot_dimension_numbers<[1], [0], [0], [1], [0, 0, 1, 1], [], []>} : vector<8x16xf32>, vector<16x447xf32>, vector<8x447xf32> -> vector<8x447xf32>
    %384 = arith.addf %379, %383 : vector<8x447xf32>
    %c4_341 = arith.constant 4 : index
    %c0_342 = arith.constant 0 : index
    %c0_343 = arith.constant 0 : index
    %385 = vector.load %arg14[%c4_341, %c0_342, %c0_343] : memref<7x8x16xf32, #tpu.memory_space<vmem>>, vector<1x8x16xf32>
    %386 = vector.shape_cast %385 : vector<1x8x16xf32> to vector<8x16xf32>
    %387 = vector.extract_strided_slice %365 {offsets = [0, 4], sizes = [16, 447], strides = [1, 1]} : vector<16x453xf32> to vector<16x447xf32>
    %cst_344 = arith.constant dense<0.000000e+00> : vector<8x447xf32>
    %388 = tpu.matmul %386, %387, %cst_344 {dimension_numbers = #tpu.dot_dimension_numbers<[1], [0], [0], [1], [0, 0, 1, 1], [], []>} : vector<8x16xf32>, vector<16x447xf32>, vector<8x447xf32> -> vector<8x447xf32>
    %389 = arith.addf %384, %388 : vector<8x447xf32>
    %c5_345 = arith.constant 5 : index
    %c0_346 = arith.constant 0 : index
    %c0_347 = arith.constant 0 : index
    %390 = vector.load %arg14[%c5_345, %c0_346, %c0_347] : memref<7x8x16xf32, #tpu.memory_space<vmem>>, vector<1x8x16xf32>
    %391 = vector.shape_cast %390 : vector<1x8x16xf32> to vector<8x16xf32>
    %392 = vector.extract_strided_slice %365 {offsets = [0, 5], sizes = [16, 447], strides = [1, 1]} : vector<16x453xf32> to vector<16x447xf32>
    %cst_348 = arith.constant dense<0.000000e+00> : vector<8x447xf32>
    %393 = tpu.matmul %391, %392, %cst_348 {dimension_numbers = #tpu.dot_dimension_numbers<[1], [0], [0], [1], [0, 0, 1, 1], [], []>} : vector<8x16xf32>, vector<16x447xf32>, vector<8x447xf32> -> vector<8x447xf32>
    %394 = arith.addf %389, %393 : vector<8x447xf32>
    %c6_349 = arith.constant 6 : index
    %c0_350 = arith.constant 0 : index
    %c0_351 = arith.constant 0 : index
    %395 = vector.load %arg14[%c6_349, %c0_350, %c0_351] : memref<7x8x16xf32, #tpu.memory_space<vmem>>, vector<1x8x16xf32>
    %396 = vector.shape_cast %395 : vector<1x8x16xf32> to vector<8x16xf32>
    %397 = vector.extract_strided_slice %365 {offsets = [0, 6], sizes = [16, 447], strides = [1, 1]} : vector<16x453xf32> to vector<16x447xf32>
    %cst_352 = arith.constant dense<0.000000e+00> : vector<8x447xf32>
    %398 = tpu.matmul %396, %397, %cst_352 {dimension_numbers = #tpu.dot_dimension_numbers<[1], [0], [0], [1], [0, 0, 1, 1], [], []>} : vector<8x16xf32>, vector<16x447xf32>, vector<8x447xf32> -> vector<8x447xf32>
    %399 = arith.addf %394, %398 : vector<8x447xf32>
    %c0_353 = arith.constant 0 : index
    %c0_354 = arith.constant 0 : index
    %400 = vector.load %arg15[%c0_353, %c0_354] : memref<8x1xf32, #tpu.memory_space<vmem>>, vector<8x1xf32>
    %401 = vector.broadcast %400 : vector<8x1xf32> to vector<8x447xf32>
    %402 = arith.addf %399, %401 : vector<8x447xf32>
    %cst_355 = arith.constant 0.000000e+00 : f32
    %403 = vector.broadcast %cst_355 : f32 to vector<8x447xf32>
    %404 = arith.maximumf %402, %403 : vector<8x447xf32>
    %cst_356 = arith.constant 0.000000e+00 : f32
    %405 = vector.broadcast %cst_356 : f32 to vector<8x449xf32>
    %c0_357 = arith.constant 0 : index
    %c0_358 = arith.constant 0 : index
    %406 = vector.load %arg28[%c0_357, %c0_358] : memref<8x449xf32, #tpu.memory_space<vmem>>, vector<8x449xf32>
    tpu.vector_store %arg28[%c0_357, %c0_358], %405 {strides = array<i32>} : memref<8x449xf32, #tpu.memory_space<vmem>>, vector<8x449xf32>,
    %c0_359 = arith.constant 0 : index
    %c1_360 = arith.constant 1 : index
    %407 = vector.load %arg28[%c0_359, %c1_360] : memref<8x449xf32, #tpu.memory_space<vmem>>, vector<8x447xf32>
    tpu.vector_store %arg28[%c0_359, %c1_360], %404 {strides = array<i32>} : memref<8x449xf32, #tpu.memory_space<vmem>>, vector<8x447xf32>,
    %c0_361 = arith.constant 0 : index
    %c1_362 = arith.constant 1 : index
    %408 = vector.load %arg28[%c0_361, %c1_362] : memref<8x449xf32, #tpu.memory_space<vmem>>, vector<8x448xf32>
    %c0_363 = arith.constant 0 : index
    %c0_364 = arith.constant 0 : index
    %409 = vector.load %arg28[%c0_363, %c0_364] : memref<8x449xf32, #tpu.memory_space<vmem>>, vector<8x448xf32>
    %c0_365 = arith.constant 0 : index
    %c0_366 = arith.constant 0 : index
    %c0_367 = arith.constant 0 : index
    %410 = vector.load %arg16[%c0_365, %c0_366, %c0_367] : memref<7x4x8xf32, #tpu.memory_space<vmem>>, vector<1x4x8xf32>
    %411 = vector.shape_cast %410 : vector<1x4x8xf32> to vector<4x8xf32>
    %cst_368 = arith.constant dense<0.000000e+00> : vector<4x448xf32>
    %412 = tpu.matmul %411, %408, %cst_368 {dimension_numbers = #tpu.dot_dimension_numbers<[1], [0], [0], [1], [0, 0, 1, 1], [], []>} : vector<4x8xf32>, vector<8x448xf32>, vector<4x448xf32> -> vector<4x448xf32>
    %c4_369 = arith.constant 4 : index
    %c0_370 = arith.constant 0 : index
    %c0_371 = arith.constant 0 : index
    %413 = vector.load %arg16[%c4_369, %c0_370, %c0_371] : memref<7x4x8xf32, #tpu.memory_space<vmem>>, vector<1x4x8xf32>
    %414 = vector.shape_cast %413 : vector<1x4x8xf32> to vector<4x8xf32>
    %cst_372 = arith.constant dense<0.000000e+00> : vector<4x448xf32>
    %415 = tpu.matmul %414, %409, %cst_372 {dimension_numbers = #tpu.dot_dimension_numbers<[1], [0], [0], [1], [0, 0, 1, 1], [], []>} : vector<4x8xf32>, vector<8x448xf32>, vector<4x448xf32> -> vector<4x448xf32>
    %416 = arith.addf %412, %415 : vector<4x448xf32>
    %c0_373 = arith.constant 0 : index
    %c0_374 = arith.constant 0 : index
    %417 = vector.load %arg17[%c0_373, %c0_374] : memref<4x1xf32, #tpu.memory_space<vmem>>, vector<4x1xf32>
    %418 = vector.broadcast %417 : vector<4x1xf32> to vector<4x448xf32>
    %419 = arith.addf %416, %418 : vector<4x448xf32>
    %cst_375 = arith.constant 0.000000e+00 : f32
    %420 = vector.broadcast %cst_375 : f32 to vector<4x448xf32>
    %421 = arith.maximumf %419, %420 : vector<4x448xf32>
    %c0_376 = arith.constant 0 : index
    %c0_377 = arith.constant 0 : index
    %422 = vector.load %arg18[%c0_376, %c0_377] : memref<4x1xf32, #tpu.memory_space<vmem>>, vector<4x1xf32>
    %423 = vector.broadcast %422 : vector<4x1xf32> to vector<4x448xf32>
    %424 = arith.mulf %423, %421 : vector<4x448xf32>
    %cst_378 = arith.constant dense<0.000000e+00> : vector<448xf32>
    %425 = vector.multi_reduction <add>, %424, %cst_378 [0] : vector<4x448xf32> to vector<448xf32>
    %426 = vector.shape_cast %425 : vector<448xf32> to vector<1x448xf32>
    %c0_379 = arith.constant 0 : index
    %c0_380 = arith.constant 0 : index
    %427 = vector.load %arg19[%c0_379, %c0_380] : memref<1x1xf32, #tpu.memory_space<vmem>>, vector<1x1xf32>
    %428 = vector.broadcast %427 : vector<1x1xf32> to vector<1x448xf32>
    %429 = arith.addf %426, %428 : vector<1x448xf32>
    %c0_381 = arith.constant 0 : index
    %c0_382 = arith.constant 0 : index
    %c0_383 = arith.constant 0 : index
    %430 = vector.load %arg24[%c0_381, %c0_382, %c0_383] : memref<1x4x448xf32, #tpu.memory_space<vmem>>, vector<1x1x448xf32>
    %431 = vector.shape_cast %430 : vector<1x1x448xf32> to vector<1x448xf32>
    %432 = vector.shape_cast %429 : vector<1x448xf32> to vector<1x1x448xf32>
    tpu.vector_store %arg24[%c0_381, %c0_382, %c0_383], %432 {strides = array<i32>} : memref<1x4x448xf32, #tpu.memory_space<vmem>>, vector<1x1x448xf32>,
    %c1_384 = arith.constant 1 : index
    %c0_385 = arith.constant 0 : index
    %c0_386 = arith.constant 0 : index
    %433 = vector.load %arg16[%c1_384, %c0_385, %c0_386] : memref<7x4x8xf32, #tpu.memory_space<vmem>>, vector<1x4x8xf32>
    %434 = vector.shape_cast %433 : vector<1x4x8xf32> to vector<4x8xf32>
    %cst_387 = arith.constant dense<0.000000e+00> : vector<4x448xf32>
    %435 = tpu.matmul %434, %408, %cst_387 {dimension_numbers = #tpu.dot_dimension_numbers<[1], [0], [0], [1], [0, 0, 1, 1], [], []>} : vector<4x8xf32>, vector<8x448xf32>, vector<4x448xf32> -> vector<4x448xf32>
    %c5_388 = arith.constant 5 : index
    %c0_389 = arith.constant 0 : index
    %c0_390 = arith.constant 0 : index
    %436 = vector.load %arg16[%c5_388, %c0_389, %c0_390] : memref<7x4x8xf32, #tpu.memory_space<vmem>>, vector<1x4x8xf32>
    %437 = vector.shape_cast %436 : vector<1x4x8xf32> to vector<4x8xf32>
    %cst_391 = arith.constant dense<0.000000e+00> : vector<4x448xf32>
    %438 = tpu.matmul %437, %409, %cst_391 {dimension_numbers = #tpu.dot_dimension_numbers<[1], [0], [0], [1], [0, 0, 1, 1], [], []>} : vector<4x8xf32>, vector<8x448xf32>, vector<4x448xf32> -> vector<4x448xf32>
    %439 = arith.addf %435, %438 : vector<4x448xf32>
    %c0_392 = arith.constant 0 : index
    %c0_393 = arith.constant 0 : index
    %440 = vector.load %arg17[%c0_392, %c0_393] : memref<4x1xf32, #tpu.memory_space<vmem>>, vector<4x1xf32>
    %441 = vector.broadcast %440 : vector<4x1xf32> to vector<4x448xf32>
    %442 = arith.addf %439, %441 : vector<4x448xf32>
    %cst_394 = arith.constant 0.000000e+00 : f32
    %443 = vector.broadcast %cst_394 : f32 to vector<4x448xf32>
    %444 = arith.maximumf %442, %443 : vector<4x448xf32>
    %c0_395 = arith.constant 0 : index
    %c0_396 = arith.constant 0 : index
    %445 = vector.load %arg18[%c0_395, %c0_396] : memref<4x1xf32, #tpu.memory_space<vmem>>, vector<4x1xf32>
    %446 = vector.broadcast %445 : vector<4x1xf32> to vector<4x448xf32>
    %447 = arith.mulf %446, %444 : vector<4x448xf32>
    %cst_397 = arith.constant dense<0.000000e+00> : vector<448xf32>
    %448 = vector.multi_reduction <add>, %447, %cst_397 [0] : vector<4x448xf32> to vector<448xf32>
    %449 = vector.shape_cast %448 : vector<448xf32> to vector<1x448xf32>
    %c0_398 = arith.constant 0 : index
    %c0_399 = arith.constant 0 : index
    %450 = vector.load %arg19[%c0_398, %c0_399] : memref<1x1xf32, #tpu.memory_space<vmem>>, vector<1x1xf32>
    %451 = vector.broadcast %450 : vector<1x1xf32> to vector<1x448xf32>
    %452 = arith.addf %449, %451 : vector<1x448xf32>
    %c0_400 = arith.constant 0 : index
    %c1_401 = arith.constant 1 : index
    %c0_402 = arith.constant 0 : index
    %453 = vector.load %arg24[%c0_400, %c1_401, %c0_402] : memref<1x4x448xf32, #tpu.memory_space<vmem>>, vector<1x1x448xf32>
    %454 = vector.shape_cast %453 : vector<1x1x448xf32> to vector<1x448xf32>
    %455 = vector.shape_cast %452 : vector<1x448xf32> to vector<1x1x448xf32>
    tpu.vector_store %arg24[%c0_400, %c1_401, %c0_402], %455 {strides = array<i32>} : memref<1x4x448xf32, #tpu.memory_space<vmem>>, vector<1x1x448xf32>,
    %c2_403 = arith.constant 2 : index
    %c0_404 = arith.constant 0 : index
    %c0_405 = arith.constant 0 : index
    %456 = vector.load %arg16[%c2_403, %c0_404, %c0_405] : memref<7x4x8xf32, #tpu.memory_space<vmem>>, vector<1x4x8xf32>
    %457 = vector.shape_cast %456 : vector<1x4x8xf32> to vector<4x8xf32>
    %cst_406 = arith.constant dense<0.000000e+00> : vector<4x448xf32>
    %458 = tpu.matmul %457, %408, %cst_406 {dimension_numbers = #tpu.dot_dimension_numbers<[1], [0], [0], [1], [0, 0, 1, 1], [], []>} : vector<4x8xf32>, vector<8x448xf32>, vector<4x448xf32> -> vector<4x448xf32>
    %c6_407 = arith.constant 6 : index
    %c0_408 = arith.constant 0 : index
    %c0_409 = arith.constant 0 : index
    %459 = vector.load %arg16[%c6_407, %c0_408, %c0_409] : memref<7x4x8xf32, #tpu.memory_space<vmem>>, vector<1x4x8xf32>
    %460 = vector.shape_cast %459 : vector<1x4x8xf32> to vector<4x8xf32>
    %cst_410 = arith.constant dense<0.000000e+00> : vector<4x448xf32>
    %461 = tpu.matmul %460, %409, %cst_410 {dimension_numbers = #tpu.dot_dimension_numbers<[1], [0], [0], [1], [0, 0, 1, 1], [], []>} : vector<4x8xf32>, vector<8x448xf32>, vector<4x448xf32> -> vector<4x448xf32>
    %462 = arith.addf %458, %461 : vector<4x448xf32>
    %c0_411 = arith.constant 0 : index
    %c0_412 = arith.constant 0 : index
    %463 = vector.load %arg17[%c0_411, %c0_412] : memref<4x1xf32, #tpu.memory_space<vmem>>, vector<4x1xf32>
    %464 = vector.broadcast %463 : vector<4x1xf32> to vector<4x448xf32>
    %465 = arith.addf %462, %464 : vector<4x448xf32>
    %cst_413 = arith.constant 0.000000e+00 : f32
    %466 = vector.broadcast %cst_413 : f32 to vector<4x448xf32>
    %467 = arith.maximumf %465, %466 : vector<4x448xf32>
    %c0_414 = arith.constant 0 : index
    %c0_415 = arith.constant 0 : index
    %468 = vector.load %arg18[%c0_414, %c0_415] : memref<4x1xf32, #tpu.memory_space<vmem>>, vector<4x1xf32>
    %469 = vector.broadcast %468 : vector<4x1xf32> to vector<4x448xf32>
    %470 = arith.mulf %469, %467 : vector<4x448xf32>
    %cst_416 = arith.constant dense<0.000000e+00> : vector<448xf32>
    %471 = vector.multi_reduction <add>, %470, %cst_416 [0] : vector<4x448xf32> to vector<448xf32>
    %472 = vector.shape_cast %471 : vector<448xf32> to vector<1x448xf32>
    %c0_417 = arith.constant 0 : index
    %c0_418 = arith.constant 0 : index
    %473 = vector.load %arg19[%c0_417, %c0_418] : memref<1x1xf32, #tpu.memory_space<vmem>>, vector<1x1xf32>
    %474 = vector.broadcast %473 : vector<1x1xf32> to vector<1x448xf32>
    %475 = arith.addf %472, %474 : vector<1x448xf32>
    %c0_419 = arith.constant 0 : index
    %c2_420 = arith.constant 2 : index
    %c0_421 = arith.constant 0 : index
    %476 = vector.load %arg24[%c0_419, %c2_420, %c0_421] : memref<1x4x448xf32, #tpu.memory_space<vmem>>, vector<1x1x448xf32>
    %477 = vector.shape_cast %476 : vector<1x1x448xf32> to vector<1x448xf32>
    %478 = vector.shape_cast %475 : vector<1x448xf32> to vector<1x1x448xf32>
    tpu.vector_store %arg24[%c0_419, %c2_420, %c0_421], %478 {strides = array<i32>} : memref<1x4x448xf32, #tpu.memory_space<vmem>>, vector<1x1x448xf32>,
    %c3_422 = arith.constant 3 : index
    %c0_423 = arith.constant 0 : index
    %c0_424 = arith.constant 0 : index
    %479 = vector.load %arg16[%c3_422, %c0_423, %c0_424] : memref<7x4x8xf32, #tpu.memory_space<vmem>>, vector<1x4x8xf32>
    %480 = vector.shape_cast %479 : vector<1x4x8xf32> to vector<4x8xf32>
    %cst_425 = arith.constant dense<0.000000e+00> : vector<4x448xf32>
    %481 = tpu.matmul %480, %408, %cst_425 {dimension_numbers = #tpu.dot_dimension_numbers<[1], [0], [0], [1], [0, 0, 1, 1], [], []>} : vector<4x8xf32>, vector<8x448xf32>, vector<4x448xf32> -> vector<4x448xf32>
    %c0_426 = arith.constant 0 : index
    %c0_427 = arith.constant 0 : index
    %482 = vector.load %arg17[%c0_426, %c0_427] : memref<4x1xf32, #tpu.memory_space<vmem>>, vector<4x1xf32>
    %483 = vector.broadcast %482 : vector<4x1xf32> to vector<4x448xf32>
    %484 = arith.addf %481, %483 : vector<4x448xf32>
    %cst_428 = arith.constant 0.000000e+00 : f32
    %485 = vector.broadcast %cst_428 : f32 to vector<4x448xf32>
    %486 = arith.maximumf %484, %485 : vector<4x448xf32>
    %c0_429 = arith.constant 0 : index
    %c0_430 = arith.constant 0 : index
    %487 = vector.load %arg18[%c0_429, %c0_430] : memref<4x1xf32, #tpu.memory_space<vmem>>, vector<4x1xf32>
    %488 = vector.broadcast %487 : vector<4x1xf32> to vector<4x448xf32>
    %489 = arith.mulf %488, %486 : vector<4x448xf32>
    %cst_431 = arith.constant dense<0.000000e+00> : vector<448xf32>
    %490 = vector.multi_reduction <add>, %489, %cst_431 [0] : vector<4x448xf32> to vector<448xf32>
    %491 = vector.shape_cast %490 : vector<448xf32> to vector<1x448xf32>
    %c0_432 = arith.constant 0 : index
    %c0_433 = arith.constant 0 : index
    %492 = vector.load %arg19[%c0_432, %c0_433] : memref<1x1xf32, #tpu.memory_space<vmem>>, vector<1x1xf32>
    %493 = vector.broadcast %492 : vector<1x1xf32> to vector<1x448xf32>
    %494 = arith.addf %491, %493 : vector<1x448xf32>
    %c0_434 = arith.constant 0 : index
    %c3_435 = arith.constant 3 : index
    %c0_436 = arith.constant 0 : index
    %495 = vector.load %arg24[%c0_434, %c3_435, %c0_436] : memref<1x4x448xf32, #tpu.memory_space<vmem>>, vector<1x1x448xf32>
    %496 = vector.shape_cast %495 : vector<1x1x448xf32> to vector<1x448xf32>
    %497 = vector.shape_cast %494 : vector<1x448xf32> to vector<1x1x448xf32>
    tpu.vector_store %arg24[%c0_434, %c3_435, %c0_436], %497 {strides = array<i32>} : memref<1x4x448xf32, #tpu.memory_space<vmem>>, vector<1x1x448xf32>,
    return
  }
  func.func @transform_0(%arg0: i32) -> (i32, i32, i32) {
    %c0_i32 = arith.constant 0 : i32
    %c0_i32_0 = arith.constant 0 : i32
    %c0_i32_1 = arith.constant 0 : i32
    return %arg0, %c0_i32, %c0_i32_0 : i32, i32, i32
  }
  func.func @transform_1(%arg0: i32) -> (i32, i32, i32) {
    %c0_i32 = arith.constant 0 : i32
    %c0_i32_0 = arith.constant 0 : i32
    %c0_i32_1 = arith.constant 0 : i32
    %c0_i32_2 = arith.constant 0 : i32
    return %c0_i32, %c0_i32_0, %c0_i32_1 : i32, i32, i32
  }
  func.func @transform_2(%arg0: i32) -> (i32, i32) {
    %c0_i32 = arith.constant 0 : i32
    %c0_i32_0 = arith.constant 0 : i32
    %c0_i32_1 = arith.constant 0 : i32
    return %c0_i32, %c0_i32_0 : i32, i32
  }
  func.func @transform_3(%arg0: i32) -> (i32, i32, i32) {
    %c0_i32 = arith.constant 0 : i32
    %c0_i32_0 = arith.constant 0 : i32
    %c0_i32_1 = arith.constant 0 : i32
    %c0_i32_2 = arith.constant 0 : i32
    return %c0_i32, %c0_i32_0, %c0_i32_1 : i32, i32, i32
  }
  func.func @transform_4(%arg0: i32) -> (i32, i32) {
    %c0_i32 = arith.constant 0 : i32
    %c0_i32_0 = arith.constant 0 : i32
    %c0_i32_1 = arith.constant 0 : i32
    return %c0_i32, %c0_i32_0 : i32, i32
  }
  func.func @transform_5(%arg0: i32) -> (i32, i32, i32) {
    %c0_i32 = arith.constant 0 : i32
    %c0_i32_0 = arith.constant 0 : i32
    %c0_i32_1 = arith.constant 0 : i32
    %c0_i32_2 = arith.constant 0 : i32
    return %c0_i32, %c0_i32_0, %c0_i32_1 : i32, i32, i32
  }
  func.func @transform_6(%arg0: i32) -> (i32, i32) {
    %c0_i32 = arith.constant 0 : i32
    %c0_i32_0 = arith.constant 0 : i32
    %c0_i32_1 = arith.constant 0 : i32
    return %c0_i32, %c0_i32_0 : i32, i32
  }
  func.func @transform_7(%arg0: i32) -> (i32, i32, i32) {
    %c0_i32 = arith.constant 0 : i32
    %c0_i32_0 = arith.constant 0 : i32
    %c0_i32_1 = arith.constant 0 : i32
    %c0_i32_2 = arith.constant 0 : i32
    return %c0_i32, %c0_i32_0, %c0_i32_1 : i32, i32, i32
  }
  func.func @transform_8(%arg0: i32) -> (i32, i32) {
    %c0_i32 = arith.constant 0 : i32
    %c0_i32_0 = arith.constant 0 : i32
    %c0_i32_1 = arith.constant 0 : i32
    return %c0_i32, %c0_i32_0 : i32, i32
  }
  func.func @transform_9(%arg0: i32) -> (i32, i32, i32) {
    %c0_i32 = arith.constant 0 : i32
    %c0_i32_0 = arith.constant 0 : i32
    %c0_i32_1 = arith.constant 0 : i32
    %c0_i32_2 = arith.constant 0 : i32
    return %c0_i32, %c0_i32_0, %c0_i32_1 : i32, i32, i32
  }
  func.func @transform_10(%arg0: i32) -> (i32, i32) {
    %c0_i32 = arith.constant 0 : i32
    %c0_i32_0 = arith.constant 0 : i32
    %c0_i32_1 = arith.constant 0 : i32
    return %c0_i32, %c0_i32_0 : i32, i32
  }
  func.func @transform_11(%arg0: i32) -> (i32, i32, i32) {
    %c0_i32 = arith.constant 0 : i32
    %c0_i32_0 = arith.constant 0 : i32
    %c0_i32_1 = arith.constant 0 : i32
    %c0_i32_2 = arith.constant 0 : i32
    return %c0_i32, %c0_i32_0, %c0_i32_1 : i32, i32, i32
  }
  func.func @transform_12(%arg0: i32) -> (i32, i32) {
    %c0_i32 = arith.constant 0 : i32
    %c0_i32_0 = arith.constant 0 : i32
    %c0_i32_1 = arith.constant 0 : i32
    return %c0_i32, %c0_i32_0 : i32, i32
  }
  func.func @transform_13(%arg0: i32) -> (i32, i32, i32) {
    %c0_i32 = arith.constant 0 : i32
    %c0_i32_0 = arith.constant 0 : i32
    %c0_i32_1 = arith.constant 0 : i32
    %c0_i32_2 = arith.constant 0 : i32
    return %c0_i32, %c0_i32_0, %c0_i32_1 : i32, i32, i32
  }
  func.func @transform_14(%arg0: i32) -> (i32, i32) {
    %c0_i32 = arith.constant 0 : i32
    %c0_i32_0 = arith.constant 0 : i32
    %c0_i32_1 = arith.constant 0 : i32
    return %c0_i32, %c0_i32_0 : i32, i32
  }
  func.func @transform_15(%arg0: i32) -> (i32, i32, i32) {
    %c0_i32 = arith.constant 0 : i32
    %c0_i32_0 = arith.constant 0 : i32
    %c0_i32_1 = arith.constant 0 : i32
    %c0_i32_2 = arith.constant 0 : i32
    return %c0_i32, %c0_i32_0, %c0_i32_1 : i32, i32, i32
  }
  func.func @transform_16(%arg0: i32) -> (i32, i32) {
    %c0_i32 = arith.constant 0 : i32
    %c0_i32_0 = arith.constant 0 : i32
    %c0_i32_1 = arith.constant 0 : i32
    return %c0_i32, %c0_i32_0 : i32, i32
  }
  func.func @transform_17(%arg0: i32) -> (i32, i32) {
    %c0_i32 = arith.constant 0 : i32
    %c0_i32_0 = arith.constant 0 : i32
    %c0_i32_1 = arith.constant 0 : i32
    return %c0_i32, %c0_i32_0 : i32, i32
  }
  func.func @transform_18(%arg0: i32) -> (i32, i32) {
    %c0_i32 = arith.constant 0 : i32
    %c0_i32_0 = arith.constant 0 : i32
    %c0_i32_1 = arith.constant 0 : i32
    return %c0_i32, %c0_i32_0 : i32, i32
  }
  func.func @transform_19(%arg0: i32) -> (i32, i32) {
    %c0_i32 = arith.constant 0 : i32
    %c0_i32_0 = arith.constant 0 : i32
    %c0_i32_1 = arith.constant 0 : i32
    return %c0_i32, %c0_i32_0 : i32, i32
  }
  func.func @transform_20(%arg0: i32) -> (i32, i32) {
    %c0_i32 = arith.constant 0 : i32
    %c0_i32_0 = arith.constant 0 : i32
    %c0_i32_1 = arith.constant 0 : i32
    return %c0_i32, %c0_i32_0 : i32, i32
  }
  func.func @transform_21(%arg0: i32) -> (i32, i32) {
    %c0_i32 = arith.constant 0 : i32
    %c0_i32_0 = arith.constant 0 : i32
    %c0_i32_1 = arith.constant 0 : i32
    return %c0_i32, %c0_i32_0 : i32, i32
  }
  func.func @transform_22(%arg0: i32) -> (i32, i32) {
    %c0_i32 = arith.constant 0 : i32
    %c0_i32_0 = arith.constant 0 : i32
    %c0_i32_1 = arith.constant 0 : i32
    return %c0_i32, %c0_i32_0 : i32, i32
  }
  func.func @transform_23(%arg0: i32) -> (i32, i32, i32) {
    %c0_i32 = arith.constant 0 : i32
    %c0_i32_0 = arith.constant 0 : i32
    %c0_i32_1 = arith.constant 0 : i32
    return %arg0, %c0_i32, %c0_i32_0 : i32, i32, i32
  }
}

</mosaic_0001>

<bundles_post_ra>
// kernel: ae_forward.1
= control target key start
LH: loop header
LB: loop body
LE: loop exit
PB: predicated region body
PF: predicated region fallthrough
CT: control target
= control target key end

     0   :  { %s6210_s24 = smov 0   ;;  %s7907_s0 = inlined_call_operand.vmem [shape: f32[2,4,448], index: 0, kind: input, shape index: {}]   ;;  %s7908_s1 = inlined_call_operand.vmem [shape: f32[7,4,1], index: 1, kind: input, shape index: {}]   ;;  %s7909_s2 = inlined_call_operand.vmem [shape: f32[4,1], index: 2, kind: input, shape index: {}]   ;;  %s7910_s3 = inlined_call_operand.vmem [shape: f32[7,8,4], index: 3, kind: input, shape index: {}]   ;;  %s7911_s4 = inlined_call_operand.vmem [shape: f32[8,1], index: 4, kind: input, shape index: {}]   ;;  %s7912_s5 = inlined_call_operand.vmem [shape: f32[7,16,8], index: 5, kind: input, shape index: {}]   ;;  %s7913_s6 = inlined_call_operand.vmem [shape: f32[16,1], index: 6, kind: input, shape index: {}]   ;;  %s7914_s7 = inlined_call_operand.vmem [shape: f32[16,27,32], index: 7, kind: input, shape index: {}]   ;;  %s7915_s8 = inlined_call_operand.vmem [shape: f32[1,32], index: 8, kind: input, shape index: {}]   ;;  %s7916_s9 = inlined_call_operand.vmem [shape: f32[16,32,27], index: 9, kind: input, shape index: {}]   ;;  %s7917_s10 = inlined_call_operand.vmem [shape: f32[16,27], index: 10, kind: input, shape index: {}]   ;;  %s7918_s11 = inlined_call_operand.vmem [shape: f32[7,16,16], index: 11, kind: input, shape index: {}]   ;;  %s7919_s12 = inlined_call_operand.vmem [shape: f32[16,1], index: 12, kind: input, shape index: {}]   ;;  %s7920_s13 = inlined_call_operand.vmem [shape: f32[7,8,16], index: 13, kind: input, shape index: {}]   ;;  %s7921_s14 = inlined_call_operand.vmem [shape: f32[8,1], index: 14, kind: input, shape index: {}]   ;;  %s7922_s15 = inlined_call_operand.vmem [shape: f32[7,4,8], index: 15, kind: input, shape index: {}]   ;;  %s7923_s16 = inlined_call_operand.vmem [shape: f32[4,1], index: 16, kind: input, shape index: {}]   ;;  %s7924_s17 = inlined_call_operand.vmem [shape: f32[4,1], index: 17, kind: input, shape index: {}]   ;;  %s7925_s18 = inlined_call_operand.<no memory space> [shape: f32[1,1], index: 18, kind: input, shape index: {}]   ;;  %s7926_s19 = inlined_call_operand.vmem [shape: f32[441,111], index: 19, kind: input, shape index: {}]   ;;  %s7927_s20 = inlined_call_operand.vmem [shape: f32[105,27], index: 20, kind: input, shape index: {}]   ;;  %s7928_s21 = inlined_call_operand.vmem [shape: f32[27,105], index: 21, kind: input, shape index: {}]   ;;  %s7929_s22 = inlined_call_operand.vmem [shape: f32[111,441], index: 22, kind: input, shape index: {}]   ;;  %s7930_s23 = inlined_call_operand.vmem [shape: f32[2,4,448], index: 23, kind: output, shape index: {}]  }
   0x1   :  { %7955 = sst [smem:[#allocation7_spill]] %s7907_s0  ;;  %v28_v0 = vstv %s7925_s18 }
   0x2   :  { %7956 = sst [smem:[#allocation8_spill]] %s7908_s1  ;;  %29 = vst [vmem:[#allocation6] sm:$0x1] %v28_v0 }
   0x3   :  { %7957 = sst [smem:[#allocation9_spill]] %s7909_s2 }
   0x4   :  { %7958 = sst [smem:[#allocation10_spill]] %s7910_s3 }
   0x5   :  { %7959 = sst [smem:[#allocation11_spill]] %s7911_s4 }
   0x6   :  { %7960 = sst [smem:[#allocation12_spill]] %s7912_s5 }
   0x7   :  { %7961 = sst [smem:[#allocation13_spill]] %s7913_s6 }
   0x8   :  { %7962 = sst [smem:[#allocation14_spill]] %s7914_s7 }
   0x9   :  { %7963 = sst [smem:[#allocation15_spill]] %s7915_s8 }
   0xa   :  { %7964 = sst [smem:[#allocation16_spill]] %s7926_s19 }
   0xb   :  { %7965 = sst [smem:[#allocation17_spill]] %s7927_s20 }
   0xc LB: > { %s5500_s25 = sadd.s32 4294967295, %s6075_s24   ;;  %p5504_p0 = scmp.ge.s32.totalorder %s6075_s24, 1  ;;  %s6075_s24 = sphi %s6210_s24, %s35_s24  }
   0xd   : > { %p639_p1 = scmp.lt.s32.totalorder %s6075_s24, 3 }
   0xf   : > { %p640_p2 = pnand %p5504_p0, %p639_p1 }
  0x10   : > { %s7966_s26 = sld [smem:[#allocation8_spill]] (!%p640_p2)  ;;  %p703_p3 = scmp.lt.s32.totalorder (!%p640_p2), %s5500_s25, 1 }
  0x11   : > { %643 = sbr.rel (%p640_p2) target bundleno = 3029 (0xbd5), region = 112  ;;  %s7967_s2 = sld [smem:[#allocation9_spill]] (!%p640_p2) }
  0x12   : > { %s7968_s28 = sld [smem:[#allocation7_spill]] (!%p640_p2)  ;;  %s7943_s3 = smov (!%p640_p2), 127  }
  0x13   : > { %s7945_s0 = smov (!%p640_p2), 126   ;;  %s7947_s4 = smov (!%p640_p2), 125  }
  0x14   : > { %s7937_s30 = smov (!%p640_p2), 124   ;;  %s7939_s5 = smov (!%p640_p2), 123  }
  0x15   : > { %s7941_s1 = smov (!%p640_p2), 122   ;;  %s7969_s27 = sld [smem:[#allocation11_spill]] (!%p640_p2) }
  0x16   : > { %v5514_v1 = vld [vmem:[%s7966_s26 + $0x18] sm:$0xf]  ;;  %v5512_v2 = vld [vmem:[%s7966_s26 + $0x10] sm:$0xf]  ;;  %v6077_v3 = vmov 0   ;;  %s7988_s25 = smov (!%p703_p3, %s5500_s25), 1 }
  0x17   : > { %5911 = vset.pattern.permute.xlu1 %v6077_v3  ;;  %5910 = vset.pattern.permute.xlu0 %v6077_v3  ;;  %v5509_v4 = vld [vmem:[%s7966_s26 + $0x4] sm:$0xf]  ;;  %v5513_v5 = vld [vmem:[%s7966_s26 + $0x14] sm:$0xf]  ;;  %v715_v6 = vld [vmem:[%s7966_s26] sm:$0xf] }
  0x18   : > { %893 = vperm.xlu1 %5911, %v5514_v1   ;;  %824 = vperm.xlu0 %5910, %v5512_v2   ;;  %v5510_v7 = vld [vmem:[%s7966_s26 + $0x8] sm:$0xf]  ;;  %v5511_v8 = vld [vmem:[%s7966_s26 + $0xc] sm:$0xf]  ;;  %v923_v9 = vld [vmem:[%s7967_s2] sm:$0xf] }
  0x19   : > { %5912 = vset.pattern.permute.xlu2 %v6077_v3  ;;  %s7936_s6 = sshll.u32 %s7988_s25, 4  ;;  %vm843_vm0 = vcmask 1039360   ;;  %vm959_vm1 = vcmask 1043456   ;;  %vm955_vm2 = vcmask 31744   ;;  %vm1149_vm3 = vcmask 1031168   ;;  %s7971_s19 = sld [smem:[#allocation16_spill]] }
  0x1a   : > { %743 = vperm.xlu2 %5912, %v5509_v4   ;;  %s707_s29 = scalar_lea.vmem %s7968_s28, %s7936_s6  ;;  %vm1258_vm4 = vcmask 1022976   ;;  %vm1367_vm5 = vcmask 1014784   ;;  %vm1476_vm6 = vcmask 1006592   ;;  %vm1585_vm7 = vcmask 998400   ;;  %s7972_s28 = smov 127  }
  0x1b   : > { %v6250_v10 = vld [vmem:[%s707_s29 + $0x8] sm:$0xff]  ;;  %v713_v16 = vld [vmem:[%s707_s29] sm:$0xff]  ;;  %s7970_s29 = sld [smem:[#allocation10_spill]]  ;;  %vm1750_vm8 = vcmask 1040384   ;;  %vm1746_vm9 = vcmask 465920   ;;  %s7973_s18 = smov 122  }
  0x1c   : > { %v726_v11 = vperm.slane %v6250_v10, 4  ;;  %v725_v12 = vperm.slane %v6250_v10, 0  ;;  %v746_v17 = vperm.slane %v713_v16, 1  ;;  %v747_v18 = vperm.slane %v713_v16, 5  ;;  %s7974_s6 = smov 123   ;;  %s7978_s20 = sld [smem:[#allocation17_spill]] }
  0x1d   : > { %v748_v19 = vperm.slane %v6250_v10, 1  ;;  %v775_v20 = vperm.slane %v6250_v10, 2  ;;  %v749_v23 = vperm.slane %v6250_v10, 5  ;;  %v773_v24 = vperm.slane %v713_v16, 2  ;;  %s7979_s7 = sld [smem:[#allocation14_spill]]  ;;  %s7982_s2 = smov 126  }
  0x1e   : > { %v734_v14 = vperm.slane %v726_v11, 0  ;;  %v733_v15 = vperm.slane %v725_v12, 0  ;;  %v774_v25 = vperm.slane %v713_v16, 6  ;;  %v776_v26 = vperm.slane %v6250_v10, 6  ;;  %s7980_s8 = sld [smem:[#allocation15_spill]] }
  0x1f   : > { %v723_v29 = vperm.slane %v713_v16, 0  ;;  %v724_v30 = vperm.slane %v713_v16, 4  ;;  %v754_v31 = vperm.slane %v746_v17, 1  ;;  %v755_v32 = vperm.slane %v747_v18, 1 }
  0x20   : > { %859 = vperm.xlu0 %5910, %v5513_v5   ;;  %718 = vperm.xlu1 %5911, %v715_v6   ;;  %v756_v33 = vperm.slane %v748_v19, 1  ;;  %v783_v34 = vperm.slane %v775_v20, 2  ;;  %v757_v35 = vperm.slane %v749_v23, 1  ;;  %v6266_v36 = vperm.slane %v773_v24, 2 }
  0x21   : > { %v782_v37 = vperm.slane %v774_v25, 2  ;;  %v784_v38 = vperm.slane %v776_v26, 2  ;;  %v731_v40 = vperm.slane %v723_v29, 0  ;;  %v732_v41 = vperm.slane %v724_v30, 0 }
  0x22   : > { %770 = vperm.xlu2 %5912, %v5510_v7   ;;  %v800_v46 = vperm.slane %v713_v16, 3  ;;  %v801_v48 = vperm.slane %v713_v16, 7  ;;  %v802_v49 = vperm.slane %v6250_v10, 3  ;;  %v803_v50 = vperm.slane %v6250_v10, 7 }
  0x23   : > { %vm1844_vm10 = vcmask 64512   ;;  %vm2158_vm11 = vcmask 1042432   ;;  %vm2114_vm12 = vcmask 859136   ;;  %vm2154_vm13 = vcmask 220160  }
  0x24   : > { %v808_v3 = vperm.slane %v800_v46, 3  ;;  %v809_v4 = vperm.slane %v801_v48, 3  ;;  %v810_v5 = vperm.slane %v802_v49, 3  ;;  %v811_v6 = vperm.slane %v803_v50, 3 }
  0x25   : > { %vm2668_vm14 = vcmask 261120   ;;  %vm2692_vm15 = vcmask 212992  }
  0x28   : > { %797 = vperm.xlu0 %5910, %v5511_v8   ;;  %926 = vperm.xlu1 %5911, %v923_v9  }
  0x74   : > { %v744_v13 = vpop.permute.xlu2 %743 }
  0x75   : > { %v758_v39 = vmul.f32 %v754_v31, %v744_v13  ;;  %v759_v43 = vmul.f32 %v755_v32, %v744_v13  ;;  %v760_v44 = vmul.f32 %v756_v33, %v744_v13  ;;  %v761_v45 = vmul.f32 %v757_v35, %v744_v13 }
  0x7c   : > { %v771_v42 = vpop.permute.xlu2 %770 }
  0x7d   : > { %v785_v53 = vmul.f32 %v6266_v36, %v771_v42  ;;  %v786_v54 = vmul.f32 %v782_v37, %v771_v42  ;;  %v787_v55 = vmul.f32 %v783_v34, %v771_v42  ;;  %v788_v56 = vmul.f32 %v784_v38, %v771_v42 }
  0x8a   : > { %v6256_v21 = vpop.permute.xlu1 %893  ;;  %v6258_v22 = vpop.permute.xlu0 %824 }
  0x8b   : > { %v830_v27 = vmul.f32 %v6258_v22, %v734_v14  ;;  %v829_v28 = vmul.f32 %v6258_v22, %v733_v15  ;;  %v898_v47 = vmul.f32 %v6256_v21, %v783_v34  ;;  %v899_v12 = vmul.f32 %v6256_v21, %v784_v38 }
  0x8c   : > { %v827_v13 = vmul.f32 %v6258_v22, %v731_v40  ;;  %v897_v26 = vmul.f32 %v6256_v21, %v782_v37 }
  0x8d   : > { %841 = vrot.lane.b32.xlu2 %v830_v27, %s7943_s3  ;;  %839 = vrot.lane.b32.xlu1 %v829_v28, %s7943_s3  ;;  %v828_v27 = vmul.f32 %v6258_v22, %v732_v41  ;;  %v896_v28 = vmul.f32 %v6256_v21, %v6266_v36 }
  0x92   : > { %v860_v51 = vpop.permute.xlu0 %859  ;;  %v719_v52 = vpop.permute.xlu1 %718 }
  0x93   : > { %v735_v57 = vmul.f32 %v731_v40, %v719_v52  ;;  %v736_v58 = vmul.f32 %v732_v41, %v719_v52  ;;  %v737_v59 = vmul.f32 %v733_v15, %v719_v52  ;;  %v738_v60 = vmul.f32 %v734_v14, %v719_v52 }
  0x94   : > { %v864_v61 = vmul.f32 %v860_v51, %v756_v33  ;;  %v865_v62 = vmul.f32 %v860_v51, %v757_v35  ;;  %v862_v18 = vmul.f32 %v860_v51, %v754_v31  ;;  %v863_v25 = vmul.f32 %v860_v51, %v755_v32 }
  0x95   : > { %v762_v63 = vadd.f32 %v758_v39, %v735_v57  ;;  %v763_v0 = vadd.f32 %v759_v43, %v736_v58  ;;  %v764_v1 = vadd.f32 %v760_v44, %v737_v59  ;;  %908 = vrot.lane.b32.xlu2 %v898_v47, %s7943_s3  ;;  %v765_v2 = vadd.f32 %v761_v45, %v738_v60 }
  0x96   : > { %874 = vrot.lane.b32.xlu0 %v864_v61, %s7943_s3  ;;  %876 = vrot.lane.b32.xlu1 %v865_v62, %s7943_s3 }
  0x97   : > { %v792_v7 = vadd.f32 %v788_v56, %v765_v2  ;;  %v791_v8 = vadd.f32 %v787_v55, %v764_v1  ;;  %v789_v9 = vadd.f32 %v785_v53, %v762_v63  ;;  %v790_v10 = vadd.f32 %v786_v54, %v763_v0 }
  0x9a   : > { %v798_v11 = vpop.permute.xlu0 %797  ;;  %v927_v29 = vpop.permute.xlu1 %926 }
  0x9b   : > { %v812_v14 = vmul.f32 %v808_v3, %v798_v11  ;;  %v813_v15 = vmul.f32 %v809_v4, %v798_v11  ;;  %v814_v16 = vmul.f32 %v810_v5, %v798_v11  ;;  %v815_v17 = vmul.f32 %v811_v6, %v798_v11  ;;  %v1740_v5 = vld [vmem:[%s7969_s27] sm:$0xff]  ;;  %s7976_s27 = sld [smem:[#allocation13_spill]] }
  0x9d   : > { %835 = vrot.lane.b32.xlu2 %v827_v13, %s7943_s3  ;;  %v819_v19 = vadd.f32 %v815_v17, %v792_v7  ;;  %v818_v20 = vadd.f32 %v814_v16, %v791_v8  ;;  %v816_v23 = vadd.f32 %v812_v14, %v789_v9  ;;  %v817_v24 = vadd.f32 %v813_v15, %v790_v10  ;;  %v5515_v10 = vld [vmem:[%s7970_s29 + $0x8] sm:$0xff]  ;;  %v937_v15 = vld [vmem:[%s7970_s29] sm:$0xff] }
  0x9e   : > { %910 = vrot.lane.b32.xlu0 %v899_v12, %s7943_s3  ;;  %870 = vrot.lane.b32.xlu1 %v862_v18, %s7943_s3  ;;  %v5532_v18 = vld [vmem:[%s7970_s29 + $0x10] sm:$0xff] }
  0xa5   : > { %872 = vrot.lane.b32.xlu2 %v863_v25, %s7943_s3 }
  0xa6   : > { %906 = vrot.lane.b32.xlu1 %v897_v26, %s7943_s3  ;;  %837 = vrot.lane.b32.xlu0 %v828_v27, %s7943_s3  ;;  %v5541_v27 = vld [vmem:[%s7970_s29 + $0x18] sm:$0xff] }
  0xae   : > { %904 = vrot.lane.b32.xlu0 %v896_v28, %s7943_s3 }
  0xe7   : > { %v842_v30 = vpop.permute.xlu2 %841 }
  0xe8   : > { %v854_v35 = vadd.f32 %v842_v30, %v819_v19 }
  0xef   : > { %v909_v33 = vpop.permute.xlu2 %908 }
  0xf7   : > { %v836_v22 = vpop.permute.xlu2 %835 }
  0xff   : > { %v840_v31 = vpop.permute.xlu1 %839  ;;  %v873_v50 = vpop.permute.xlu2 %872 }
 0x100   : > { %v846_v37 = vsel %vm843_vm0, %v840_v31, %v842_v30 }
 0x101   : > { %v853_v21 = vadd.f32 %v846_v37, %v818_v20 }
 0x108   : > { %v875_v32 = vpop.permute.xlu0 %874  ;;  %v877_v34 = vpop.permute.xlu1 %876 }
 0x109   : > { %v888_v38 = vadd.f32 %v877_v34, %v854_v35  ;;  %v880_v41 = vsel %vm843_vm0, %v875_v32, %v877_v34  ;;  %v879_v54 = vsel %vm843_vm0, %v873_v50, %v875_v32  ;;  %v5550_v32 = vld [vmem:[%s7970_s29 + $0x20] sm:$0xff] }
 0x10a   : > { %v887_v44 = vadd.f32 %v880_v41, %v853_v21 }
 0x110   : > { %v911_v39 = vpop.permute.xlu0 %910  ;;  %v871_v40 = vpop.permute.xlu1 %870 }
 0x111   : > { %v922_v42 = vadd.f32 %v911_v39, %v888_v38  ;;  %v914_v36 = vsel %vm843_vm0, %v909_v33, %v911_v39  ;;  %v878_v60 = vsel %vm843_vm0, %v871_v40, %v873_v50  ;;  %v5559_v39 = vld [vmem:[%s7970_s29 + $0x28] sm:$0xff] }
 0x112   : > { %v921_v46 = vadd.f32 %v914_v36, %v887_v44  ;;  %v5568_v44 = vld [vmem:[%s7970_s29 + $0x30] sm:$0xff] }
 0x113   : > { %v932_v43 = vadd.f32 %v927_v29, %v922_v42 }
 0x114   : > { %v931_v51 = vadd.f32 %v927_v29, %v921_v46 }
 0x115   : > { %v6291_v45 = vmax.f32 %v932_v43, 0.0 }
 0x116   : > { %v935_v58 = vmax.f32 %v931_v51, 0.0 }
 0x117   : > { %1147 = vrot.lane.b32.xlu1 %v6291_v45, %s7945_s0  ;;  %950 = vrot.lane.b32.xlu0 %v6291_v45, %s7943_s3 }
 0x118   : > { %1256 = vrot.lane.b32.xlu2 %v6291_v45, %s7947_s4  ;;  %v838_v47 = vpop.permute.xlu0 %837  ;;  %v907_v52 = vpop.permute.xlu1 %906 }
 0x119   : > { %v844_v48 = vsel %vm843_vm0, %v836_v22, %v838_v47  ;;  %v845_v49 = vsel %vm843_vm0, %v838_v47, %v840_v31  ;;  %v913_v57 = vsel %vm843_vm0, %v907_v52, %v909_v33 }
 0x11a   : > { %v852_v53 = vadd.f32 %v845_v49, %v817_v24  ;;  %v851_v55 = vadd.f32 %v844_v48, %v816_v23 }
 0x11c   : > { %v886_v56 = vadd.f32 %v879_v54, %v852_v53  ;;  %v885_v62 = vadd.f32 %v878_v60, %v851_v55  ;;  %v1731_v55 = vld [vmem:[%s7971_s19 + $0x178] sm:$0xff]  ;;  %v1698_v60 = vld [vmem:[%s7971_s19 + $0x70] sm:$0xff] }
 0x11e   : > { %v920_v59 = vadd.f32 %v913_v57, %v886_v56  ;;  %v1699_v57 = vld [vmem:[%s7971_s19 + $0x78] sm:$0xff] }
 0x11f   : > { %1365 = vrot.lane.b32.xlu0 %v6291_v45, %s7937_s30 }
 0x120   : > { %948 = vrot.lane.b32.xlu2 %v935_v58, %s7943_s3  ;;  %v905_v61 = vpop.permute.xlu0 %904  ;;  %v930_v0 = vadd.f32 %v927_v29, %v920_v59  ;;  %v1730_v59 = vld [vmem:[%s7971_s19 + $0x170] sm:$0xff] }
 0x121   : > { %v912_v63 = vsel %vm843_vm0, %v905_v61, %v907_v52  ;;  %v1714_v61 = vld [vmem:[%s7971_s19 + $0xf0] sm:$0xff] }
 0x122   : > { %v919_v1 = vadd.f32 %v912_v63, %v885_v62  ;;  %v934_v3 = vmax.f32 %v930_v0, 0.0  ;;  %v1729_v62 = vld [vmem:[%s7971_s19 + $0x168] sm:$0xff] }
 0x123   : > { %v1697_v63 = vld [vmem:[%s7971_s19 + $0x68] sm:$0xff] }
 0x124   : > { %v929_v2 = vadd.f32 %v927_v29, %v919_v1  ;;  %v1713_v0 = vld [vmem:[%s7971_s19 + $0xe8] sm:$0xff]  ;;  %v1728_v1 = vld [vmem:[%s7971_s19 + $0x160] sm:$0xff] }
 0x126   : > { %v6308_v4 = vmax.f32 %v929_v2, 0.0  ;;  %v1739_v2 = vld [vmem:[%s7971_s19 + $0x1b8] sm:$0x1] }
 0x127   : > { %1145 = vrot.lane.b32.xlu0 %v935_v58, %s7945_s0 }
 0x128   : > { %946 = vrot.lane.b32.xlu2 %v934_v3, %s7943_s3  ;;  %944 = vrot.lane.b32.xlu1 %v6308_v4, %s7943_s3 }
 0x12f   : > { %1143 = vrot.lane.b32.xlu0 %v934_v3, %s7945_s0 }
 0x130   : > { %1141 = vrot.lane.b32.xlu2 %v6308_v4, %s7945_s0  ;;  %1474 = vrot.lane.b32.xlu1 %v6291_v45, %s7939_s5 }
 0x137   : > { %1250 = vrot.lane.b32.xlu0 %v6308_v4, %s7947_s4 }
 0x138   : > { %1363 = vrot.lane.b32.xlu2 %v935_v58, %s7937_s30  ;;  %1254 = vrot.lane.b32.xlu1 %v935_v58, %s7947_s4 }
 0x13f   : > { %1472 = vrot.lane.b32.xlu0 %v935_v58, %s7939_s5 }
 0x140   : > { %1361 = vrot.lane.b32.xlu2 %v934_v3, %s7937_s30  ;;  %1252 = vrot.lane.b32.xlu1 %v934_v3, %s7947_s4 }
 0x147   : > { %1470 = vrot.lane.b32.xlu0 %v934_v3, %s7939_s5 }
 0x148   : > { %1468 = vrot.lane.b32.xlu2 %v6308_v4, %s7939_s5  ;;  %1359 = vrot.lane.b32.xlu1 %v6308_v4, %s7937_s30  ;;  %s7975_s30 = smov 124   ;;  %s7981_s5 = smov 125  }
 0x14f   : > { %1577 = vrot.lane.b32.xlu0 %v6308_v4, %s7941_s1 }
 0x150   : > { %1583 = vrot.lane.b32.xlu2 %v6291_v45, %s7941_s1  ;;  %1581 = vrot.lane.b32.xlu1 %v935_v58, %s7941_s1 }
 0x158   : > { %1743 = vperm.xlu2 %5912, %v1740_v5   ;;  %1579 = vrot.lane.b32.xlu1 %v934_v3, %s7941_s1  ;;  %s7952_s1 = smov 6  }
 0x172   : > { %v1257_v6 = vpop.permute.xlu2 %1256 }
 0x17a   : > { %v949_v7 = vpop.permute.xlu2 %948 }
 0x182   : > { %v947_v8 = vpop.permute.xlu2 %946 }
 0x183   : > { %v953_v9 = vsel %vm843_vm0, %v947_v8, %v949_v7 }
 0x184   : > { %5518 = vmatpush.msk.msra.mxu1 %vm959_vm1, %v953_v9 }
 0x185   : > { %5519 = vmatmul.msk.f32.vlgmr.msra.gmra.mxu1 %vm955_vm2, %v5515_v10 }
 0x186   : > { %5526 = vmatpush.msk.msrb.mxu1 %vm959_vm1, %v934_v3  ;;  %v1696_v3 = vld [vmem:[%s7971_s19 + $0x60] sm:$0xff] }
 0x189   : > { %v951_v11 = vpop.permute.xlu0 %950  ;;  %v1148_v14 = vpop.permute.xlu1 %1147 }
 0x18a   : > { %v1142_v12 = vpop.permute.xlu2 %1141  ;;  %5522 = vmatpush.msk.msra.mxu3 %vm959_vm1, %v951_v11  ;;  %v954_v13 = vsel %vm843_vm0, %v949_v7, %v951_v11  ;;  %v1738_v7 = vld [vmem:[%s7971_s19 + $0x1b0] sm:$0xff]  ;;  %v1711_v11 = vld [vmem:[%s7971_s19 + $0xd8] sm:$0xff] }
 0x18b   : > { %5520 = vmatpush.msk.msra.mxu2 %vm959_vm1, %v954_v13  ;;  %5523 = vmatmul.msk.f32.vlgmr.msra.gmra.mxu3 %vm955_vm2, %v5515_v10  ;;  %v1737_v13 = vld [vmem:[%s7971_s19 + $0x1a8] sm:$0xff] }
 0x18c   : > { %5530 = vmatpush.msk.msrb.mxu3 %vm959_vm1, %v6291_v45  ;;  %5521 = vmatmul.msk.f32.vlgmr.msra.gmra.mxu2 %vm955_vm2, %v5515_v10 }
 0x18d   : > { %5528 = vmatpush.msk.msrb.mxu2 %vm959_vm1, %v935_v58  ;;  %5527 = vmatmul.msk.f32.vlgmr.msrb.gmra.mxu1 %vm955_vm2, %v937_v15  ;;  %v1715_v58 = vld [vmem:[%s7971_s19 + $0xf8] sm:$0xff] }
 0x18e   : > { %5539 = vmatpush.msk.msra.mxu3 %vm959_vm1, %v1148_v14 }
 0x191   : > { %v1366_v16 = vpop.permute.xlu0 %1365 }
 0x192   : > { %v1364_v17 = vpop.permute.xlu2 %1363 }
 0x193   : > { %5531 = vmatmul.msk.f32.vlgmr.msrb.gmra.mxu3 %vm955_vm2, %v937_v15  ;;  %v1370_v37 = vsel %vm1367_vm5, %v1364_v17, %v1366_v16 }
 0x194   : > { %5548 = vmatpush.msk.msrb.mxu3 %vm959_vm1, %v1257_v6  ;;  %5529 = vmatmul.msk.f32.vlgmr.msrb.gmra.mxu2 %vm955_vm2, %v937_v15 }
 0x199   : > { %v1146_v19 = vpop.permute.xlu0 %1145 }
 0x19a   : > { %v1152_v20 = vsel %vm1149_vm3, %v1146_v19, %v1148_v14  ;;  %v1362_v23 = vpop.permute.xlu2 %1361  ;;  %v945_v24 = vpop.permute.xlu1 %944  ;;  %v1694_v14 = vld [vmem:[%s7971_s19 + $0x50] sm:$0xff] }
 0x19b   : > { %5537 = vmatpush.msk.msra.mxu2 %vm959_vm1, %v1152_v20  ;;  %5540 = vmatmul.msk.f32.vlgmr.msra.gmra.mxu3 %vm955_vm2, %v5532_v18  ;;  %v952_v25 = vsel %vm843_vm0, %v945_v24, %v947_v8  ;;  %v1369_v36 = vsel %vm1367_vm5, %v1362_v23, %v1364_v17  ;;  %v1709_v20 = vld [vmem:[%s7971_s19 + $0xc8] sm:$0xff]  ;;  %v1735_v24 = vld [vmem:[%s7971_s19 + $0x198] sm:$0xff] }
 0x19c   : > { %5557 = vmatpush.msk.msra.mxu3 %vm959_vm1, %v1366_v16  ;;  %5516 = vmatpush.msk.msra.mxu0 %vm959_vm1, %v952_v25  ;;  %v1725_v16 = vld [vmem:[%s7971_s19 + $0x148] sm:$0xff]  ;;  %v1692_v25 = vld [vmem:[%s7971_s19 + $0x40] sm:$0xff] }
 0x19d   : > { %5538 = vmatmul.msk.f32.vlgmr.msra.gmra.mxu2 %vm955_vm2, %v5532_v18  ;;  %5517 = vmatmul.msk.f32.vlgmr.msra.gmra.mxu0 %vm955_vm2, %v5515_v10  ;;  %v1695_v10 = vld [vmem:[%s7971_s19 + $0x58] sm:$0xff] }
 0x19e   : > { %5524 = vmatpush.msk.msrb.mxu0 %vm959_vm1, %v6308_v4  ;;  %v1712_v4 = vld [vmem:[%s7971_s19 + $0xe0] sm:$0xff] }
 0x1a1   : > { %v1144_v26 = vpop.permute.xlu0 %1143 }
 0x1a2   : > { %v1150_v28 = vsel %vm1149_vm3, %v1142_v12, %v1144_v26  ;;  %v1151_v29 = vsel %vm1149_vm3, %v1144_v26, %v1146_v19  ;;  %v1469_v30 = vpop.permute.xlu2 %1468  ;;  %v1475_v31 = vpop.permute.xlu1 %1474  ;;  %v1726_v12 = vld [vmem:[%s7971_s19 + $0x150] sm:$0xff]  ;;  %v1693_v19 = vld [vmem:[%s7971_s19 + $0x48] sm:$0xff]  ;;  %v1708_v26 = vld [vmem:[%s7971_s19 + $0xc0] sm:$0xff] }
 0x1a3   : > { %5533 = vmatpush.msk.msra.mxu0 %vm959_vm1, %v1150_v28  ;;  %5535 = vmatpush.msk.msra.mxu1 %vm959_vm1, %v1151_v29  ;;  %v1734_v28 = vld [vmem:[%s7971_s19 + $0x190] sm:$0xff] }
 0x1a4   : > { %5549 = vmatmul.msk.f32.vlgmr.msrb.gmra.mxu3 %vm955_vm2, %v5541_v27  ;;  %5536 = vmatmul.msk.f32.vlgmr.msra.gmra.mxu1 %vm955_vm2, %v5532_v18 }
 0x1a5   : > { %5566 = vmatpush.msk.msrb.mxu3 %vm959_vm1, %v1475_v31  ;;  %5525 = vmatmul.msk.f32.vlgmr.msrb.gmra.mxu0 %vm955_vm2, %v937_v15  ;;  %v1710_v15 = vld [vmem:[%s7971_s19 + $0xd0] sm:$0xff] }
 0x1a9   : > { %v1251_v33 = vpop.permute.xlu0 %1250 }
 0x1aa   : > { %v1584_v34 = vpop.permute.xlu2 %1583  ;;  %v1255_v35 = vpop.permute.xlu1 %1254 }
 0x1ab   : > { %v1261_v22 = vsel %vm1258_vm4, %v1255_v35, %v1257_v6  ;;  %v1727_v6 = vld [vmem:[%s7971_s19 + $0x158] sm:$0xff] }
 0x1ac   : > { %5558 = vmatmul.msk.f32.vlgmr.msra.gmra.mxu3 %vm955_vm2, %v5550_v32  ;;  %5546 = vmatpush.msk.msrb.mxu2 %vm959_vm1, %v1261_v22  ;;  %v1690_v22 = vld [vmem:[%s7971_s19 + $0x30] sm:$0xff] }
 0x1ad   : > { %5575 = vmatpush.msk.msra.mxu3 %vm959_vm1, %v1584_v34  ;;  %5534 = vmatmul.msk.f32.vlgmr.msra.gmra.mxu0 %vm955_vm2, %v5532_v18  ;;  %v1736_v18 = vld [vmem:[%s7971_s19 + $0x1a0] sm:$0xff] }
 0x1ae   : > { %5547 = vmatmul.msk.f32.vlgmr.msrb.gmra.mxu2 %vm955_vm2, %v5541_v27 }
 0x1af   : > { %5555 = vmatpush.msk.msra.mxu2 %vm959_vm1, %v1370_v37  ;;  %v1706_v37 = vld [vmem:[%s7971_s19 + $0xb0] sm:$0xff] }
 0x1b1   : > { %v1473_v38 = vpop.permute.xlu0 %1472 }
 0x1b2   : > { %v1479_v40 = vsel %vm1476_vm6, %v1473_v38, %v1475_v31  ;;  %v1253_v41 = vpop.permute.xlu1 %1252  ;;  %v1691_v31 = vld [vmem:[%s7971_s19 + $0x38] sm:$0xff] }
 0x1b3   : > { %v1259_v42 = vsel %vm1258_vm4, %v1251_v33, %v1253_v41  ;;  %v1260_v21 = vsel %vm1258_vm4, %v1253_v41, %v1255_v35  ;;  %5564 = vmatpush.msk.msrb.mxu2 %vm959_vm1, %v1479_v40  ;;  %v1707_v33 = vld [vmem:[%s7971_s19 + $0xb8] sm:$0xff]  ;;  %v1732_v40 = vld [vmem:[%s7971_s19 + $0x180] sm:$0xff]  ;;  %v1689_v41 = vld [vmem:[%s7971_s19 + $0x28] sm:$0xff] }
 0x1b4   : > { %5567 = vmatmul.msk.f32.vlgmr.msrb.gmra.mxu3 %vm955_vm2, %v5559_v39  ;;  %5542 = vmatpush.msk.msrb.mxu0 %vm959_vm1, %v1259_v42  ;;  %v1705_v42 = vld [vmem:[%s7971_s19 + $0xa8] sm:$0xff] }
 0x1b5   : > { %5544 = vmatpush.msk.msrb.mxu1 %vm959_vm1, %v1260_v21  ;;  %5543 = vmatmul.msk.f32.vlgmr.msrb.gmra.mxu0 %vm955_vm2, %v5541_v27  ;;  %v1720_v21 = vld [vmem:[%s7971_s19 + $0x120] sm:$0xff] }
 0x1b6   : > { %5545 = vmatmul.msk.f32.vlgmr.msrb.gmra.mxu1 %vm955_vm2, %v5541_v27  ;;  %5556 = vmatmul.msk.f32.vlgmr.msra.gmra.mxu2 %vm955_vm2, %v5550_v32  ;;  %v1723_v27 = vld [vmem:[%s7971_s19 + $0x138] sm:$0xff] }
 0x1b7   : > { %5553 = vmatpush.msk.msra.mxu1 %vm959_vm1, %v1369_v36  ;;  %5577 = vmatpush.msk.msrb.mxu3 %vm1750_vm8, %v1739_v2  ;;  %v1688_v36 = vld [vmem:[%s7971_s19 + $0x20] sm:$0xff] }
 0x1b9   : > { %v1471_v43 = vpop.permute.xlu0 %1470  ;;  %1823 = vmatpush.msrb.mxu3 %v1738_v7 }
 0x1ba   : > { %v1478_v45 = vsel %vm1476_vm6, %v1471_v43, %v1473_v38  ;;  %v1360_v46 = vpop.permute.xlu1 %1359  ;;  %v1477_v48 = vsel %vm1476_vm6, %v1469_v30, %v1471_v43  ;;  %v1721_v38 = vld [vmem:[%s7971_s19 + $0x128] sm:$0xff]  ;;  %v1704_v43 = vld [vmem:[%s7971_s19 + $0xa0] sm:$0xff] }
 0x1bb   : > { %v1368_v47 = vsel %vm1367_vm5, %v1360_v46, %v1362_v23  ;;  %5562 = vmatpush.msk.msrb.mxu1 %vm959_vm1, %v1478_v45  ;;  %1824 = vmatpush.msrb.mxu3 %v1737_v13  ;;  %v1724_v23 = vld [vmem:[%s7971_s19 + $0x140] sm:$0xff]  ;;  %v1687_v45 = vld [vmem:[%s7971_s19 + $0x18] sm:$0xff] }
 0x1bc   : > { %5576 = vmatmul.msk.f32.vlgmr.msra.gmra.mxu3 %vm955_vm2, %v5568_v44  ;;  %5551 = vmatpush.msk.msra.mxu0 %vm959_vm1, %v1368_v47  ;;  %v1703_v46 = vld [vmem:[%s7971_s19 + $0x98] sm:$0xff]  ;;  %v1718_v47 = vld [vmem:[%s7971_s19 + $0x110] sm:$0xff] }
 0x1bd   : > { %5552 = vmatmul.msk.f32.vlgmr.msra.gmra.mxu0 %vm955_vm2, %v5550_v32  ;;  %1825 = vmatpush.msrb.mxu3 %v1736_v18 }
 0x1be   : > { %5554 = vmatmul.msk.f32.vlgmr.msra.gmra.mxu1 %vm955_vm2, %v5550_v32  ;;  %5560 = vmatpush.msk.msrb.mxu0 %vm959_vm1, %v1477_v48  ;;  %v1722_v32 = vld [vmem:[%s7971_s19 + $0x130] sm:$0xff] }
 0x1bf   : > { %5565 = vmatmul.msk.f32.vlgmr.msrb.gmra.mxu2 %vm955_vm2, %v5559_v39  ;;  %1826 = vmatpush.msrb.mxu3 %v1735_v24 }
 0x1c1   : > { %v1578_v51 = vpop.permute.xlu0 %1577  ;;  %1827 = vmatpush.msrb.mxu3 %v1734_v28 }
 0x1c2   : > { %v1582_v49 = vpop.permute.xlu1 %1581 }
 0x1c3   : > { %v1588_v50 = vsel %vm1585_vm7, %v1582_v49, %v1584_v34  ;;  %v1733_v34 = vld [vmem:[%s7971_s19 + $0x188] sm:$0xff] }
 0x1c4   : > { %5573 = vmatpush.msk.msra.mxu2 %vm959_vm1, %v1588_v50  ;;  %1828 = vmatpush.msrb.mxu3 %v1733_v34  ;;  %v1686_v50 = vld [vmem:[%s7971_s19 + $0x10] sm:$0xff] }
 0x1c5   : > { %5561 = vmatmul.msk.f32.vlgmr.msrb.gmra.mxu0 %vm955_vm2, %v5559_v39 }
 0x1c6   : > { %5563 = vmatmul.msk.f32.vlgmr.msrb.gmra.mxu1 %vm955_vm2, %v5559_v39  ;;  %1794 = vmatpush.msrb.mxu2 %v1731_v55  ;;  %v1685_v55 = vld [vmem:[%s7971_s19 + $0x8] sm:$0xff] }
 0x1c7   : > { %5574 = vmatmul.msk.f32.vlgmr.msra.gmra.mxu2 %vm955_vm2, %v5568_v44  ;;  %1829 = vmatpush.msrb.mxu3 %v1732_v40 }
 0x1c8   : > { %1795 = vmatpush.msrb.mxu2 %v1730_v59  ;;  %v1684_v59 = vld [vmem:[%s7971_s19] sm:$0xff] }
 0x1ca   : > { %v1580_v52 = vpop.permute.xlu1 %1579  ;;  %1796 = vmatpush.msrb.mxu2 %v1729_v62 }
 0x1cb   : > { %v1586_v53 = vsel %vm1585_vm7, %v1578_v51, %v1580_v52  ;;  %v1587_v54 = vsel %vm1585_vm7, %v1580_v52, %v1582_v49  ;;  %v1702_v51 = vld [vmem:[%s7971_s19 + $0x90] sm:$0xff]  ;;  %v1717_v52 = vld [vmem:[%s7971_s19 + $0x108] sm:$0xff] }
 0x1cc   : > { %5569 = vmatpush.msk.msra.mxu0 %vm959_vm1, %v1586_v53  ;;  %5571 = vmatpush.msk.msra.mxu1 %vm959_vm1, %v1587_v54 }
 0x1cd   : > { %5570 = vmatmul.msk.f32.vlgmr.msra.gmra.mxu0 %vm955_vm2, %v5568_v44  ;;  %1797 = vmatpush.msrb.mxu2 %v1728_v1 }
 0x1ce   : > { %5572 = vmatmul.msk.f32.vlgmr.msra.gmra.mxu1 %vm955_vm2, %v5568_v44  ;;  %1754 = vmatpush.msrb.mxu0 %v1699_v57  ;;  %v1719_v44 = vld [vmem:[%s7971_s19 + $0x118] sm:$0xff]  ;;  %v1701_v57 = vld [vmem:[%s7971_s19 + $0x88] sm:$0xff]  ;;  %vm3101_vm2 = vcmask 957440  }
 0x1cf   : > { %1774 = vmatpush.msrb.mxu1 %v1715_v58  ;;  %1798 = vmatpush.msrb.mxu2 %v1727_v6  ;;  %v1716_v58 = vld [vmem:[%s7971_s19 + $0x100] sm:$0xff] }
 0x1d0   : > { %1755 = vmatpush.msrb.mxu0 %v1698_v60  ;;  %v1700_v60 = vld [vmem:[%s7971_s19 + $0x80] sm:$0xff] }
 0x1d1   : > { %1775 = vmatpush.msrb.mxu1 %v1714_v61  ;;  %1799 = vmatpush.msrb.mxu2 %v1726_v12 }
 0x1d2   : > { %1756 = vmatpush.msrb.mxu0 %v1697_v63 }
 0x1d3   : > { %1776 = vmatpush.msrb.mxu1 %v1713_v0  ;;  %1800 = vmatpush.msrb.mxu2 %v1725_v16 }
 0x1d4   : > { %1757 = vmatpush.msrb.mxu0 %v1696_v3 }
 0x1d5   : > { %1777 = vmatpush.msrb.mxu1 %v1712_v4  ;;  %1801 = vmatpush.msrb.mxu2 %v1724_v23 }
 0x1d6   : > { %1758 = vmatpush.msrb.mxu0 %v1695_v10 }
 0x1d7   : > { %1778 = vmatpush.msrb.mxu1 %v1711_v11  ;;  %1802 = vmatpush.msrb.mxu2 %v1723_v27 }
 0x1d8   : > { %1759 = vmatpush.msrb.mxu0 %v1694_v14 }
 0x1d9   : > { %1779 = vmatpush.msrb.mxu1 %v1710_v15  ;;  %1803 = vmatpush.msrb.mxu2 %v1722_v32 }
 0x1da   : > { %1760 = vmatpush.msrb.mxu0 %v1693_v19 }
 0x1db   : > { %1780 = vmatpush.msrb.mxu1 %v1709_v20  ;;  %1804 = vmatpush.msrb.mxu2 %v1721_v38 }
 0x1dc   : > { %1761 = vmatpush.msrb.mxu0 %v1692_v25 }
 0x1dd   : > { %1781 = vmatpush.msrb.mxu1 %v1708_v26  ;;  %1805 = vmatpush.msrb.mxu2 %v1720_v21 }
 0x1de   : > { %1762 = vmatpush.msrb.mxu0 %v1691_v31 }
 0x1df   : > { %1782 = vmatpush.msrb.mxu1 %v1707_v33  ;;  %1806 = vmatpush.msrb.mxu2 %v1719_v44 }
 0x1e0   : > { %1763 = vmatpush.msrb.mxu0 %v1690_v22 }
 0x1e1   : > { %1783 = vmatpush.msrb.mxu1 %v1706_v37  ;;  %1807 = vmatpush.msrb.mxu2 %v1718_v47  ;;  %v1744_v37 = vpop.permute.xlu2 %1743 }
 0x1e2   : > { %1764 = vmatpush.msrb.mxu0 %v1689_v41 }
 0x1e3   : > { %1784 = vmatpush.msrb.mxu1 %v1705_v42  ;;  %1808 = vmatpush.msrb.mxu2 %v1717_v52  ;;  %v2101_v52 = vld [vmem:[%s7978_s20 + $0x68] sm:$0x1] }
 0x1e4   : > { %1765 = vmatpush.msrb.mxu0 %v1688_v36 }
 0x1e5   : > { %1785 = vmatpush.msrb.mxu1 %v1704_v43  ;;  %1809 = vmatpush.msrb.mxu2 %v1716_v58 }
 0x1e6   : > { %1766 = vmatpush.msrb.mxu0 %v1687_v45  ;;  %v2103_v45 = vld [vmem:[%s7976_s27 + $0x8] sm:$0xff] }
 0x1e7   : > { %1786 = vmatpush.msrb.mxu1 %v1703_v46  ;;  %v2102_v46 = vld [vmem:[%s7976_s27] sm:$0xff]  ;;  %s7983_s27 = smov 6  }
 0x1e8   : > { %1767 = vmatpush.msrb.mxu0 %v1686_v50 }
 0x1e9   : > { %1787 = vmatpush.msrb.mxu1 %v1702_v51 }
 0x1ea   : > { %1768 = vmatpush.msrb.mxu0 %v1685_v55 }
 0x1eb   : > { %1788 = vmatpush.msrb.mxu1 %v1701_v57 }
 0x1ec   : > { %1769 = vmatpush.msrb.mxu0 %v1684_v59 }
 0x1ed   : > { %1789 = vmatpush.msrb.mxu1 %v1700_v60 }
 0x202   : > { %v6489_v9 = vpop.f32.mrf.mxu1 }
 0x20a   : > { %v6557_v35 = vpop.f32.mrf.mxu1 }
 0x20e   : > { %v6440_v56 = vpop.f32.mrf.mxu3 }
 0x20f   : > { %v6478_v5 = vpop.f32.mrf.mxu2 }
 0x216   : > { %v6487_v8 = vpop.f32.mrf.mxu3 }
 0x217   : > { %v6543_v30 = vpop.f32.mrf.mxu2  ;;  %v1137_v1 = vadd.f32 %v6487_v8, %v6440_v56  ;;  %v1097_v56 = vadd.f32 %v6557_v35, %v6489_v9 }
 0x218   : > { %v1117_v15 = vadd.f32 %v6543_v30, %v6478_v5 }
 0x21a   : > { %v6512_v17 = vpop.f32.mrf.mxu0 }
 0x21e   : > { %v6541_v29 = vpop.f32.mrf.mxu3 }
 0x21f   : > { %v1247_v3 = vadd.f32 %v6541_v29, %v1137_v1 }
 0x220   : > { %v1221_v49 = vpop.f32.mrf.mxu2 }
 0x221   : > { %v1201_v54 = vpop.f32.mrf.mxu1  ;;  %v1246_v19 = vadd.f32 %v1221_v49, %v1117_v15  ;;  %v2093_v15 = vld [vmem:[%s7978_s20 + $0x28] sm:$0xff] }
 0x222   : > { %v1076_v39 = vpop.f32.mrf.mxu0  ;;  %v1245_v24 = vadd.f32 %v1201_v54, %v1097_v56  ;;  %v2091_v56 = vld [vmem:[%s7978_s20 + $0x18] sm:$0xff] }
 0x223   : > { %v1077_v16 = vadd.f32 %v1076_v39, %v6512_v17 }
 0x227   : > { %v1350_v48 = vpop.f32.mrf.mxu3 }
 0x228   : > { %v1356_v6 = vadd.f32 %v1350_v48, %v1247_v3 }
 0x22a   : > { %v1181_v53 = vpop.f32.mrf.mxu0 }
 0x22b   : > { %v1244_v20 = vadd.f32 %v1181_v53, %v1077_v16  ;;  %v2100_v53 = vld [vmem:[%s7978_s20 + $0x60] sm:$0xff] }
 0x22c   : > { %v2092_v16 = vld [vmem:[%s7978_s20 + $0x20] sm:$0xff] }
 0x22f   : > { %v1459_v61 = vpop.f32.mrf.mxu3 }
 0x230   : > { %v1465_v11 = vadd.f32 %v1459_v61, %v1356_v6 }
 0x231   : > { %v1330_v62 = vpop.f32.mrf.mxu2 }
 0x232   : > { %v1290_v63 = vpop.f32.mrf.mxu0  ;;  %v1355_v25 = vadd.f32 %v1330_v62, %v1246_v19  ;;  %v2088_v19 = vld [vmem:[%s7978_s20] sm:$0xff] }
 0x233   : > { %v1310_v0 = vpop.f32.mrf.mxu1  ;;  %v1353_v26 = vadd.f32 %v1290_v63, %v1244_v20 }
 0x234   : > { %v1354_v27 = vadd.f32 %v1310_v0, %v1245_v24  ;;  %v2153_v24 = vld [vmem:[%s7979_s7 + $0x18] sm:$0x7] }
 0x237   : > { %v1568_v2 = vpop.f32.mrf.mxu3 }
 0x238   : > { %v1574_v12 = vadd.f32 %v1568_v2, %v1465_v11  ;;  %v2097_v11 = vld [vmem:[%s7978_s20 + $0x48] sm:$0xff] }
 0x239   : > { %v1439_v4 = vpop.f32.mrf.mxu2 }
 0x23a   : > { %v1399_v7 = vpop.f32.mrf.mxu0  ;;  %v1464_v28 = vadd.f32 %v1439_v4, %v1355_v25 }
 0x23b   : > { %v1419_v10 = vpop.f32.mrf.mxu1  ;;  %v1462_v29 = vadd.f32 %v1399_v7, %v1353_v26  ;;  %v2099_v7 = vld [vmem:[%s7978_s20 + $0x58] sm:$0xff] }
 0x23c   : > { %v1463_v31 = vadd.f32 %v1419_v10, %v1354_v27  ;;  %v2098_v10 = vld [vmem:[%s7978_s20 + $0x50] sm:$0xff] }
 0x23f   : > { %v1677_v13 = vpop.f32.mrf.mxu3 }
 0x240   : > { %v1683_v14 = vadd.f32 %v1677_v13, %v1574_v12  ;;  %v2096_v12 = vld [vmem:[%s7978_s20 + $0x40] sm:$0xff]  ;;  %v2095_v13 = vld [vmem:[%s7978_s20 + $0x38] sm:$0xff] }
 0x242   : > { %v1548_v8 = vpop.f32.mrf.mxu2  ;;  %5578 = vmatmul.msk.f32.vlgmr.msrb.gmra.mxu3 %vm1746_vm9, %v1683_v14  ;;  %v1508_v18 = vpop.f32.mrf.mxu0  ;;  %v2094_v14 = vld [vmem:[%s7978_s20 + $0x30] sm:$0xff]  ;;  %vm3148_vm9 = vcmask 908336  }
 0x243   : > { %v1528_v23 = vpop.f32.mrf.mxu1  ;;  %v1573_v33 = vadd.f32 %v1548_v8, %v1464_v28  ;;  %v1571_v5 = vadd.f32 %v1508_v18, %v1462_v29  ;;  %v2090_v8 = vld [vmem:[%s7978_s20 + $0x10] sm:$0xff]  ;;  %v2089_v18 = vld [vmem:[%s7978_s20 + $0x8] sm:$0xff] }
 0x244   : > { %v1572_v30 = vadd.f32 %v1528_v23, %v1463_v31 }
 0x24a   : > { %v1657_v17 = vpop.f32.mrf.mxu2  ;;  %v1617_v32 = vpop.f32.mrf.mxu0 }
 0x24b   : > { %v1682_v34 = vadd.f32 %v1657_v17, %v1573_v33  ;;  %v1680_v9 = vadd.f32 %v1617_v32, %v1571_v5  ;;  %v1637_v35 = vpop.f32.mrf.mxu1 }
 0x24c   : > { %v1681_v22 = vadd.f32 %v1637_v35, %v1572_v30 }
 0x24d   : > { %1810 = vmatmul.f32.vlgmr.msrb.gmra.mxu2 %v1682_v34  ;;  %1770 = vmatmul.f32.vlgmr.msrb.gmra.mxu0 %v1680_v9 }
 0x24e   : > { %1790 = vmatmul.f32.vlgmr.msrb.gmra.mxu1 %v1681_v22 }
 0x2c5   : > { %v1831_v36 = vpop.f32.mrf.mxu3 }
 0x2ca   : > { %v1771_v38 = vpop.f32.mrf.mxu0 }
 0x2cb   : > { %v1772_v39 = vadd.f32 %v1771_v38, %v1744_v37  ;;  %v1791_v40 = vpop.f32.mrf.mxu1 }
 0x2cd   : > { %v1792_v41 = vadd.f32 %v1791_v40, %v1772_v39 }
 0x2d0   : > { %v1811_v42 = vpop.f32.mrf.mxu2 }
 0x2d1   : > { %v1812_v21 = vadd.f32 %v1811_v42, %v1792_v41 }
 0x2d3   : > { %v1832_v43 = vadd.f32 %v1831_v36, %v1812_v21 }
 0x2d5   : > { %v1834_v44 = vmax.f32 %v1832_v43, 0.0 }
 0x2d7   : > { %1943 = vrot.lane.b32.xlu2 %v1834_v44, %s7947_s4  ;;  %1906 = vrot.lane.b32.xlu1 %v1834_v44, %s7945_s0  ;;  %s7977_s4 = sld [smem:[#allocation12_spill]] }
 0x2d8   : > { %1841 = vrot.lane.b32.xlu0 %v1834_v44, %s7972_s28  ;;  %1895 = vmatpush.msra.mxu0 %v1834_v44 }
 0x2dd   : > { %v5589_v47 = vld [vmem:[%s7977_s4 + $0x30] sm:$0xff]  ;;  %v1835_v49 = vld [vmem:[%s7977_s4] sm:$0xff]  ;;  %v5590_v50 = vld [vmem:[%s7977_s4 + $0x38] sm:$0xff] }
 0x2de   : > { %5583 = vmatmul.msk.f32.vlgmr.msra.gmra.mxu0 %vm1844_vm10, %v1835_v49  ;;  %v1836_v51 = vld [vmem:[%s7977_s4 + $0x8] sm:$0xff]  ;;  %v5579_v55 = vld [vmem:[%s7977_s4 + $0x10] sm:$0xff]  ;;  %v5585_v57 = vld [vmem:[%s7977_s4 + $0x20] sm:$0xff] }
 0x2df   : > { %2054 = vrot.lane.b32.xlu2 %v1834_v44, %s7973_s18  ;;  %2017 = vrot.lane.b32.xlu1 %v1834_v44, %s7974_s6  ;;  %v5597_v60 = vld [vmem:[%s7977_s4 + $0x50] sm:$0xff]  ;;  %v5580_v62 = vld [vmem:[%s7977_s4 + $0x18] sm:$0xff] }
 0x2e0   : > { %1980 = vrot.lane.b32.xlu0 %v1834_v44, %s7975_s30  ;;  %v5586_v63 = vld [vmem:[%s7977_s4 + $0x28] sm:$0xff]  ;;  %v5598_v1 = vld [vmem:[%s7977_s4 + $0x58] sm:$0xff]  ;;  %v5593_v2 = vld [vmem:[%s7977_s4 + $0x40] sm:$0xff] }
 0x2e1   : > { %v5601_v3 = vld [vmem:[%s7977_s4 + $0x60] sm:$0xff]  ;;  %v5594_v4 = vld [vmem:[%s7977_s4 + $0x48] sm:$0xff]  ;;  %v2152_v44 = vld [vmem:[%s7979_s7 + $0x10] sm:$0xff] }
 0x2e2   : > { %v5602_v6 = vld [vmem:[%s7977_s4 + $0x68] sm:$0xff]  ;;  %v5624_v49 = vld [vmem:[%s7979_s7 + $0x70] sm:$0xff] }
 0x2e6   : > { %5584 = vmatmul.msk.f32.gmra.mxu0 %vm1844_vm10, %v1836_v51  ;;  %v5617_v51 = vld [vmem:[%s7979_s7 + $0x48] sm:$0xff] }
 0x2e7   : > { %2111 = vperm.xlu1 %5911, %v2103_v45   ;;  %v5619_v45 = vld [vmem:[%s7979_s7 + $0x58] sm:$0x7] }
 0x2e8   : > { %2106 = vperm.xlu0 %5910, %v2102_v46   ;;  %v5625_v46 = vld [vmem:[%s7979_s7 + $0x78] sm:$0x7] }
 0x331   : > { %v1944_v48 = vpop.permute.xlu2 %1943 }
 0x332   : > { %1967 = vmatpush.msra.mxu2 %v1944_v48  ;;  %v5618_v48 = vld [vmem:[%s7979_s7 + $0x50] sm:$0xff] }
 0x333   : > { %5591 = vmatmul.msk.f32.vlgmr.msra.gmra.mxu2 %vm1844_vm10, %v5589_v47  ;;  %v2151_v47 = vld [vmem:[%s7979_s7 + $0x8] sm:$0xff] }
 0x334   : > { %5605 = vmatpush.msk.msrb.mxu2 %vm1750_vm8, %v2101_v52  ;;  %v5623_v52 = vld [vmem:[%s7979_s7 + $0x68] sm:$0xff] }
 0x336   : > { %2127 = vmatpush.msrb.mxu2 %v2100_v53  ;;  %v5613_v53 = vld [vmem:[%s7979_s7 + $0x38] sm:$0x7] }
 0x338   : > { %2128 = vmatpush.msrb.mxu2 %v2099_v7  ;;  %v5634_v7 = vld [vmem:[%s7979_s7 + $0xa0] sm:$0xff] }
 0x339   : > { %v2055_v58 = vpop.permute.xlu2 %2054 }
 0x33a   : > { %2129 = vmatpush.msrb.mxu2 %v2098_v10  ;;  %v5640_v10 = vld [vmem:[%s7979_s7 + $0xc0] sm:$0xff] }
 0x33b   : > { %5592 = vmatmul.msk.f32.gmra.mxu2 %vm1844_vm10, %v5590_v50  ;;  %v2150_v50 = vld [vmem:[%s7979_s7] sm:$0xff] }
 0x33c   : > { %2130 = vmatpush.msrb.mxu2 %v2097_v11  ;;  %v5679_v11 = vld [vmem:[%s7979_s7 + $0x198] sm:$0x7] }
 0x33e   : > { %2131 = vmatpush.msrb.mxu2 %v2096_v12  ;;  %v5678_v12 = vld [vmem:[%s7979_s7 + $0x190] sm:$0xff] }
 0x340   : > { %2132 = vmatpush.msrb.mxu2 %v2095_v13  ;;  %v5677_v13 = vld [vmem:[%s7979_s7 + $0x188] sm:$0xff] }
 0x342   : > { %2133 = vmatpush.msrb.mxu2 %v2094_v14  ;;  %v5676_v14 = vld [vmem:[%s7979_s7 + $0x180] sm:$0xff] }
 0x344   : > { %2134 = vmatpush.msrb.mxu2 %v2093_v15 }
 0x346   : > { %2135 = vmatpush.msrb.mxu2 %v2092_v16 }
 0x348   : > { %2136 = vmatpush.msrb.mxu2 %v2091_v56 }
 0x349   : > { %v1907_v54 = vpop.permute.xlu1 %1906 }
 0x34a   : > { %v1842_v59 = vpop.permute.xlu0 %1841  ;;  %1930 = vmatpush.msra.mxu1 %v1907_v54  ;;  %2137 = vmatpush.msrb.mxu2 %v2090_v8  ;;  %v5616_v54 = vld [vmem:[%s7979_s7 + $0x40] sm:$0xff] }
 0x34b   : > { %1866 = vmatpush.msra.mxu3 %v1842_v59  ;;  %5587 = vmatmul.msk.f32.vlgmr.msra.gmra.mxu1 %vm1844_vm10, %v5585_v57  ;;  %v5655_v57 = vld [vmem:[%s7979_s7 + $0x118] sm:$0x7] }
 0x34c   : > { %2078 = vmatpush.msrb.mxu1 %v2055_v58  ;;  %5581 = vmatmul.msk.f32.vlgmr.msra.gmra.mxu3 %vm1844_vm10, %v5579_v55  ;;  %v5622_v55 = vld [vmem:[%s7979_s7 + $0x60] sm:$0xff]  ;;  %v5612_v58 = vld [vmem:[%s7979_s7 + $0x30] sm:$0xff]  ;;  %v5637_v59 = vld [vmem:[%s7979_s7 + $0xb8] sm:$0x7] }
 0x34d   : > { %2138 = vmatpush.msrb.mxu2 %v2089_v18  ;;  %v5631_v18 = vld [vmem:[%s7979_s7 + $0x98] sm:$0x7] }
 0x34e   : > { %5626 = vmatpush.msk.msra.mxu1 %vm2158_vm11, %v5625_v46  ;;  %v5683_v46 = vld [vmem:[%s7979_s7 + $0x1a8] sm:$0xff] }
 0x34f   : > { %2139 = vmatpush.msrb.mxu2 %v2088_v19 }
 0x350   : > { %2271 = vmatpush.msra.mxu1 %v5624_v49  ;;  %v5689_v49 = vld [vmem:[%s7979_s7 + $0x1c8] sm:$0xff] }
 0x351   : > { %v2018_v61 = vpop.permute.xlu1 %2017  ;;  %5656 = vmatpush.msk.msra.mxu2 %vm2158_vm11, %v5655_v57  ;;  %v5670_v57 = vld [vmem:[%s7979_s7 + $0x160] sm:$0xff] }
 0x352   : > { %v1981_v0 = vpop.permute.xlu0 %1980  ;;  %2041 = vmatpush.msrb.mxu0 %v2018_v61  ;;  %2272 = vmatpush.msra.mxu1 %v5623_v52  ;;  %v5654_v61 = vld [vmem:[%s7979_s7 + $0x110] sm:$0xff]  ;;  %v5688_v52 = vld [vmem:[%s7979_s7 + $0x1c0] sm:$0xff] }
 0x353   : > { %2004 = vmatpush.msrb.mxu3 %v1981_v0  ;;  %5599 = vmatmul.msk.f32.vlgmr.msrb.gmra.mxu0 %vm1844_vm10, %v5597_v60  ;;  %v5643_v60 = vld [vmem:[%s7979_s7 + $0xd8] sm:$0x7]  ;;  %v5642_v0 = vld [vmem:[%s7979_s7 + $0xd0] sm:$0xff] }
 0x354   : > { %5582 = vmatmul.msk.f32.gmra.mxu3 %vm1844_vm10, %v5580_v62  ;;  %5588 = vmatmul.msk.f32.gmra.mxu1 %vm1844_vm10, %v5586_v63  ;;  %v5611_v62 = vld [vmem:[%s7979_s7 + $0x28] sm:$0xff]  ;;  %v5636_v63 = vld [vmem:[%s7979_s7 + $0xb0] sm:$0xff] }
 0x355   : > { %5608 = vmatpush.msk.msra.mxu3 %vm2158_vm11, %v2153_v24  ;;  %5620 = vmatpush.msk.msra.mxu0 %vm2158_vm11, %v5619_v45  ;;  %v5661_v24 = vld [vmem:[%s7979_s7 + $0x138] sm:$0x7]  ;;  %v5646_v45 = vld [vmem:[%s7979_s7 + $0xe0] sm:$0xff] }
 0x356   : > { %2273 = vmatpush.msra.mxu1 %v5622_v55  ;;  %2431 = vmatpush.msra.mxu2 %v5654_v61  ;;  %v5696_v61 = vld [vmem:[%s7979_s7 + $0x1f0] sm:$0xff] }
 0x357   : > { %2175 = vmatpush.msra.mxu3 %v2152_v44  ;;  %2239 = vmatpush.msra.mxu0 %v5618_v48 }
 0x359   : > { %2176 = vmatpush.msra.mxu3 %v2151_v47  ;;  %2240 = vmatpush.msra.mxu0 %v5617_v51  ;;  %v5682_v51 = vld [vmem:[%s7979_s7 + $0x1a0] sm:$0xff] }
 0x35a   : > { %v2107_v15 = vpop.permute.xlu0 %2106 }
 0x35b   : > { %5600 = vmatmul.msk.f32.gmra.mxu0 %vm1844_vm10, %v5598_v1  ;;  %v1897_v20 = vpop.f32.mrf.mxu0  ;;  %2177 = vmatpush.msra.mxu3 %v2150_v50  ;;  %v5653_v1 = vld [vmem:[%s7979_s7 + $0x108] sm:$0xff]  ;;  %v5673_v50 = vld [vmem:[%s7979_s7 + $0x178] sm:$0x7] }
 0x35c   : > { %5595 = vmatmul.msk.f32.vlgmr.msrb.gmra.mxu3 %vm1844_vm10, %v5593_v2  ;;  %5603 = vmatmul.msk.f32.vlgmr.msrb.gmra.mxu1 %vm1844_vm10, %v5601_v3  ;;  %v5610_v2 = vld [vmem:[%s7979_s7 + $0x20] sm:$0xff]  ;;  %v5635_v3 = vld [vmem:[%s7979_s7 + $0xa8] sm:$0xff] }
 0x35d   : > { %5614 = vmatpush.msk.msrb.mxu3 %vm2158_vm11, %v5613_v53  ;;  %2241 = vmatpush.msra.mxu0 %v5616_v54  ;;  %v5672_v53 = vld [vmem:[%s7979_s7 + $0x170] sm:$0xff]  ;;  %v5671_v54 = vld [vmem:[%s7979_s7 + $0x168] sm:$0xff] }
 0x35e   : > { %5644 = vmatpush.msk.msrb.mxu1 %vm2158_vm11, %v5643_v60  ;;  %2432 = vmatpush.msra.mxu2 %v5653_v1  ;;  %v5697_v60 = vld [vmem:[%s7979_s7 + $0x1f8] sm:$0x7] }
 0x35f   : > { %2207 = vmatpush.msrb.mxu3 %v5612_v58  ;;  %5638 = vmatpush.msk.msrb.mxu0 %vm2158_vm11, %v5637_v59 }
 0x360   : > { %2367 = vmatpush.msrb.mxu1 %v5642_v0  ;;  %v5694_v0 = vld [vmem:[%s7979_s7 + $0x1e0] sm:$0xff] }
 0x361   : > { %2208 = vmatpush.msrb.mxu3 %v5611_v62  ;;  %2335 = vmatpush.msrb.mxu0 %v5636_v63  ;;  %v5695_v62 = vld [vmem:[%s7979_s7 + $0x1e8] sm:$0xff] }
 0x363   : > { %v1900_v26 = vpop.f32.mrf.mxu0  ;;  %2209 = vmatpush.msrb.mxu3 %v5610_v2  ;;  %2336 = vmatpush.msrb.mxu0 %v5635_v3  ;;  %v2149_v3 = vld [vmem:[%s7980_s8] sm:$0x1] }
 0x364   : > { %5596 = vmatmul.msk.f32.gmra.mxu3 %vm1844_vm10, %v5594_v4  ;;  %5604 = vmatmul.msk.f32.gmra.mxu1 %vm1844_vm10, %v5602_v6  ;;  %v5641_v4 = vld [vmem:[%s7979_s7 + $0xc8] sm:$0xff]  ;;  %v5652_v6 = vld [vmem:[%s7979_s7 + $0x100] sm:$0xff] }
 0x365   : > { %2368 = vmatpush.msrb.mxu1 %v5641_v4  ;;  %2433 = vmatpush.msra.mxu2 %v5652_v6  ;;  %v2666_v4 = vld [vmem:[%s7916_s9 + $0x18] sm:$0xff] }
 0x366   : > { %2337 = vmatpush.msrb.mxu0 %v5634_v7  ;;  %v5704_v6 = vld [vmem:[%s7916_s9 + $0x38] sm:$0xff] }
 0x367   : > { %2369 = vmatpush.msrb.mxu1 %v5640_v10  ;;  %v5709_v7 = vld [vmem:[%s7916_s9 + $0x58] sm:$0xff] }
 0x368   : > { %v5714_v10 = vld [vmem:[%s7916_s9 + $0x78] sm:$0xff] }
 0x3b6   : > { %v1969_v31 = vpop.f32.mrf.mxu2 }
 0x3be   : > { %v1972_v37 = vpop.f32.mrf.mxu2 }
 0x3c8   : > { %v1932_v23 = vpop.f32.mrf.mxu1 }
 0x3cf   : > { %v1868_v25 = vpop.f32.mrf.mxu3 }
 0x3d0   : > { %v1898_v27 = vadd.f32 %v1897_v20, %v1868_v25  ;;  %v2043_v5 = vpop.f32.mrf.mxu0  ;;  %v5667_v25 = vld [vmem:[%s7979_s7 + $0x158] sm:$0x7] }
 0x3d1   : > { %v1935_v29 = vpop.f32.mrf.mxu1 }
 0x3d2   : > { %v1938_v33 = vadd.f32 %v1932_v23, %v1898_v27  ;;  %v5630_v23 = vld [vmem:[%s7979_s7 + $0x90] sm:$0xff] }
 0x3d3   : > { %v5660_v27 = vld [vmem:[%s7979_s7 + $0x130] sm:$0xff] }
 0x3d4   : > { %v1975_v30 = vadd.f32 %v1969_v31, %v1938_v33  ;;  %v5666_v31 = vld [vmem:[%s7979_s7 + $0x150] sm:$0xff] }
 0x3d7   : > { %v1871_v28 = vpop.f32.mrf.mxu3 }
 0x3d8   : > { %v1901_v17 = vadd.f32 %v1900_v26, %v1871_v28  ;;  %v2046_v41 = vpop.f32.mrf.mxu0  ;;  %v5629_v26 = vld [vmem:[%s7979_s7 + $0x88] sm:$0xff]  ;;  %v2112_v28 = vpop.permute.xlu1 %2111 }
 0x3d9   : > { %v2080_v34 = vpop.f32.mrf.mxu1 }
 0x3da   : > { %v1939_v35 = vadd.f32 %v1935_v29, %v1901_v17 }
 0x3dc   : > { %v1976_v39 = vadd.f32 %v1972_v37, %v1939_v35  ;;  %v5658_v37 = vld [vmem:[%s7979_s7 + $0x120] sm:$0xff] }
 0x3df   : > { %v2006_v32 = vpop.f32.mrf.mxu3 }
 0x3e0   : > { %v2012_v9 = vadd.f32 %v2006_v32, %v1975_v30  ;;  %v5659_v30 = vld [vmem:[%s7979_s7 + $0x128] sm:$0xff] }
 0x3e1   : > { %v2083_v21 = vpop.f32.mrf.mxu1 }
 0x3e2   : > { %v2049_v22 = vadd.f32 %v2043_v5, %v2012_v9  ;;  %v5628_v5 = vld [vmem:[%s7979_s7 + $0x80] sm:$0xff]  ;;  %v5649_v9 = vld [vmem:[%s7979_s7 + $0xf8] sm:$0x7] }
 0x3e4   : > { %v2086_v38 = vadd.f32 %v2080_v34, %v2049_v22  ;;  %v5665_v34 = vld [vmem:[%s7979_s7 + $0x148] sm:$0xff] }
 0x3e6   : > { %5606 = vmatmul.msk.f32.vlgmr.msrb.gmra.mxu2 %vm2114_vm12, %v2086_v38  ;;  %v5664_v38 = vld [vmem:[%s7979_s7 + $0x140] sm:$0xff] }
 0x3e7   : > { %v2009_v40 = vpop.f32.mrf.mxu3  ;;  %5680 = vmatpush.msk.msrb.mxu2 %vm2158_vm11, %v5679_v11  ;;  %v2665_v11 = vld [vmem:[%s7916_s9 + $0x10] sm:$0xff] }
 0x3e8   : > { %v2013_v42 = vadd.f32 %v2009_v40, %v1976_v39  ;;  %v5648_v39 = vld [vmem:[%s7979_s7 + $0xf0] sm:$0xff]  ;;  %v5685_v40 = vld [vmem:[%s7979_s7 + $0x1b8] sm:$0x7] }
 0x3e9   : > { %2559 = vmatpush.msrb.mxu2 %v5678_v12  ;;  %v5703_v12 = vld [vmem:[%s7916_s9 + $0x30] sm:$0xff] }
 0x3ea   : > { %v2050_v36 = vadd.f32 %v2046_v41, %v2013_v42  ;;  %v5691_v41 = vld [vmem:[%s7979_s7 + $0x1d8] sm:$0x7]  ;;  %v5647_v42 = vld [vmem:[%s7979_s7 + $0xe8] sm:$0xff] }
 0x3eb   : > { %2560 = vmatpush.msrb.mxu2 %v5677_v13  ;;  %v5708_v13 = vld [vmem:[%s7916_s9 + $0x50] sm:$0xff] }
 0x3ec   : > { %v2087_v43 = vadd.f32 %v2083_v21, %v2050_v36  ;;  %v5684_v21 = vld [vmem:[%s7979_s7 + $0x1b0] sm:$0xff] }
 0x3ed   : > { %2561 = vmatpush.msrb.mxu2 %v5676_v14  ;;  %v5690_v36 = vld [vmem:[%s7979_s7 + $0x1d0] sm:$0xff] }
 0x3ee   : > { %5607 = vmatmul.msk.f32.gmra.mxu2 %vm2114_vm12, %v2087_v43  ;;  %v5713_v14 = vld [vmem:[%s7916_s9 + $0x70] sm:$0xff]  ;;  %vm3513_vm12 = vcmask 1046528  }
 0x469   : > { %v2141_v16 = vpop.f32.mrf.mxu2 }
 0x46a   : > { %v2142_v56 = vadd.f32 %v2141_v16, %v2107_v15 }
 0x46c   : > { %v6845_v8 = vmax.f32 %v2142_v56, 0.0 }
 0x46e   : > { %5609 = vmatmul.msk.f32.vlgmr.msra.gmra.mxu3 %vm2154_vm13, %v6845_v8  ;;  %v2220_v19 = vrot.slane %v6845_v8, 2  ;;  %v2252_v20 = vrot.slane %v6845_v8, 3  ;;  %v2188_v32 = vrot.slane %v6845_v8, 1  ;;  %v2316_v35 = vrot.slane %v6845_v8, 5 }
 0x46f   : > { %5632 = vmatpush.msk.msra.mxu3 %vm2158_vm11, %v5631_v18  ;;  %v2348_v22 = vrot.slane %v6845_v8, 6  ;;  %v2284_v43 = vrot.slane %v6845_v8, 4  ;;  %v2380_v55 = vrot.slane %v6845_v8, 7  ;;  %v2664_v18 = vld [vmem:[%s7916_s9 + $0x8] sm:$0xff] }
 0x470   : > { %5621 = vmatmul.msk.f32.vlgmr.msra.gmra.mxu0 %vm2154_vm13, %v2220_v19  ;;  %5627 = vmatmul.msk.f32.vlgmr.msra.gmra.mxu1 %vm2154_vm13, %v2252_v20  ;;  %v5702_v19 = vld [vmem:[%s7916_s9 + $0x28] sm:$0xff] }
 0x471   : > { %v2144_v29 = vpop.f32.mrf.mxu2  ;;  %2303 = vmatpush.msra.mxu3 %v5630_v23  ;;  %5662 = vmatpush.msk.msra.mxu0 %vm2158_vm11, %v5661_v24  ;;  %v5707_v20 = vld [vmem:[%s7916_s9 + $0x48] sm:$0xff] }
 0x472   : > { %v2145_v33 = vadd.f32 %v2144_v29, %v2112_v28  ;;  %5668 = vmatpush.msk.msra.mxu1 %vm2158_vm11, %v5667_v25  ;;  %v5712_v24 = vld [vmem:[%s7916_s9 + $0x68] sm:$0xff]  ;;  %v2663_v25 = vld [vmem:[%s7916_s9] sm:$0xff] }
 0x473   : > { %2304 = vmatpush.msra.mxu3 %v5629_v26  ;;  %2463 = vmatpush.msra.mxu0 %v5660_v27  ;;  %v5701_v26 = vld [vmem:[%s7916_s9 + $0x20] sm:$0xff] }
 0x474   : > { %v6883_v17 = vmax.f32 %v2145_v33, 0.0  ;;  %2495 = vmatpush.msra.mxu1 %v5666_v31  ;;  %v5706_v27 = vld [vmem:[%s7916_s9 + $0x40] sm:$0xff]  ;;  %v5719_v31 = vld [vmem:[%s7916_s9 + $0x98] sm:$0xff] }
 0x475   : > { %2305 = vmatpush.msra.mxu3 %v5628_v5  ;;  %2464 = vmatpush.msra.mxu0 %v5659_v30  ;;  %v5711_v28 = vld [vmem:[%s7916_s9 + $0x60] sm:$0xff]  ;;  %v5724_v33 = vld [vmem:[%s7916_s9 + $0xb8] sm:$0xff] }
 0x476   : > { %5615 = vmatmul.msk.f32.vlgmr.msrb.gmra.mxu3 %vm2154_vm13, %v2188_v32  ;;  %5657 = vmatmul.msk.f32.vlgmr.msra.gmra.mxu2 %vm2154_vm13, %v6883_v17  ;;  %v2540_v44 = vrot.slane %v6883_v17, 4  ;;  %v2444_v47 = vrot.slane %v6883_v17, 1  ;;  %v2476_v48 = vrot.slane %v6883_v17, 2  ;;  %v2572_v58 = vrot.slane %v6883_v17, 5  ;;  %v5729_v5 = vld [vmem:[%s7916_s9 + $0xd8] sm:$0xff]  ;;  %v5723_v32 = vld [vmem:[%s7916_s9 + $0xb0] sm:$0xff] }
 0x477   : > { %2496 = vmatpush.msra.mxu1 %v5665_v34  ;;  %5650 = vmatpush.msk.msrb.mxu3 %vm2158_vm11, %v5649_v9  ;;  %v2604_v59 = vrot.slane %v6883_v17, 6  ;;  %v2508_v63 = vrot.slane %v6883_v17, 3  ;;  %v2636_v1 = vrot.slane %v6883_v17, 7  ;;  %v5734_v30 = vld [vmem:[%s7916_s9 + $0xf8] sm:$0xff]  ;;  %v5718_v17 = vld [vmem:[%s7916_s9 + $0x90] sm:$0xff] }
 0x478   : > { %5639 = vmatmul.msk.f32.vlgmr.msrb.gmra.mxu0 %vm2154_vm13, %v2316_v35  ;;  %5645 = vmatmul.msk.f32.vlgmr.msrb.gmra.mxu1 %vm2154_vm13, %v2348_v22  ;;  %v5728_v34 = vld [vmem:[%s7916_s9 + $0xd0] sm:$0xff]  ;;  %v5717_v35 = vld [vmem:[%s7916_s9 + $0x88] sm:$0xff] }
 0x479   : > { %2465 = vmatpush.msra.mxu0 %v5658_v37  ;;  %2497 = vmatpush.msra.mxu1 %v5664_v38  ;;  %v5733_v9 = vld [vmem:[%s7916_s9 + $0xf0] sm:$0xff]  ;;  %v5722_v37 = vld [vmem:[%s7916_s9 + $0xa8] sm:$0xff] }
 0x47a   : > { %2399 = vmatpush.msrb.mxu3 %v5648_v39  ;;  %2684 = vmatpush.msra.mxu2 %v2666_v4  ;;  %v5727_v38 = vld [vmem:[%s7916_s9 + $0xc8] sm:$0xff]  ;;  %v5744_v4 = vld [vmem:[%s7916_s9 + $0x138] sm:$0xff] }
 0x47b   : > { %5686 = vmatpush.msk.msrb.mxu0 %vm2158_vm11, %v5685_v40  ;;  %5692 = vmatpush.msk.msrb.mxu1 %vm2158_vm11, %v5691_v41  ;;  %v5732_v39 = vld [vmem:[%s7916_s9 + $0xe8] sm:$0xff] }
 0x47c   : > { %2400 = vmatpush.msrb.mxu3 %v5647_v42  ;;  %2685 = vmatpush.msra.mxu2 %v2665_v11  ;;  %v5716_v42 = vld [vmem:[%s7916_s9 + $0x80] sm:$0xff]  ;;  %v5743_v11 = vld [vmem:[%s7916_s9 + $0x130] sm:$0xff] }
 0x47d   : > { %2591 = vmatpush.msrb.mxu0 %v5684_v21  ;;  %2623 = vmatpush.msrb.mxu1 %v5690_v36  ;;  %v5721_v21 = vld [vmem:[%s7916_s9 + $0xa0] sm:$0xff] }
 0x47e   : > { %5633 = vmatmul.msk.f32.vlgmr.msra.gmra.mxu3 %vm2154_vm13, %v2284_v43  ;;  %5681 = vmatmul.msk.f32.vlgmr.msrb.gmra.mxu2 %vm2154_vm13, %v2540_v44  ;;  %v5726_v43 = vld [vmem:[%s7916_s9 + $0xc0] sm:$0xff] }
 0x47f   : > { %2401 = vmatpush.msrb.mxu3 %v5646_v45  ;;  %2592 = vmatpush.msrb.mxu0 %v5683_v46  ;;  %v5731_v44 = vld [vmem:[%s7916_s9 + $0xe0] sm:$0xff] }
 0x480   : > { %5663 = vmatmul.msk.f32.vlgmr.msra.gmra.mxu0 %vm2154_vm13, %v2444_v47  ;;  %5669 = vmatmul.msk.f32.vlgmr.msra.gmra.mxu1 %vm2154_vm13, %v2476_v48 }
 0x481   : > { %2624 = vmatpush.msrb.mxu1 %v5689_v49  ;;  %5674 = vmatpush.msk.msra.mxu3 %vm2158_vm11, %v5673_v50 }
 0x482   : > { %2593 = vmatpush.msrb.mxu0 %v5682_v51  ;;  %2686 = vmatpush.msra.mxu2 %v2664_v18  ;;  %v5741_v18 = vld [vmem:[%s7916_s9 + $0x120] sm:$0xff] }
 0x483   : > { %2625 = vmatpush.msrb.mxu1 %v5688_v52  ;;  %2527 = vmatpush.msra.mxu3 %v5672_v53 }
 0x484   : > { %2712 = vmatpush.msra.mxu0 %v5704_v6  ;;  %2687 = vmatpush.msra.mxu2 %v2663_v25  ;;  %v5749_v6 = vld [vmem:[%s7916_s9 + $0x158] sm:$0xff] }
 0x485   : > { %2528 = vmatpush.msra.mxu3 %v5671_v54  ;;  %2739 = vmatpush.msra.mxu1 %v5709_v7  ;;  %v5754_v7 = vld [vmem:[%s7916_s9 + $0x178] sm:$0xff] }
 0x486   : > { %5651 = vmatmul.msk.f32.vlgmr.msrb.gmra.mxu3 %vm2154_vm13, %v2380_v55  ;;  %2713 = vmatpush.msra.mxu0 %v5703_v12  ;;  %v5748_v12 = vld [vmem:[%s7916_s9 + $0x150] sm:$0xff]  ;;  %v5769_v25 = vld [vmem:[%s7916_s9 + $0x1d8] sm:$0xff] }
 0x487   : > { %2529 = vmatpush.msra.mxu3 %v5670_v57  ;;  %2740 = vmatpush.msra.mxu1 %v5708_v13  ;;  %v5753_v13 = vld [vmem:[%s7916_s9 + $0x170] sm:$0xff] }
 0x488   : > { %5687 = vmatmul.msk.f32.vlgmr.msrb.gmra.mxu0 %vm2154_vm13, %v2572_v58  ;;  %5693 = vmatmul.msk.f32.vlgmr.msrb.gmra.mxu1 %vm2154_vm13, %v2604_v59 }
 0x489   : > { %5698 = vmatpush.msk.msrb.mxu3 %vm2158_vm11, %v5697_v60  ;;  %2714 = vmatpush.msra.mxu0 %v5702_v19  ;;  %v5746_v19 = vld [vmem:[%s7916_s9 + $0x140] sm:$0xff] }
 0x48a   : > { %2741 = vmatpush.msra.mxu1 %v5707_v20  ;;  %2793 = vmatpush.msrb.mxu2 %v5719_v31  ;;  %v5751_v20 = vld [vmem:[%s7916_s9 + $0x160] sm:$0xff]  ;;  %v5773_v31 = vld [vmem:[%s7916_s9 + $0x1f0] sm:$0xff] }
 0x48b   : > { %2655 = vmatpush.msrb.mxu3 %v5696_v61  ;;  %2715 = vmatpush.msra.mxu0 %v5701_v26  ;;  %v5774_v26 = vld [vmem:[%s7916_s9 + $0x1f8] sm:$0xff] }
 0x48c   : > { %2742 = vmatpush.msra.mxu1 %v5706_v27  ;;  %2794 = vmatpush.msrb.mxu2 %v5718_v17  ;;  %v5758_v27 = vld [vmem:[%s7916_s9 + $0x190] sm:$0xff]  ;;  %v5772_v17 = vld [vmem:[%s7916_s9 + $0x1e8] sm:$0xff] }
 0x48d   : > { %2656 = vmatpush.msrb.mxu3 %v5695_v62  ;;  %2820 = vmatpush.msrb.mxu0 %v5724_v33  ;;  %v5757_v33 = vld [vmem:[%s7916_s9 + $0x188] sm:$0xff] }
 0x48e   : > { %5675 = vmatmul.msk.f32.vlgmr.msra.gmra.mxu3 %vm2154_vm13, %v2508_v63  ;;  %2847 = vmatpush.msrb.mxu1 %v5729_v5  ;;  %v5762_v5 = vld [vmem:[%s7916_s9 + $0x1a8] sm:$0xff] }
 0x48f   : > { %2657 = vmatpush.msrb.mxu3 %v5694_v0  ;;  %2821 = vmatpush.msrb.mxu0 %v5723_v32  ;;  %v5756_v32 = vld [vmem:[%s7916_s9 + $0x180] sm:$0xff] }
 0x490   : > { %2848 = vmatpush.msrb.mxu1 %v5728_v34  ;;  %2795 = vmatpush.msrb.mxu2 %v5717_v35  ;;  %v5761_v34 = vld [vmem:[%s7916_s9 + $0x1a0] sm:$0xff] }
 0x491   : > { %2766 = vmatpush.msra.mxu3 %v5714_v10  ;;  %2822 = vmatpush.msrb.mxu0 %v5722_v37  ;;  %v5738_v10 = vld [vmem:[%s7916_s9 + $0x110] sm:$0xff]  ;;  %v5771_v35 = vld [vmem:[%s7916_s9 + $0x1e0] sm:$0xff] }
 0x492   : > { %2849 = vmatpush.msrb.mxu1 %v5727_v38  ;;  %2796 = vmatpush.msrb.mxu2 %v5716_v42  ;;  %v3106_v37 = vld [vmem:[%s7928_s21 + $0x10] sm:$0xff]  ;;  %v3105_v38 = vld [vmem:[%s7928_s21 + $0x8] sm:$0xff] }
 0x493   : > { %2767 = vmatpush.msra.mxu3 %v5713_v14  ;;  %2823 = vmatpush.msrb.mxu0 %v5721_v21  ;;  %v5737_v14 = vld [vmem:[%s7916_s9 + $0x108] sm:$0xff] }
 0x494   : > { %2850 = vmatpush.msrb.mxu1 %v5726_v43 }
 0x495   : > { %2768 = vmatpush.msra.mxu3 %v5712_v24  ;;  %v5764_v24 = vld [vmem:[%s7916_s9 + $0x1b8] sm:$0xff] }
 0x496   : > { %5699 = vmatmul.msk.f32.vlgmr.msrb.gmra.mxu3 %vm2154_vm13, %v2636_v1 }
 0x497   : > { %2769 = vmatpush.msra.mxu3 %v5711_v28  ;;  %v5763_v28 = vld [vmem:[%s7916_s9 + $0x1b0] sm:$0xff] }
 0x499   : > { %2874 = vmatpush.msrb.mxu3 %v5734_v30  ;;  %v5767_v30 = vld [vmem:[%s7916_s9 + $0x1c8] sm:$0xff] }
 0x49b   : > { %2875 = vmatpush.msrb.mxu3 %v5733_v9  ;;  %v5766_v9 = vld [vmem:[%s7916_s9 + $0x1c0] sm:$0xff] }
 0x49d   : > { %2876 = vmatpush.msrb.mxu3 %v5732_v39  ;;  %v3104_v39 = vld [vmem:[%s7928_s21] sm:$0xff] }
 0x49f   : > { %2877 = vmatpush.msrb.mxu3 %v5731_v44  ;;  %v2667_v44 = vld [vmem:[%s7917_s10] sm:$0x1] }
 0x4ed   : > { %v2243_v15 = vpop.f32.mrf.mxu0  ;;  %v2275_v56 = vpop.f32.mrf.mxu1 }
 0x4f1   : > { %v2179_v2 = vpop.f32.mrf.mxu3 }
 0x4f2   : > { %v2182_v16 = vadd.f32 %v2179_v2, %v2149_v3  ;;  %v5739_v3 = vld [vmem:[%s7916_s9 + $0x118] sm:$0xff] }
 0x4f5   : > { %v2339_v40 = vpop.f32.mrf.mxu0  ;;  %v2371_v45 = vpop.f32.mrf.mxu1 }
 0x4f9   : > { %v2211_v8 = vpop.f32.mrf.mxu3  ;;  %v2435_v48 = vpop.f32.mrf.mxu2 }
 0x4fa   : > { %v2214_v23 = vadd.f32 %v2211_v8, %v2182_v16  ;;  %v5747_v16 = vld [vmem:[%s7916_s9 + $0x148] sm:$0xff]  ;;  %v5736_v8 = vld [vmem:[%s7916_s9 + $0x100] sm:$0xff] }
 0x4fc   : > { %v2246_v29 = vadd.f32 %v2243_v15, %v2214_v23  ;;  %v5742_v15 = vld [vmem:[%s7916_s9 + $0x128] sm:$0xff]  ;;  %v5759_v23 = vld [vmem:[%s7916_s9 + $0x198] sm:$0xff] }
 0x4fd   : > { %v2467_v51 = vpop.f32.mrf.mxu0  ;;  %v2499_v53 = vpop.f32.mrf.mxu1 }
 0x4fe   : > { %v2278_v22 = vadd.f32 %v2275_v56, %v2246_v29  ;;  %v5752_v56 = vld [vmem:[%s7916_s9 + $0x168] sm:$0xff]  ;;  %v5768_v29 = vld [vmem:[%s7916_s9 + $0x1d0] sm:$0xff] }
 0x501   : > { %v2307_v41 = vpop.f32.mrf.mxu3  ;;  %v2563_v59 = vpop.f32.mrf.mxu2 }
 0x502   : > { %v2310_v36 = vadd.f32 %v2307_v41, %v2278_v22  ;;  %v3107_v22 = vld [vmem:[%s7928_s21 + $0x18] sm:$0x7]  ;;  %v2726_v41 = vld [vmem:[%s7917_s10 + $0x2] sm:$0x1] }
 0x504   : > { %v2342_v46 = vadd.f32 %v2339_v40, %v2310_v36  ;;  %v2699_v40 = vld [vmem:[%s7917_s10 + $0x1] sm:$0x1] }
 0x505   : > { %v2595_v61 = vpop.f32.mrf.mxu0  ;;  %v2627_v63 = vpop.f32.mrf.mxu1 }
 0x506   : > { %v2374_v47 = vadd.f32 %v2371_v45, %v2342_v46  ;;  %v2753_v45 = vld [vmem:[%s7917_s10 + $0x3] sm:$0x1] }
 0x509   : > { %v2403_v49 = vpop.f32.mrf.mxu3 }
 0x50a   : > { %v2406_v50 = vadd.f32 %v2403_v49, %v2374_v47  ;;  %v2807_v47 = vld [vmem:[%s7917_s10 + $0x5] sm:$0x1] }
 0x50c   : > { %v2438_v52 = vadd.f32 %v2435_v48, %v2406_v50  ;;  %v2834_v50 = vld [vmem:[%s7917_s10 + $0x6] sm:$0x1] }
 0x50e   : > { %v2470_v54 = vadd.f32 %v2467_v51, %v2438_v52 }
 0x510   : > { %v2502_v55 = vadd.f32 %v2499_v53, %v2470_v54 }
 0x511   : > { %v2531_v57 = vpop.f32.mrf.mxu3 }
 0x512   : > { %v2534_v58 = vadd.f32 %v2531_v57, %v2502_v55  ;;  %v2780_v57 = vld [vmem:[%s7917_s10 + $0x4] sm:$0x1] }
 0x514   : > { %v2566_v60 = vadd.f32 %v2563_v59, %v2534_v58  ;;  %v2861_v58 = vld [vmem:[%s7917_s10 + $0x7] sm:$0x1] }
 0x516   : > { %v2598_v62 = vadd.f32 %v2595_v61, %v2566_v60  ;;  %v2915_v60 = vld [vmem:[%s7917_s10 + $0x9] sm:$0x1] }
 0x518   : > { %v2630_v0 = vadd.f32 %v2627_v63, %v2598_v62  ;;  %v2942_v63 = vld [vmem:[%s7917_s10 + $0xa] sm:$0x1] }
 0x519   : > { %v2659_v1 = vpop.f32.mrf.mxu3 }
 0x51a   : > { %v7084_v2 = vadd.f32 %v2659_v1, %v2630_v0 }
 0x51c   : > { %5700 = vmatmul.msk.f32.vlgmr.msra.gmra.mxu2 %vm2668_vm14, %v7084_v2  ;;  %5705 = vmatmul.msk.f32.vlgmr.msra.gmra.mxu0 %vm2668_vm14, %v7084_v2 }
 0x51d   : > { %5710 = vmatmul.msk.f32.vlgmr.msra.gmra.mxu1 %vm2668_vm14, %v7084_v2  ;;  %5715 = vmatmul.msk.f32.vlgmr.msra.gmra.mxu3 %vm2668_vm14, %v7084_v2 }
 0x51e   : > { %2901 = vmatpush.msra.mxu2 %v5739_v3  ;;  %2928 = vmatpush.msra.mxu0 %v5744_v4 }
 0x51f   : > { %2955 = vmatpush.msra.mxu1 %v5749_v6  ;;  %2982 = vmatpush.msra.mxu3 %v5754_v7  ;;  %v2888_v6 = vld [vmem:[%s7917_s10 + $0x8] sm:$0x1]  ;;  %v2969_v7 = vld [vmem:[%s7917_s10 + $0xb] sm:$0x1] }
 0x520   : > { %2902 = vmatpush.msra.mxu2 %v5738_v10  ;;  %2929 = vmatpush.msra.mxu0 %v5743_v11  ;;  %v3023_v11 = vld [vmem:[%s7917_s10 + $0xd] sm:$0x1] }
 0x521   : > { %2956 = vmatpush.msra.mxu1 %v5748_v12  ;;  %2983 = vmatpush.msra.mxu3 %v5753_v13 }
 0x522   : > { %2903 = vmatpush.msra.mxu2 %v5737_v14  ;;  %2930 = vmatpush.msra.mxu0 %v5742_v15  ;;  %v3050_v14 = vld [vmem:[%s7917_s10 + $0xe] sm:$0x1] }
 0x523   : > { %2957 = vmatpush.msra.mxu1 %v5747_v16  ;;  %2984 = vmatpush.msra.mxu3 %v5752_v56 }
 0x524   : > { %5720 = vmatmul.msk.f32.vlgmr.msrb.gmra.mxu2 %vm2668_vm14, %v7084_v2  ;;  %5725 = vmatmul.msk.f32.vlgmr.msrb.gmra.mxu0 %vm2668_vm14, %v7084_v2 }
 0x525   : > { %5730 = vmatmul.msk.f32.vlgmr.msrb.gmra.mxu1 %vm2668_vm14, %v7084_v2  ;;  %5735 = vmatmul.msk.f32.vlgmr.msrb.gmra.mxu3 %vm2668_vm14, %v7084_v2 }
 0x526   : > { %2904 = vmatpush.msra.mxu2 %v5736_v8  ;;  %2931 = vmatpush.msra.mxu0 %v5741_v18 }
 0x527   : > { %2958 = vmatpush.msra.mxu1 %v5746_v19  ;;  %2985 = vmatpush.msra.mxu3 %v5751_v20  ;;  %v2996_v20 = vld [vmem:[%s7917_s10 + $0xc] sm:$0x1] }
 0x528   : > { %3009 = vmatpush.msrb.mxu2 %v5759_v23  ;;  %3036 = vmatpush.msrb.mxu0 %v5764_v24  ;;  %v3077_v23 = vld [vmem:[%s7917_s10 + $0xf] sm:$0x1] }
 0x529   : > { %3063 = vmatpush.msrb.mxu1 %v5769_v25  ;;  %3090 = vmatpush.msrb.mxu3 %v5774_v26 }
 0x52a   : > { %3010 = vmatpush.msrb.mxu2 %v5758_v27  ;;  %3037 = vmatpush.msrb.mxu0 %v5763_v28 }
 0x52b   : > { %3064 = vmatpush.msrb.mxu1 %v5768_v29  ;;  %3091 = vmatpush.msrb.mxu3 %v5773_v31  ;;  %v6084_v29 = vmov 0.0  }
 0x52c   : > { %5740 = vmatmul.msk.f32.vlgmr.msra.gmra.mxu2 %vm2668_vm14, %v7084_v2  ;;  %5745 = vmatmul.msk.f32.vlgmr.msra.gmra.mxu0 %vm2668_vm14, %v7084_v2  ;;  %3103 = vst.msk [vmem:[#allocation3 + $0x8] sm:$0xff] %vm3101_vm2, %v6084_v29 }
 0x52d   : > { %5750 = vmatmul.msk.f32.vlgmr.msra.gmra.mxu1 %vm2668_vm14, %v7084_v2  ;;  %5755 = vmatmul.msk.f32.vlgmr.msra.gmra.mxu3 %vm2668_vm14, %v7084_v2  ;;  %3102 = vst.msk [vmem:[#allocation3] sm:$0xff] %vm3101_vm2, %v6084_v29  ;;  %vm3657_vm2 = vcmask 1047600  }
 0x52e   : > { %3011 = vmatpush.msrb.mxu2 %v5757_v33  ;;  %3038 = vmatpush.msrb.mxu0 %v5762_v5  ;;  %3441 = vst [vmem:[#allocation4] sm:$0xff] %v6084_v29 }
 0x52f   : > { %3065 = vmatpush.msrb.mxu1 %v5767_v30  ;;  %3092 = vmatpush.msrb.mxu3 %v5772_v17  ;;  %3446 = vst [vmem:[#allocation4 + $0x20] sm:$0xff] %v6084_v29 }
 0x530   : > { %3012 = vmatpush.msrb.mxu2 %v5756_v32  ;;  %3039 = vmatpush.msrb.mxu0 %v5761_v34  ;;  %4491 = vst [vmem:[#allocation5] sm:$0xff] %v6084_v29 }
 0x531   : > { %3066 = vmatpush.msrb.mxu1 %v5766_v9  ;;  %3093 = vmatpush.msrb.mxu3 %v5771_v35  ;;  %v3426_v9 = vld [vmem:[%s7919_s12 + $0x8] sm:$0xff]  ;;  %v3425_v35 = vld [vmem:[%s7919_s12] sm:$0xff] }
 0x532   : > { %5776 = vmatpush.msk.msra.mxu2 %vm2158_vm11, %v3107_v22  ;;  %vm3166_vm11 = vcmask 130048   ;;  %v3153_v22 = vld [vmem:[%s7918_s11] sm:$0xff] }
 0x534   : > { %5760 = vmatmul.msk.f32.vlgmr.msrb.gmra.mxu2 %vm2668_vm14, %v7084_v2  ;;  %5765 = vmatmul.msk.f32.vlgmr.msrb.gmra.mxu0 %vm2668_vm14, %v7084_v2 }
 0x535   : > { %5770 = vmatmul.msk.f32.vlgmr.msrb.gmra.mxu1 %vm2668_vm14, %v7084_v2  ;;  %5775 = vmatmul.msk.f32.vlgmr.msrb.gmra.mxu3 %vm2668_vm14, %v7084_v2  ;;  %vm3444_vm14 = vcmask 564224  }
 0x536   : > { %3130 = vmatpush.msra.mxu2 %v3106_v37  ;;  %3449 = vst.msk [vmem:[#allocation4 + $0x38] sm:$0xff] %vm3444_vm14, %v6084_v29 }
 0x537   : > { %3445 = vst.msk [vmem:[#allocation4 + $0x18] sm:$0xff] %vm3444_vm14, %v6084_v29 }
 0x538   : > { %3131 = vmatpush.msra.mxu2 %v3105_v38 }
 0x53a   : > { %3132 = vmatpush.msra.mxu2 %v3104_v39  ;;  %v3154_v39 = vld [vmem:[%s7918_s11 + $0x8] sm:$0xff] }
 0x599   : > { %v2717_v42 = vpop.f32.mrf.mxu0 }
 0x59a   : > { %v2718_v21 = vadd.f32 %v2717_v42, %v2699_v40  ;;  %v2744_v36 = vpop.f32.mrf.mxu1 }
 0x59b   : > { %v2745_v43 = vadd.f32 %v2744_v36, %v2726_v41  ;;  %v5779_v41 = vld [vmem:[%s7918_s11 + $0x10] sm:$0xff] }
 0x59c   : > { %2720 = vst.msk [vmem:[#allocation2 + $0x1] sm:$0x1] %vm2692_vm15, %v2718_v21 }
 0x59d   : > { %2747 = vst.msk [vmem:[#allocation2 + $0x2] sm:$0x1] %vm2692_vm15, %v2745_v43  ;;  %v5780_v43 = vld [vmem:[%s7918_s11 + $0x18] sm:$0xff] }
 0x59f   : > { %v2689_v46 = vpop.f32.mrf.mxu2 }
 0x5a0   : > { %v2690_v48 = vadd.f32 %v2689_v46, %v2667_v44  ;;  %v2771_v49 = vpop.f32.mrf.mxu3  ;;  %v5793_v44 = vld [vmem:[%s7918_s11 + $0x40] sm:$0xff] }
 0x5a1   : > { %v2772_v51 = vadd.f32 %v2771_v49, %v2753_v45  ;;  %v2825_v52 = vpop.f32.mrf.mxu0 }
 0x5a2   : > { %2693 = vst.msk [vmem:[#allocation2] sm:$0x1] %vm2692_vm15, %v2690_v48  ;;  %v2826_v53 = vadd.f32 %v2825_v52, %v2807_v47  ;;  %v2852_v54 = vpop.f32.mrf.mxu1  ;;  %v5785_v52 = vld [vmem:[%s7918_s11 + $0x20] sm:$0xff] }
 0x5a3   : > { %2774 = vst.msk [vmem:[#allocation2 + $0x3] sm:$0x1] %vm2692_vm15, %v2772_v51  ;;  %v2853_v55 = vadd.f32 %v2852_v54, %v2834_v50  ;;  %v5789_v50 = vld [vmem:[%s7918_s11 + $0x30] sm:$0xff] }
 0x5a4   : > { %2828 = vst.msk [vmem:[#allocation2 + $0x5] sm:$0x1] %vm2692_vm15, %v2826_v53  ;;  %v5794_v53 = vld [vmem:[%s7918_s11 + $0x48] sm:$0xff] }
 0x5a5   : > { %2855 = vst.msk [vmem:[#allocation2 + $0x6] sm:$0x1] %vm2692_vm15, %v2853_v55 }
 0x5a7   : > { %v2798_v59 = vpop.f32.mrf.mxu2 }
 0x5a8   : > { %v2799_v61 = vadd.f32 %v2798_v59, %v2780_v57  ;;  %v2879_v62 = vpop.f32.mrf.mxu3 }
 0x5a9   : > { %v2880_v0 = vadd.f32 %v2879_v62, %v2861_v58  ;;  %v2933_v1 = vpop.f32.mrf.mxu0  ;;  %v5786_v62 = vld [vmem:[%s7918_s11 + $0x28] sm:$0xff] }
 0x5aa   : > { %2801 = vst.msk [vmem:[#allocation2 + $0x4] sm:$0x1] %vm2692_vm15, %v2799_v61  ;;  %v2934_v2 = vadd.f32 %v2933_v1, %v2915_v60  ;;  %v2960_v3 = vpop.f32.mrf.mxu1  ;;  %v5790_v60 = vld [vmem:[%s7918_s11 + $0x38] sm:$0xff] }
 0x5ab   : > { %2882 = vst.msk [vmem:[#allocation2 + $0x7] sm:$0x1] %vm2692_vm15, %v2880_v0  ;;  %v2961_v4 = vadd.f32 %v2960_v3, %v2942_v63  ;;  %v5797_v63 = vld [vmem:[%s7918_s11 + $0x50] sm:$0xff]  ;;  %v5801_v0 = vld [vmem:[%s7918_s11 + $0x60] sm:$0xff]  ;;  %v5798_v1 = vld [vmem:[%s7918_s11 + $0x58] sm:$0xff] }
 0x5ac   : > { %2936 = vst.msk [vmem:[#allocation2 + $0x9] sm:$0x1] %vm2692_vm15, %v2934_v2  ;;  %v5802_v2 = vld [vmem:[%s7918_s11 + $0x68] sm:$0xff]  ;;  %v3502_v3 = vld [vmem:[%s7929_s22 + $0x1a0] sm:$0x7f] }
 0x5ad   : > { %2963 = vst.msk [vmem:[#allocation2 + $0xa] sm:$0x1] %vm2692_vm15, %v2961_v4  ;;  %v3503_v4 = vld [vmem:[%s7929_s22 + $0x1a8] sm:$0x7f] }
 0x5af   : > { %v2906_v10 = vpop.f32.mrf.mxu2 }
 0x5b0   : > { %v2907_v12 = vadd.f32 %v2906_v10, %v2888_v6  ;;  %v2987_v13 = vpop.f32.mrf.mxu3  ;;  %v3504_v6 = vld [vmem:[%s7929_s22 + $0x1b0] sm:$0x7f]  ;;  %v3498_v10 = vld [vmem:[%s7929_s22 + $0x180] sm:$0xff] }
 0x5b1   : > { %v2988_v15 = vadd.f32 %v2987_v13, %v2969_v7  ;;  %v3041_v16 = vpop.f32.mrf.mxu0  ;;  %v3505_v7 = vld [vmem:[%s7929_s22 + $0x1b8] sm:$0x7f] }
 0x5b2   : > { %2909 = vst.msk [vmem:[#allocation2 + $0x8] sm:$0x1] %vm2692_vm15, %v2907_v12  ;;  %v3042_v56 = vadd.f32 %v3041_v16, %v3023_v11  ;;  %v3068_v8 = vpop.f32.mrf.mxu1  ;;  %v3099_v18 = vld [vmem:[#allocation2] sm:$0xff]  ;;  %v3499_v11 = vld [vmem:[%s7929_s22 + $0x188] sm:$0xff]  ;;  %v3500_v12 = vld [vmem:[%s7929_s22 + $0x190] sm:$0xff] }
 0x5b3   : > { %2990 = vst.msk [vmem:[#allocation2 + $0xb] sm:$0x1] %vm2692_vm15, %v2988_v15  ;;  %v3069_v19 = vadd.f32 %v3068_v8, %v3050_v14  ;;  %5777 = vmatmul.msk.f32.vlgmr.msra.gmra.mxu2 %vm2154_vm13, %v3099_v18  ;;  %v3501_v13 = vld [vmem:[%s7929_s22 + $0x198] sm:$0xff]  ;;  %v3494_v14 = vld [vmem:[%s7929_s22 + $0x160] sm:$0xff]  ;;  %v3495_v15 = vld [vmem:[%s7929_s22 + $0x168] sm:$0xff] }
 0x5b4   : > { %3044 = vst.msk [vmem:[#allocation2 + $0xd] sm:$0x1] %vm2692_vm15, %v3042_v56  ;;  %v3496_v16 = vld [vmem:[%s7929_s22 + $0x170] sm:$0xff]  ;;  %v3497_v56 = vld [vmem:[%s7929_s22 + $0x178] sm:$0xff]  ;;  %v3490_v8 = vld [vmem:[%s7929_s22 + $0x140] sm:$0xff] }
 0x5b5   : > { %3071 = vst.msk [vmem:[#allocation2 + $0xe] sm:$0x1] %vm2692_vm15, %v3069_v19  ;;  %v3491_v18 = vld [vmem:[%s7929_s22 + $0x148] sm:$0xff]  ;;  %v3492_v19 = vld [vmem:[%s7929_s22 + $0x150] sm:$0xff] }
 0x5b7   : > { %v3014_v24 = vpop.f32.mrf.mxu2 }
 0x5b8   : > { %v3015_v25 = vadd.f32 %v3014_v24, %v2996_v20  ;;  %v3095_v26 = vpop.f32.mrf.mxu3  ;;  %v3493_v20 = vld [vmem:[%s7929_s22 + $0x158] sm:$0xff]  ;;  %v3487_v24 = vld [vmem:[%s7929_s22 + $0x128] sm:$0xff] }
 0x5b9   : > { %v3096_v27 = vadd.f32 %v3095_v26, %v3077_v23  ;;  %v3486_v23 = vld [vmem:[%s7929_s22 + $0x120] sm:$0xff]  ;;  %v3489_v26 = vld [vmem:[%s7929_s22 + $0x138] sm:$0xff] }
 0x5ba   : > { %3017 = vst.msk [vmem:[#allocation2 + $0xc] sm:$0x1] %vm2692_vm15, %v3015_v25  ;;  %v3488_v25 = vld [vmem:[%s7929_s22 + $0x130] sm:$0xff] }
 0x5bb   : > { %3098 = vst.msk [vmem:[#allocation2 + $0xf] sm:$0x1] %vm2692_vm15, %v3096_v27  ;;  %v3482_v27 = vld [vmem:[%s7929_s22 + $0x100] sm:$0xff]  ;;  %vm3642_vm15 = vcmask 48128  }
 0x5c2   : > { %v3100_v28 = vld [vmem:[#allocation2 + $0x8] sm:$0xff] }
 0x5c3   : > { %5778 = vmatmul.msk.f32.gmra.mxu2 %vm2154_vm13, %v3100_v28  ;;  %v3483_v28 = vld [vmem:[%s7929_s22 + $0x108] sm:$0xff]  ;;  %vm3506_vm13 = vcmask 908288  }
 0x636   : > { %v3134_v31 = vpop.f32.mrf.mxu2 }
 0x637   : > { %3142 = vrot.lane.b32.xlu0 %v3134_v31, %s7952_s1  ;;  %v3484_v31 = vld [vmem:[%s7929_s22 + $0x110] sm:$0xff] }
 0x646   : > { %v3137_v33 = vpop.f32.mrf.mxu2 }
 0x647   : > { %3144 = vrot.lane.b32.xlu2 %v3137_v33, %s7952_s1  ;;  %v3485_v33 = vld [vmem:[%s7929_s22 + $0x118] sm:$0xff] }
 0x6a1   : > { %v3145_v5 = vpop.permute.xlu2 %3144 }
 0x6a2   : > { %3150 = vst.msk [vmem:[#allocation3 + $0x8] sm:$0xff] %vm3148_vm9, %v3145_v5  ;;  %v3478_v5 = vld [vmem:[%s7929_s22 + $0xe0] sm:$0xff] }
 0x6a9   : > { %v3143_v30 = vpop.permute.xlu0 %3142  ;;  %v3152_v17 = vld [vmem:[#allocation3 + $0x8] sm:$0xff] }
 0x6aa   : > { %3149 = vst.msk [vmem:[#allocation3] sm:$0xff] %vm3148_vm9, %v3143_v30  ;;  %3216 = vmatpush.msra.mxu1 %v3152_v17  ;;  %v3479_v30 = vld [vmem:[%s7929_s22 + $0xe8] sm:$0xff]  ;;  %vm3661_vm9 = vcmask 515072  }
 0x6b1   : > { %v3151_v32 = vld [vmem:[#allocation3] sm:$0xff] }
 0x6b2   : > { %3217 = vmatpush.msra.mxu1 %v3151_v32  ;;  %v5923_v34 = vpack.i.bf16 %v3151_v32, %v3152_v17  ;;  %v3480_v17 = vld [vmem:[%s7929_s22 + $0xf0] sm:$0xff]  ;;  %v3481_v32 = vld [vmem:[%s7929_s22 + $0xf8] sm:$0xff] }
 0x6b3   : > { %5783 = vmatmul.msk.f32.vlgmr.msra.gmra.mxu1 %vm3166_vm11, %v3153_v22  ;;  %v3477_v22 = vld [vmem:[%s7929_s22 + $0xd8] sm:$0xff] }
 0x6b4   : > { %5924 = vrot.lane.b32.xlu0 %v5923_v34, %s7981_s5  ;;  %5919 = vrot.lane.b32.xlu2 %v5923_v34, %s7972_s28 }
 0x6b5   : > { %5914 = vrot.lane.b32.xlu1 %v5923_v34, %s7982_s2 }
 0x6bb   : > { %5784 = vmatmul.msk.f32.gmra.mxu1 %vm3166_vm11, %v3154_v39  ;;  %v3472_v39 = vld [vmem:[%s7929_s22 + $0xb0] sm:$0xff] }
 0x6bc   : > { %5939 = vrot.lane.b32.xlu0 %v5923_v34, %s7974_s6  ;;  %5934 = vrot.lane.b32.xlu2 %v5923_v34, %s7975_s30 }
 0x6bd   : > { %5929 = vrot.lane.b32.xlu1 %v5923_v34, %s7973_s18  ;;  %v3474_v34 = vld [vmem:[%s7929_s22 + $0xc0] sm:$0xff] }
 0x6c4   : > { %3434 = vperm.xlu2 %5912, %v3426_v9   ;;  %v3475_v9 = vld [vmem:[%s7929_s22 + $0xc8] sm:$0xff] }
 0x6c5   : > { %3429 = vperm.xlu1 %5911, %v3425_v35   ;;  %v3476_v35 = vld [vmem:[%s7929_s22 + $0xd0] sm:$0xff] }
 0x70e   : > { %v5920_v37 = vpop.permute.xlu2 %5919 }
 0x70f   : > { %v5921_v38 = vunpack.i.l.bf16 %v5920_v37  ;;  %v5922_v40 = vunpack.i.h.bf16 %v5920_v37  ;;  %v3470_v37 = vld [vmem:[%s7929_s22 + $0xa0] sm:$0xff] }
 0x711   : > { %3187 = vmatpush.msra.mxu0 %v5921_v38  ;;  %v3471_v38 = vld [vmem:[%s7929_s22 + $0xa8] sm:$0xff] }
 0x713   : > { %3188 = vmatpush.msra.mxu0 %v5922_v40  ;;  %v3473_v40 = vld [vmem:[%s7929_s22 + $0xb8] sm:$0xff] }
 0x714   : > { %5781 = vmatmul.msk.f32.vlgmr.msra.gmra.mxu0 %vm3166_vm11, %v5779_v41  ;;  %v3466_v41 = vld [vmem:[%s7929_s22 + $0x80] sm:$0xff] }
 0x716   : > { %v5935_v42 = vpop.permute.xlu2 %5934 }
 0x717   : > { %v5936_v21 = vunpack.i.l.bf16 %v5935_v42  ;;  %v5937_v36 = vunpack.i.h.bf16 %v5935_v42  ;;  %v3467_v42 = vld [vmem:[%s7929_s22 + $0x88] sm:$0xff] }
 0x719   : > { %3334 = vmatpush.msrb.mxu0 %v5936_v21  ;;  %v3468_v21 = vld [vmem:[%s7929_s22 + $0x90] sm:$0xff] }
 0x71b   : > { %3335 = vmatpush.msrb.mxu0 %v5937_v36  ;;  %v3469_v36 = vld [vmem:[%s7929_s22 + $0x98] sm:$0xff] }
 0x71c   : > { %5782 = vmatmul.msk.f32.gmra.mxu0 %vm3166_vm11, %v5780_v43  ;;  %v3462_v43 = vld [vmem:[%s7929_s22 + $0x60] sm:$0xff] }
 0x71d   : > { %5808 = vmatpush.msk.msra.mxu0 %vm3513_vm12, %v3503_v4 }
 0x71f   : > { %3552 = vmatpush.msra.mxu0 %v3499_v11 }
 0x721   : > { %3553 = vmatpush.msra.mxu0 %v3495_v15 }
 0x723   : > { %3554 = vmatpush.msra.mxu0 %v3491_v18 }
 0x724   : > { %5795 = vmatmul.msk.f32.vlgmr.msrb.gmra.mxu0 %vm3166_vm11, %v5793_v44  ;;  %v3463_v44 = vld [vmem:[%s7929_s22 + $0x68] sm:$0xff] }
 0x725   : > { %3555 = vmatpush.msra.mxu0 %v3487_v24 }
 0x726   : > { %v5925_v45 = vpop.permute.xlu0 %5924 }
 0x727   : > { %v5926_v46 = vunpack.i.l.bf16 %v5925_v45  ;;  %v5915_v47 = vpop.permute.xlu1 %5914  ;;  %v5927_v49 = vunpack.i.h.bf16 %v5925_v45  ;;  %3556 = vmatpush.msra.mxu0 %v3483_v28  ;;  %v3464_v45 = vld [vmem:[%s7929_s22 + $0x70] sm:$0xff] }
 0x728   : > { %v5916_v48 = vunpack.i.l.bf16 %v5915_v47  ;;  %v5917_v51 = vunpack.i.h.bf16 %v5915_v47  ;;  %v3458_v47 = vld [vmem:[%s7929_s22 + $0x40] sm:$0xff] }
 0x729   : > { %3294 = vmatpush.msrb.mxu2 %v5926_v46  ;;  %3557 = vmatpush.msra.mxu0 %v3479_v30  ;;  %v3465_v46 = vld [vmem:[%s7929_s22 + $0x78] sm:$0xff] }
 0x72a   : > { %3254 = vmatpush.msra.mxu3 %v5916_v48  ;;  %v3459_v48 = vld [vmem:[%s7929_s22 + $0x48] sm:$0xff] }
 0x72b   : > { %3295 = vmatpush.msrb.mxu2 %v5927_v49  ;;  %3558 = vmatpush.msra.mxu0 %v3475_v9  ;;  %v3460_v49 = vld [vmem:[%s7929_s22 + $0x50] sm:$0xff] }
 0x72c   : > { %3255 = vmatpush.msra.mxu3 %v5917_v51  ;;  %5791 = vmatmul.msk.f32.vlgmr.msrb.gmra.mxu2 %vm3166_vm11, %v5789_v50  ;;  %v3461_v51 = vld [vmem:[%s7929_s22 + $0x58] sm:$0xff] }
 0x72d   : > { %5787 = vmatmul.msk.f32.vlgmr.msra.gmra.mxu3 %vm3166_vm11, %v5785_v52  ;;  %5796 = vmatmul.msk.f32.gmra.mxu0 %vm3166_vm11, %v5794_v53  ;;  %v3454_v52 = vld [vmem:[%s7929_s22 + $0x20] sm:$0xff]  ;;  %v3455_v53 = vld [vmem:[%s7929_s22 + $0x28] sm:$0xff] }
 0x72e   : > { %v5940_v54 = vpop.permute.xlu0 %5939  ;;  %5805 = vmatpush.msk.msra.mxu2 %vm3513_vm12, %v3502_v3  ;;  %3559 = vmatpush.msra.mxu0 %v3471_v38 }
 0x72f   : > { %v5941_v55 = vunpack.i.l.bf16 %v5940_v54  ;;  %v5930_v57 = vpop.permute.xlu1 %5929  ;;  %v5942_v59 = vunpack.i.h.bf16 %v5940_v54  ;;  %v3456_v54 = vld [vmem:[%s7929_s22 + $0x30] sm:$0xff] }
 0x730   : > { %v5931_v58 = vunpack.i.l.bf16 %v5930_v57  ;;  %v5932_v61 = vunpack.i.h.bf16 %v5930_v57  ;;  %3529 = vmatpush.msra.mxu2 %v3498_v10  ;;  %3560 = vmatpush.msra.mxu0 %v3467_v42  ;;  %v3450_v57 = vld [vmem:[%s7929_s22] sm:$0xff] }
 0x731   : > { %3374 = vmatpush.msrb.mxu1 %v5941_v55  ;;  %v3457_v55 = vld [vmem:[%s7929_s22 + $0x38] sm:$0xff] }
 0x732   : > { %3414 = vmatpush.msrb.mxu3 %v5931_v58  ;;  %3530 = vmatpush.msra.mxu2 %v3494_v14  ;;  %v3451_v58 = vld [vmem:[%s7929_s22 + $0x8] sm:$0xff] }
 0x733   : > { %3375 = vmatpush.msrb.mxu1 %v5942_v59  ;;  %3561 = vmatpush.msra.mxu0 %v3463_v44  ;;  %v3452_v59 = vld [vmem:[%s7929_s22 + $0x10] sm:$0xff] }
 0x734   : > { %3415 = vmatpush.msrb.mxu3 %v5932_v61  ;;  %5792 = vmatmul.msk.f32.gmra.mxu2 %vm3166_vm11, %v5790_v60  ;;  %v3219_v60 = vpop.f32.mrf.mxu1  ;;  %v3453_v61 = vld [vmem:[%s7929_s22 + $0x18] sm:$0xff] }
 0x735   : > { %5788 = vmatmul.msk.f32.gmra.mxu3 %vm3166_vm11, %v5786_v62  ;;  %5799 = vmatmul.msk.f32.vlgmr.msrb.gmra.mxu1 %vm3166_vm11, %v5797_v63 }
 0x736   : > { %5811 = vmatpush.msk.msra.mxu1 %vm3513_vm12, %v3504_v6  ;;  %5814 = vmatpush.msk.msra.mxu3 %vm3513_vm12, %v3505_v7 }
 0x737   : > { %3531 = vmatpush.msra.mxu2 %v3490_v8  ;;  %3562 = vmatpush.msra.mxu0 %v3459_v48 }
 0x738   : > { %3575 = vmatpush.msra.mxu1 %v3500_v12  ;;  %3598 = vmatpush.msra.mxu3 %v3501_v13 }
 0x739   : > { %3532 = vmatpush.msra.mxu2 %v3486_v23  ;;  %3563 = vmatpush.msra.mxu0 %v3455_v53 }
 0x73a   : > { %3576 = vmatpush.msra.mxu1 %v3496_v16  ;;  %3599 = vmatpush.msra.mxu3 %v3497_v56 }
 0x73b   : > { %3533 = vmatpush.msra.mxu2 %v3482_v27  ;;  %3564 = vmatpush.msra.mxu0 %v3451_v58  ;;  %v4477_v58 = vld [vmem:[%s7921_s14] sm:$0xff] }
 0x73c   : > { %3577 = vmatpush.msra.mxu1 %v3492_v19  ;;  %3600 = vmatpush.msra.mxu3 %v3493_v20  ;;  %v3222_v63 = vpop.f32.mrf.mxu1  ;;  %v3430_v19 = vpop.permute.xlu1 %3429 }
 0x73d   : > { %5803 = vmatmul.msk.f32.vlgmr.msrb.gmra.mxu3 %vm3166_vm11, %v5801_v0  ;;  %5800 = vmatmul.msk.f32.gmra.mxu1 %vm3166_vm11, %v5798_v1 }
 0x73e   : > { %3578 = vmatpush.msra.mxu1 %v3488_v25  ;;  %3601 = vmatpush.msra.mxu3 %v3489_v26 }
 0x73f   : > { %3534 = vmatpush.msra.mxu2 %v3478_v5 }
 0x740   : > { %3579 = vmatpush.msra.mxu1 %v3484_v31  ;;  %3602 = vmatpush.msra.mxu3 %v3485_v33  ;;  %v3435_v31 = vpop.permute.xlu2 %3434 }
 0x741   : > { %3535 = vmatpush.msra.mxu2 %v3474_v34 }
 0x742   : > { %3580 = vmatpush.msra.mxu1 %v3480_v17  ;;  %3603 = vmatpush.msra.mxu3 %v3481_v32 }
 0x743   : > { %3536 = vmatpush.msra.mxu2 %v3470_v37 }
 0x744   : > { %3581 = vmatpush.msra.mxu1 %v3476_v35  ;;  %3604 = vmatpush.msra.mxu3 %v3477_v22 }
 0x745   : > { %5804 = vmatmul.msk.f32.gmra.mxu3 %vm3166_vm11, %v5802_v2  ;;  %3537 = vmatpush.msra.mxu2 %v3466_v41 }
 0x746   : > { %3582 = vmatpush.msra.mxu1 %v3472_v39  ;;  %3605 = vmatpush.msra.mxu3 %v3473_v40 }
 0x747   : > { %3538 = vmatpush.msra.mxu2 %v3462_v43 }
 0x748   : > { %3583 = vmatpush.msra.mxu1 %v3468_v21  ;;  %3606 = vmatpush.msra.mxu3 %v3469_v36 }
 0x749   : > { %3539 = vmatpush.msra.mxu2 %v3458_v47 }
 0x74a   : > { %3584 = vmatpush.msra.mxu1 %v3464_v45  ;;  %3607 = vmatpush.msra.mxu3 %v3465_v46 }
 0x74b   : > { %3540 = vmatpush.msra.mxu2 %v3454_v52 }
 0x74c   : > { %3585 = vmatpush.msra.mxu1 %v3460_v49  ;;  %3608 = vmatpush.msra.mxu3 %v3461_v51 }
 0x74d   : > { %3541 = vmatpush.msra.mxu2 %v3450_v57 }
 0x74e   : > { %3586 = vmatpush.msra.mxu1 %v3456_v54  ;;  %3609 = vmatpush.msra.mxu3 %v3457_v55 }
 0x750   : > { %3587 = vmatpush.msra.mxu1 %v3452_v59  ;;  %3610 = vmatpush.msra.mxu3 %v3453_v61 }
 0x791   : > { %v3190_v50 = vpop.f32.mrf.mxu0 }
 0x792   : > { %v3220_v1 = vadd.f32 %v3219_v60, %v3190_v50 }
 0x799   : > { %v3193_v62 = vpop.f32.mrf.mxu0 }
 0x79a   : > { %v3223_v10 = vadd.f32 %v3222_v63, %v3193_v62 }
 0x7a1   : > { %v3337_v4 = vpop.f32.mrf.mxu0 }
 0x7aa   : > { %v3340_v56 = vpop.f32.mrf.mxu0 }
 0x7af   : > { %v3297_v2 = vpop.f32.mrf.mxu2 }
 0x7b0   : > { %v3257_v0 = vpop.f32.mrf.mxu3 }
 0x7b1   : > { %v3263_v3 = vadd.f32 %v3257_v0, %v3220_v1 }
 0x7b2   : > { %v3377_v11 = vpop.f32.mrf.mxu1 }
 0x7b3   : > { %v3303_v6 = vadd.f32 %v3297_v2, %v3263_v3 }
 0x7b5   : > { %v3343_v12 = vadd.f32 %v3337_v4, %v3303_v6 }
 0x7b7   : > { %v3300_v14 = vpop.f32.mrf.mxu2  ;;  %v3383_v15 = vadd.f32 %v3377_v11, %v3343_v12 }
 0x7b8   : > { %v3260_v7 = vpop.f32.mrf.mxu3 }
 0x7b9   : > { %v3264_v13 = vadd.f32 %v3260_v7, %v3223_v10 }
 0x7ba   : > { %v3380_v24 = vpop.f32.mrf.mxu1 }
 0x7bb   : > { %v3304_v16 = vadd.f32 %v3300_v14, %v3264_v13 }
 0x7bd   : > { %v3344_v20 = vadd.f32 %v3340_v56, %v3304_v16  ;;  %v5817_v16 = vld [vmem:[%s7920_s13 + $0x8] sm:$0xff] }
 0x7bf   : > { %v3384_v26 = vadd.f32 %v3380_v24, %v3344_v20 }
 0x7c0   : > { %v3417_v8 = vpop.f32.mrf.mxu3 }
 0x7c1   : > { %v3423_v18 = vadd.f32 %v3417_v8, %v3383_v15 }
 0x7c3   : > { %v3437_v23 = vadd.f32 %v3430_v19, %v3423_v18 }
 0x7c5   : > { %v3439_v25 = vmax.f32 %v3437_v23, 0.0 }
 0x7c7   : > { %5806 = vmatmul.msk.f32.vlgmr.msra.gmra.mxu2 %vm3506_vm13, %v3439_v25  ;;  %5809 = vmatmul.msk.f32.vlgmr.msra.gmra.mxu0 %vm3506_vm13, %v3439_v25 }
 0x7c8   : > { %5812 = vmatmul.msk.f32.vlgmr.msra.gmra.mxu1 %vm3506_vm13, %v3439_v25  ;;  %5815 = vmatmul.msk.f32.vlgmr.msra.gmra.mxu3 %vm3506_vm13, %v3439_v25  ;;  %v3420_v27 = vpop.f32.mrf.mxu3 }
 0x7c9   : > { %v3424_v28 = vadd.f32 %v3420_v27, %v3384_v26  ;;  %v3675_v27 = vld [vmem:[%s7920_s13] sm:$0xff] }
 0x7cb   : > { %v3438_v33 = vadd.f32 %v3435_v31, %v3424_v28 }
 0x7cd   : > { %v3440_v5 = vmax.f32 %v3438_v33, 0.0 }
 0x7cf   : > { %5807 = vmatmul.msk.f32.gmra.mxu2 %vm3506_vm13, %v3440_v5  ;;  %5810 = vmatmul.msk.f32.gmra.mxu0 %vm3506_vm13, %v3440_v5 }
 0x7d0   : > { %5813 = vmatmul.msk.f32.gmra.mxu1 %vm3506_vm13, %v3440_v5  ;;  %5816 = vmatmul.msk.f32.gmra.mxu3 %vm3506_vm13, %v3440_v5 }
 0x844   : > { %v3566_v17 = vpop.f32.mrf.mxu0 }
 0x845   : > { %v3589_v30 = vpop.f32.mrf.mxu1 }
 0x84a   : > { %v3543_v32 = vpop.f32.mrf.mxu2 }
 0x84b   : > { %3626 = vrot.lane.b32.xlu1 %v3543_v32, %s7983_s27  ;;  %v3612_v9 = vpop.f32.mrf.mxu3 }
 0x84c   : > { %v3569_v35 = vpop.f32.mrf.mxu0 }
 0x84d   : > { %v3592_v34 = vpop.f32.mrf.mxu1 }
 0x84e   : > { %3638 = vrot.lane.b32.xlu2 %v3592_v34, %s7983_s27 }
 0x852   : > { %v3546_v22 = vpop.f32.mrf.mxu2 }
 0x853   : > { %3636 = vrot.lane.b32.xlu1 %v3569_v35, %s7983_s27  ;;  %3634 = vrot.lane.b32.xlu0 %v3546_v22, %s7983_s27  ;;  %v3615_v37 = vpop.f32.mrf.mxu3 }
 0x856   : > { %3628 = vrot.lane.b32.xlu2 %v3566_v17, %s7983_s27 }
 0x85b   : > { %3632 = vrot.lane.b32.xlu1 %v3612_v9, %s7983_s27  ;;  %3640 = vrot.lane.b32.xlu0 %v3615_v37, %s7983_s27 }
 0x863   : > { %3630 = vrot.lane.b32.xlu0 %v3589_v30, %s7983_s27 }
 0x8a8   : > { %v3639_v38 = vpop.permute.xlu2 %3638 }
 0x8b0   : > { %v3629_v39 = vpop.permute.xlu2 %3628 }
 0x8bd   : > { %v3627_v40 = vpop.permute.xlu1 %3626 }
 0x8be   : > { %v7547_v41 = vsel %vm3642_vm15, %v3627_v40, %v3629_v39  ;;  %3658 = vst.msk [vmem:[#allocation4] sm:$0xff] %vm3657_vm2, %v3627_v40 }
 0x8c5   : > { %v3637_v42 = vpop.permute.xlu1 %3636  ;;  %v3635_v21 = vpop.permute.xlu0 %3634  ;;  %v7560_v49 = vld [vmem:[#allocation4] sm:$0xff] }
 0x8c6   : > { %v7550_v36 = vsel %vm3642_vm15, %v3637_v42, %v3639_v38  ;;  %v7553_v43 = vsel %vm3642_vm15, %v3635_v21, %v3637_v42  ;;  %3663 = vst.msk [vmem:[#allocation4 + $0x20] sm:$0xff] %vm3657_vm2, %v3635_v21 }
 0x8cd   : > { %v3641_v29 = vpop.permute.xlu0 %3640  ;;  %v3633_v45 = vpop.permute.xlu1 %3632  ;;  %v3671_v53 = vld [vmem:[#allocation4 + $0x20] sm:$0xff] }
 0x8ce   : > { %v3648_v44 = vsel %vm3642_vm15, %v3639_v38, %v3641_v29  ;;  %v5973_v55 = vpack.i.bf16 %v7553_v43, %v3671_v53 }
 0x8cf   : > { %3666 = vst.msk [vmem:[#allocation4 + $0x38] sm:$0xff] %vm3661_vm9, %v3648_v44 }
 0x8d5   : > { %v3631_v46 = vpop.permute.xlu0 %3630 }
 0x8d6   : > { %v7557_v47 = vsel %vm3642_vm15, %v3629_v39, %v3631_v46  ;;  %v3645_v48 = vsel %vm3642_vm15, %v3631_v46, %v3633_v45  ;;  %v7562_v50 = vld [vmem:[#allocation4 + $0x38] sm:$0xff]  ;;  %v5826_v39 = vld [vmem:[%s7920_s13 + $0x10] sm:$0xff] }
 0x8d7   : > { %v5963_v51 = vpack.i.bf16 %v7560_v49, %v7562_v50  ;;  %v5968_v52 = vpack.i.bf16 %v7557_v47, %v7550_v36  ;;  %3662 = vst.msk [vmem:[#allocation4 + $0x18] sm:$0xff] %vm3661_vm9, %v3645_v48 }
 0x8d9   : > { %5964 = vrot.lane.b32.xlu0 %v5963_v51, %s7972_s28  ;;  %5949 = vrot.lane.b32.xlu2 %v5968_v52, %s7972_s28 }
 0x8de   : > { %v7570_v54 = vld [vmem:[#allocation4 + $0x18] sm:$0xff] }
 0x8df   : > { %v5943_v57 = vpack.i.bf16 %v7570_v54, %v7547_v41 }
 0x8e1   : > { %5969 = vrot.lane.b32.xlu0 %v5968_v52, %s7982_s2  ;;  %5954 = vrot.lane.b32.xlu2 %v5973_v55, %s7972_s28 }
 0x8e2   : > { %5944 = vrot.lane.b32.xlu1 %v5943_v57, %s7972_s28 }
 0x8e9   : > { %5974 = vrot.lane.b32.xlu0 %v5973_v55, %s7982_s2  ;;  %5959 = vrot.lane.b32.xlu2 %v5943_v57, %s7982_s2 }
 0x8ea   : > { %5984 = vrot.lane.b32.xlu1 %v5968_v52, %s7981_s5 }
 0x8f1   : > { %5979 = vrot.lane.b32.xlu0 %v5943_v57, %s7981_s5  ;;  %6004 = vrot.lane.b32.xlu2 %v5968_v52, %s7975_s30 }
 0x8f2   : > { %5989 = vrot.lane.b32.xlu1 %v5963_v51, %s7982_s2  ;;  %s7984_s2 = sshll.u32 %s7988_s25, 4 }
 0x8f9   : > { %6024 = vrot.lane.b32.xlu0 %v5963_v51, %s7975_s30  ;;  %6009 = vrot.lane.b32.xlu2 %v5963_v51, %s7981_s5 }
 0x8fa   : > { %5994 = vrot.lane.b32.xlu1 %v5973_v55, %s7981_s5  ;;  %s6086_s5 = smov 1  }
 0x901   : > { %6029 = vrot.lane.b32.xlu0 %v5973_v55, %s7974_s6  ;;  %6014 = vrot.lane.b32.xlu2 %v5973_v55, %s7975_s30 }
 0x902   : > { %5999 = vrot.lane.b32.xlu1 %v5943_v57, %s7975_s30 }
 0x909   : > { %6034 = vrot.lane.b32.xlu0 %v5968_v52, %s7974_s6  ;;  %6019 = vrot.lane.b32.xlu2 %v5943_v57, %s7974_s6 }
 0x90a   : > { %6039 = vrot.lane.b32.xlu1 %v5963_v51, %s7974_s6  ;;  %s7840_s6 = scalar_lea.vmem %s7930_s23, %s7984_s2 }
 0x911   : > { %6054 = vrot.lane.b32.xlu0 %v5943_v57, %s7973_s18  ;;  %6049 = vrot.lane.b32.xlu2 %v5963_v51, %s7973_s18 }
 0x912   : > { %6044 = vrot.lane.b32.xlu1 %v5973_v55, %s7973_s18 }
 0x919   : > { %4480 = vperm.xlu2 %5912, %v4477_v58   ;;  %v5831_v58 = vld [vmem:[%s7920_s13 + $0x18] sm:$0xff] }
 0x91a   : > { %6059 = vrot.lane.b32.xlu1 %v5968_v52, %s7973_s18 }
 0x933   : > { %v5950_v59 = vpop.permute.xlu2 %5949 }
 0x934   : > { %v5951_v61 = vunpack.i.l.bf16 %v5950_v59  ;;  %v5952_v11 = vunpack.i.h.bf16 %v5950_v59 }
 0x93b   : > { %v5955_v60 = vpop.permute.xlu2 %5954 }
 0x93c   : > { %v5957_v62 = vunpack.i.h.bf16 %v5955_v60  ;;  %v5956_v63 = vunpack.i.l.bf16 %v5955_v60 }
 0x93e   : > { %v3705_v0 = vsel %vm843_vm0, %v5956_v63, %v5957_v62  ;;  %v3706_v1 = vsel %vm843_vm0, %v5957_v62, %v5951_v61 }
 0x93f   : > { %3733 = vmatpush.msrb.mxu2 %v3705_v0  ;;  %3753 = vmatpush.msrb.mxu0 %v3706_v1 }
 0x943   : > { %v7602_v2 = vpop.permute.xlu2 %5959 }
 0x944   : > { %v5961_v33 = vunpack.i.l.bf16 %v7602_v2  ;;  %v5962_v22 = vunpack.i.h.bf16 %v7602_v2 }
 0x94b   : > { %v5965_v3 = vpop.permute.xlu0 %5964  ;;  %v7607_v15 = vpop.permute.xlu2 %6004 }
 0x94c   : > { %v5966_v4 = vunpack.i.l.bf16 %v5965_v3  ;;  %v5967_v12 = vunpack.i.h.bf16 %v5965_v3  ;;  %v6006_v44 = vunpack.i.l.bf16 %v7607_v15 }
 0x94e   : > { %3793 = vmatpush.msrb.mxu3 %v5966_v4  ;;  %v3707_v6 = vsel %vm843_vm0, %v5951_v61, %v5966_v4  ;;  %v6007_v4 = vunpack.i.h.bf16 %v7607_v15  ;;  %v5836_v15 = vld [vmem:[%s7920_s13 + $0x20] sm:$0xff] }
 0x94f   : > { %3773 = vmatpush.msrb.mxu1 %v3707_v6 }
 0x953   : > { %v7605_v7 = vpop.permute.xlu0 %5969  ;;  %v6010_v5 = vpop.permute.xlu2 %6009 }
 0x954   : > { %v5945_v10 = vpop.permute.xlu1 %5944  ;;  %v5971_v20 = vunpack.i.l.bf16 %v7605_v7  ;;  %v5972_v26 = vunpack.i.h.bf16 %v7605_v7  ;;  %v6011_v40 = vunpack.i.l.bf16 %v6010_v5 }
 0x955   : > { %v5947_v13 = vunpack.i.h.bf16 %v5945_v10  ;;  %v5946_v14 = vunpack.i.l.bf16 %v5945_v10 }
 0x956   : > { %v3901_v30 = vsel %vm1149_vm3, %v5961_v33, %v5972_v26  ;;  %v3902_v21 = vsel %vm1149_vm3, %v5972_v26, %v5962_v22 }
 0x957   : > { %3794 = vmatpush.msrb.mxu3 %v5947_v13  ;;  %v3702_v56 = vsel %vm843_vm0, %v5967_v12, %v5946_v14  ;;  %v3703_v8 = vsel %vm843_vm0, %v5946_v14, %v5952_v11  ;;  %v3704_v18 = vsel %vm843_vm0, %v5952_v11, %v5947_v13 }
 0x958   : > { %3734 = vmatpush.msrb.mxu2 %v3702_v56  ;;  %3754 = vmatpush.msrb.mxu0 %v3703_v8 }
 0x959   : > { %3774 = vmatpush.msrb.mxu1 %v3704_v18  ;;  %5821 = vmatmul.msk.f32.vlgmr.msrb.gmra.mxu3 %vm3166_vm11, %v5817_v16 }
 0x95a   : > { %3876 = vmatpush.msra.mxu3 %v7562_v50  ;;  %3816 = vmatpush.msra.mxu2 %v3671_v53 }
 0x95b   : > { %3836 = vmatpush.msra.mxu0 %v7553_v43  ;;  %3856 = vmatpush.msra.mxu1 %v7550_v36  ;;  %v5975_v19 = vpop.permute.xlu0 %5974 }
 0x95c   : > { %3877 = vmatpush.msra.mxu3 %v7570_v54  ;;  %5818 = vmatmul.msk.f32.vlgmr.msrb.gmra.mxu2 %vm3166_vm11, %v5817_v16  ;;  %v7622_v23 = vpop.permute.xlu1 %5984  ;;  %v5977_v24 = vunpack.i.h.bf16 %v5975_v19  ;;  %v5976_v25 = vunpack.i.l.bf16 %v5975_v19  ;;  %v6012_v54 = vunpack.i.h.bf16 %v6010_v5  ;;  %v5841_v5 = vld [vmem:[%s7920_s13 + $0x28] sm:$0xff] }
 0x95d   : > { %5819 = vmatmul.msk.f32.vlgmr.msrb.gmra.mxu0 %vm3166_vm11, %v5817_v16  ;;  %5820 = vmatmul.msk.f32.vlgmr.msrb.gmra.mxu1 %vm3166_vm11, %v5817_v16  ;;  %v5986_v35 = vunpack.i.l.bf16 %v7622_v23  ;;  %v5987_v43 = vunpack.i.h.bf16 %v7622_v23 }
 0x95e   : > { %3817 = vmatpush.msra.mxu2 %v7560_v49  ;;  %3837 = vmatpush.msra.mxu0 %v7547_v41  ;;  %v3903_v28 = vsel %vm1149_vm3, %v5976_v25, %v5977_v24  ;;  %v3904_v31 = vsel %vm1149_vm3, %v5977_v24, %v5971_v20  ;;  %v6015_v41 = vpop.permute.xlu2 %6014 }
 0x95f   : > { %3857 = vmatpush.msra.mxu1 %v7557_v47  ;;  %v4024_v36 = vsel %vm1258_vm4, %v5986_v35, %v6011_v40  ;;  %v6017_v51 = vunpack.i.h.bf16 %v6015_v41  ;;  %v6016_v52 = vunpack.i.l.bf16 %v6015_v41 }
 0x960   : > { %3931 = vmatpush.msrb.mxu2 %v3903_v28  ;;  %3951 = vmatpush.msrb.mxu0 %v3904_v31 }
 0x961   : > { %5825 = vmatmul.msk.f32.vlgmr.msra.gmra.mxu3 %vm3166_vm11, %v3675_v27  ;;  %v4141_v61 = vsel %vm1367_vm5, %v6016_v52, %v6017_v51  ;;  %v4142_v63 = vsel %vm1367_vm5, %v6017_v51, %v6006_v44 }
 0x962   : > { %3952 = vmatpush.msrb.mxu0 %v3901_v30 }
 0x963   : > { %v5980_v17 = vpop.permute.xlu0 %5979 }
 0x964   : > { %5822 = vmatmul.msk.f32.vlgmr.msra.gmra.mxu2 %vm3166_vm11, %v3675_v27  ;;  %v5990_v32 = vpop.permute.xlu1 %5989  ;;  %v5982_v42 = vunpack.i.h.bf16 %v5980_v17  ;;  %v5981_v47 = vunpack.i.l.bf16 %v5980_v17 }
 0x965   : > { %5823 = vmatmul.msk.f32.vlgmr.msra.gmra.mxu0 %vm3166_vm11, %v3675_v27  ;;  %5824 = vmatmul.msk.f32.vlgmr.msra.gmra.mxu1 %vm3166_vm11, %v3675_v27  ;;  %v5992_v34 = vunpack.i.h.bf16 %v5990_v32  ;;  %v5991_v9 = vunpack.i.l.bf16 %v5990_v32 }
 0x966   : > { %v4021_v50 = vsel %vm1258_vm4, %v5987_v43, %v5982_v42  ;;  %v4019_v59 = vsel %vm1258_vm4, %v6012_v54, %v5981_v47  ;;  %v4020_v60 = vsel %vm1258_vm4, %v5981_v47, %v5987_v43  ;;  %v6020_v62 = vpop.permute.xlu2 %6019 }
 0x967   : > { %3991 = vmatpush.msrb.mxu3 %v5991_v9  ;;  %v3900_v37 = vsel %vm1149_vm3, %v5992_v34, %v5961_v33  ;;  %v3905_v38 = vsel %vm1149_vm3, %v5971_v20, %v5991_v9  ;;  %v6021_v19 = vunpack.i.l.bf16 %v6020_v62  ;;  %v6022_v26 = vunpack.i.h.bf16 %v6020_v62 }
 0x968   : > { %3932 = vmatpush.msrb.mxu2 %v3900_v37  ;;  %3971 = vmatpush.msrb.mxu1 %v3905_v38  ;;  %vm4494_vm3 = vcmask 531456  }
 0x969   : > { %3992 = vmatpush.msrb.mxu3 %v5962_v22 }
 0x96a   : > { %3972 = vmatpush.msrb.mxu1 %v3902_v21  ;;  %5830 = vmatmul.msk.f32.vlgmr.msrb.gmra.mxu3 %vm3166_vm11, %v5826_v39 }
 0x96b   : > { %4110 = vmatpush.msra.mxu3 %v6011_v40  ;;  %v6025_v29 = vpop.permute.xlu0 %6024 }
 0x96c   : > { %4090 = vmatpush.msra.mxu1 %v4024_v36  ;;  %5827 = vmatmul.msk.f32.vlgmr.msrb.gmra.mxu2 %vm3166_vm11, %v5826_v39  ;;  %v5995_v45 = vpop.permute.xlu1 %5994  ;;  %v6026_v46 = vunpack.i.l.bf16 %v6025_v29  ;;  %v6027_v6 = vunpack.i.h.bf16 %v6025_v29 }
 0x96d   : > { %5828 = vmatmul.msk.f32.vlgmr.msrb.gmra.mxu0 %vm3166_vm11, %v5826_v39  ;;  %5829 = vmatmul.msk.f32.vlgmr.msrb.gmra.mxu1 %vm3166_vm11, %v5826_v39  ;;  %v5997_v48 = vunpack.i.h.bf16 %v5995_v45  ;;  %v5996_v49 = vunpack.i.l.bf16 %v5995_v45  ;;  %v5846_v39 = vld [vmem:[%s7920_s13 + $0x30] sm:$0xff] }
 0x96e   : > { %4111 = vmatpush.msra.mxu3 %v5982_v42  ;;  %4091 = vmatpush.msra.mxu1 %v4021_v50  ;;  %v4143_v53 = vsel %vm1367_vm5, %v6006_v44, %v6026_v46  ;;  %v6050_v20 = vpop.permute.xlu2 %6049 }
 0x96f   : > { %v4022_v55 = vsel %vm1258_vm4, %v5996_v49, %v5997_v48  ;;  %v4023_v57 = vsel %vm1258_vm4, %v5997_v48, %v5986_v35  ;;  %v6051_v31 = vunpack.i.l.bf16 %v6050_v20  ;;  %v6052_v37 = vunpack.i.h.bf16 %v6050_v20 }
 0x970   : > { %4229 = vmatpush.msrb.mxu3 %v6026_v46  ;;  %4209 = vmatpush.msrb.mxu1 %v4143_v53  ;;  %vm4516_vm4 = vcmask 1047560  }
 0x971   : > { %4050 = vmatpush.msra.mxu2 %v4022_v55  ;;  %4070 = vmatpush.msra.mxu0 %v4023_v57 }
 0x972   : > { %5835 = vmatmul.msk.f32.vlgmr.msra.gmra.mxu3 %vm3166_vm11, %v5831_v58 }
 0x973   : > { %4051 = vmatpush.msra.mxu2 %v4019_v59  ;;  %4071 = vmatpush.msra.mxu0 %v4020_v60  ;;  %v6030_v0 = vpop.permute.xlu0 %6029 }
 0x974   : > { %5832 = vmatmul.msk.f32.vlgmr.msra.gmra.mxu2 %vm3166_vm11, %v5831_v58  ;;  %v6000_v1 = vpop.permute.xlu1 %5999  ;;  %v6032_v2 = vunpack.i.h.bf16 %v6030_v0  ;;  %v6031_v3 = vunpack.i.l.bf16 %v6030_v0 }
 0x975   : > { %4169 = vmatpush.msrb.mxu2 %v4141_v61  ;;  %4189 = vmatpush.msrb.mxu0 %v4142_v63  ;;  %v6002_v7 = vunpack.i.h.bf16 %v6000_v1  ;;  %v6001_v10 = vunpack.i.l.bf16 %v6000_v1 }
 0x976   : > { %5833 = vmatmul.msk.f32.vlgmr.msra.gmra.mxu0 %vm3166_vm11, %v5831_v58  ;;  %5834 = vmatmul.msk.f32.vlgmr.msra.gmra.mxu1 %vm3166_vm11, %v5831_v58  ;;  %v4260_v11 = vsel %vm1476_vm6, %v6031_v3, %v6032_v2 }
 0x977   : > { %4230 = vmatpush.msrb.mxu3 %v6002_v7  ;;  %v4138_v12 = vsel %vm1367_vm5, %v6027_v6, %v6001_v10  ;;  %v4139_v13 = vsel %vm1367_vm5, %v6001_v10, %v6007_v4  ;;  %v4140_v14 = vsel %vm1367_vm5, %v6007_v4, %v6002_v7  ;;  %vm4508_vm5 = vcmask 7168  }
 0x978   : > { %4170 = vmatpush.msrb.mxu2 %v4138_v12  ;;  %4190 = vmatpush.msrb.mxu0 %v4139_v13 }
 0x979   : > { %4210 = vmatpush.msrb.mxu1 %v4140_v14 }
 0x97a   : > { %4288 = vmatpush.msra.mxu2 %v4260_v11  ;;  %5840 = vmatmul.msk.f32.vlgmr.msrb.gmra.mxu3 %vm3166_vm11, %v5836_v15 }
 0x97b   : > { %v6035_v16 = vpop.permute.xlu0 %6034 }
 0x97c   : > { %5837 = vmatmul.msk.f32.vlgmr.msrb.gmra.mxu2 %vm3166_vm11, %v5836_v15  ;;  %v6040_v56 = vpop.permute.xlu1 %6039  ;;  %v6037_v8 = vunpack.i.h.bf16 %v6035_v16  ;;  %v6036_v18 = vunpack.i.l.bf16 %v6035_v16 }
 0x97d   : > { %v6042_v23 = vunpack.i.h.bf16 %v6040_v56  ;;  %v6041_v24 = vunpack.i.l.bf16 %v6040_v56 }
 0x97e   : > { %5838 = vmatmul.msk.f32.vlgmr.msrb.gmra.mxu0 %vm3166_vm11, %v5836_v15  ;;  %5839 = vmatmul.msk.f32.vlgmr.msrb.gmra.mxu1 %vm3166_vm11, %v5836_v15  ;;  %v4261_v25 = vsel %vm1476_vm6, %v6032_v2, %v6036_v18  ;;  %v4258_v33 = vsel %vm1476_vm6, %v6021_v19, %v6037_v8  ;;  %v4259_v30 = vsel %vm1476_vm6, %v6037_v8, %v6022_v26 }
 0x97f   : > { %4348 = vmatpush.msra.mxu3 %v6041_v24  ;;  %v4257_v27 = vsel %vm1476_vm6, %v6042_v23, %v6021_v19  ;;  %4308 = vmatpush.msra.mxu0 %v4261_v25  ;;  %v4262_v28 = vsel %vm1476_vm6, %v6036_v18, %v6041_v24  ;;  %vm4520_vm6 = vcmask 523264  }
 0x980   : > { %4289 = vmatpush.msra.mxu2 %v4257_v27  ;;  %4328 = vmatpush.msra.mxu1 %v4262_v28 }
 0x981   : > { %4349 = vmatpush.msra.mxu3 %v6022_v26  ;;  %4309 = vmatpush.msra.mxu0 %v4258_v33 }
 0x982   : > { %4329 = vmatpush.msra.mxu1 %v4259_v30  ;;  %5845 = vmatmul.msk.f32.vlgmr.msra.gmra.mxu3 %vm3166_vm11, %v5841_v5 }
 0x983   : > { %4467 = vmatpush.msrb.mxu3 %v6051_v31  ;;  %v6055_v17 = vpop.permute.xlu0 %6054 }
 0x984   : > { %5842 = vmatmul.msk.f32.vlgmr.msra.gmra.mxu2 %vm3166_vm11, %v5841_v5  ;;  %v6045_v32 = vpop.permute.xlu1 %6044  ;;  %v6057_v34 = vunpack.i.h.bf16 %v6055_v17  ;;  %v6056_v22 = vunpack.i.l.bf16 %v6055_v17 }
 0x985   : > { %v6047_v9 = vunpack.i.h.bf16 %v6045_v32  ;;  %v6046_v35 = vunpack.i.l.bf16 %v6045_v32 }
 0x986   : > { %5843 = vmatmul.msk.f32.vlgmr.msra.gmra.mxu0 %vm3166_vm11, %v5841_v5  ;;  %5844 = vmatmul.msk.f32.vlgmr.msra.gmra.mxu1 %vm3166_vm11, %v5841_v5  ;;  %v4376_v40 = vsel %vm1585_vm7, %v6052_v37, %v6056_v22  ;;  %v4481_v5 = vpop.permute.xlu2 %4480 }
 0x987   : > { %4468 = vmatpush.msrb.mxu3 %v6057_v34  ;;  %v4379_v38 = vsel %vm1585_vm7, %v6046_v35, %v6047_v9 }
 0x988   : > { %4407 = vmatpush.msrb.mxu2 %v4379_v38 }
 0x98a   : > { %4408 = vmatpush.msrb.mxu2 %v4376_v40  ;;  %5850 = vmatmul.msk.f32.vlgmr.msrb.gmra.mxu3 %vm3166_vm11, %v5846_v39 }
 0x98c   : > { %5847 = vmatmul.msk.f32.vlgmr.msrb.gmra.mxu2 %vm3166_vm11, %v5846_v39  ;;  %v6060_v41 = vpop.permute.xlu1 %6059 }
 0x98d   : > { %v6062_v42 = vunpack.i.h.bf16 %v6060_v41  ;;  %v6061_v21 = vunpack.i.l.bf16 %v6060_v41 }
 0x98f   : > { %v4380_v36 = vsel %vm1585_vm7, %v6047_v9, %v6061_v21  ;;  %v4381_v43 = vsel %vm1585_vm7, %v6061_v21, %v6051_v31  ;;  %v4377_v29 = vsel %vm1585_vm7, %v6056_v22, %v6062_v42  ;;  %v4378_v44 = vsel %vm1585_vm7, %v6062_v42, %v6057_v34 }
 0x990   : > { %4427 = vmatpush.msrb.mxu0 %v4380_v36  ;;  %4447 = vmatpush.msrb.mxu1 %v4381_v43  ;;  %v6068_v43 = vld [vmem:[#allocation5] sm:$0xff]  ;;  %vm4786_vm7 = vcmask 1042434  }
 0x991   : > { %4495 = vst.msk [vmem:[#allocation5 + $0x18] sm:$0xff] %vm4494_vm3, %v6068_v43 }
 0x992   : > { %4428 = vmatpush.msrb.mxu0 %v4377_v29  ;;  %4448 = vmatpush.msrb.mxu1 %v4378_v44 }
 0x993   : > { %5848 = vmatmul.msk.f32.vlgmr.msrb.gmra.mxu0 %vm3166_vm11, %v5846_v39  ;;  %5849 = vmatmul.msk.f32.vlgmr.msrb.gmra.mxu1 %vm3166_vm11, %v5846_v39 }
 0x9da   : > { %v3756_v45 = vpop.f32.mrf.mxu0  ;;  %v3776_v46 = vpop.f32.mrf.mxu1 }
 0x9dc   : > { %v3796_v47 = vpop.f32.mrf.mxu3 }
 0x9df   : > { %v3736_v48 = vpop.f32.mrf.mxu2 }
 0x9e2   : > { %v3839_v49 = vpop.f32.mrf.mxu0  ;;  %v3859_v50 = vpop.f32.mrf.mxu1 }
 0x9e3   : > { %v3840_v4 = vadd.f32 %v3839_v49, %v3756_v45  ;;  %v3860_v10 = vadd.f32 %v3859_v50, %v3776_v46 }
 0x9e4   : > { %v3879_v51 = vpop.f32.mrf.mxu3 }
 0x9e5   : > { %v3880_v6 = vadd.f32 %v3879_v51, %v3796_v47 }
 0x9e7   : > { %v3819_v52 = vpop.f32.mrf.mxu2 }
 0x9e8   : > { %v3820_v1 = vadd.f32 %v3819_v52, %v3736_v48 }
 0x9ea   : > { %v3974_v53 = vpop.f32.mrf.mxu1  ;;  %v3954_v54 = vpop.f32.mrf.mxu0 }
 0x9eb   : > { %v3998_v15 = vadd.f32 %v3954_v54, %v3840_v4  ;;  %v3999_v16 = vadd.f32 %v3974_v53, %v3860_v10  ;;  %v4966_v53 = vld [vmem:[%s7923_s16] sm:$0xf] }
 0x9ec   : > { %v4728_v54 = vld [vmem:[%s7924_s17] sm:$0xf] }
 0x9ed   : > { %v3994_v55 = vpop.f32.mrf.mxu3  ;;  %v4526_v4 = vld [vmem:[%s7922_s15] sm:$0xf] }
 0x9ee   : > { %v4000_v11 = vadd.f32 %v3994_v55, %v3880_v6  ;;  %v4714_v55 = vld [vmem:[%s7923_s16] sm:$0xf] }
 0x9ef   : > { %v3934_v57 = vpop.f32.mrf.mxu2 }
 0x9f0   : > { %v3997_v3 = vadd.f32 %v3934_v57, %v3820_v1  ;;  %v4980_v57 = vld [vmem:[%s7924_s17] sm:$0xf] }
 0x9f1   : > { %v5018_v1 = vld [vmem:[#allocation6] sm:$0x1] }
 0x9f3   : > { %v4093_v58 = vpop.f32.mrf.mxu1  ;;  %v4073_v59 = vpop.f32.mrf.mxu0 }
 0x9f4   : > { %v4118_v18 = vadd.f32 %v4093_v58, %v3999_v16  ;;  %v4117_v23 = vadd.f32 %v4073_v59, %v3998_v15  ;;  %v5290_v58 = vld [vmem:[%s7923_s16] sm:$0xf]  ;;  %v5861_v15 = vld [vmem:[%s7922_s15 + $0x14] sm:$0xf]  ;;  %v5860_v16 = vld [vmem:[%s7922_s15 + $0x4] sm:$0xf] }
 0x9f5   : > { %v4113_v60 = vpop.f32.mrf.mxu3  ;;  %v5212_v59 = vld [vmem:[%s7923_s16] sm:$0xf] }
 0x9f6   : > { %v4119_v56 = vadd.f32 %v4113_v60, %v4000_v11  ;;  %v4767_v60 = vld [vmem:[#allocation6] sm:$0x1] }
 0x9f7   : > { %v4053_v61 = vpop.f32.mrf.mxu2 }
 0x9f8   : > { %v4116_v13 = vadd.f32 %v4053_v61, %v3997_v3  ;;  %v5383_v61 = vld [vmem:[%s7924_s17] sm:$0xf] }
 0x9fb   : > { %v4212_v62 = vpop.f32.mrf.mxu1  ;;  %v4192_v2 = vpop.f32.mrf.mxu0 }
 0x9fc   : > { %v4237_v24 = vadd.f32 %v4212_v62, %v4118_v18  ;;  %v4236_v32 = vadd.f32 %v4192_v2, %v4117_v23  ;;  %v5226_v62 = vld [vmem:[%s7924_s17] sm:$0xf]  ;;  %v5851_v2 = vld [vmem:[%s7922_s15 + $0x10] sm:$0xf]  ;;  %v5882_v18 = vld [vmem:[%s7922_s15 + $0xc] sm:$0xf] }
 0x9fd   : > { %v4232_v63 = vpop.f32.mrf.mxu3 }
 0x9fe   : > { %v4238_v19 = vadd.f32 %v4232_v63, %v4119_v56  ;;  %v5421_v63 = vld [vmem:[#allocation6] sm:$0x1]  ;;  %v5872_v56 = vld [vmem:[%s7922_s15 + $0x18] sm:$0xf] }
 0x9ff   : > { %v4172_v0 = vpop.f32.mrf.mxu2 }
 0xa00   : > { %v4235_v20 = vadd.f32 %v4172_v0, %v4116_v13  ;;  %v5264_v0 = vld [vmem:[#allocation6] sm:$0x1] }
 0xa03   : > { %v4331_v14 = vpop.f32.mrf.mxu1  ;;  %v4311_v8 = vpop.f32.mrf.mxu0 }
 0xa04   : > { %v4356_v28 = vadd.f32 %v4331_v14, %v4237_v24  ;;  %v4355_v37 = vadd.f32 %v4311_v8, %v4236_v32  ;;  %v5871_v8 = vld [vmem:[%s7922_s15 + $0x8] sm:$0xf] }
 0xa05   : > { %v4351_v7 = vpop.f32.mrf.mxu3 }
 0xa06   : > { %v4357_v25 = vadd.f32 %v4351_v7, %v4238_v19 }
 0xa07   : > { %v4291_v12 = vpop.f32.mrf.mxu2 }
 0xa08   : > { %v4354_v26 = vadd.f32 %v4291_v12, %v4235_v20 }
 0xa0d   : > { %v4470_v27 = vpop.f32.mrf.mxu3 }
 0xa0e   : > { %v4476_v31 = vadd.f32 %v4470_v27, %v4357_v25 }
 0xa0f   : > { %v4410_v33 = vpop.f32.mrf.mxu2 }
 0xa10   : > { %v4473_v30 = vadd.f32 %v4410_v33, %v4354_v26  ;;  %v4450_v17 = vpop.f32.mrf.mxu1  ;;  %v4486_v34 = vadd.f32 %v4481_v5, %v4476_v31  ;;  %v4430_v22 = vpop.f32.mrf.mxu0 }
 0xa11   : > { %v4475_v9 = vadd.f32 %v4450_v17, %v4356_v28  ;;  %v4474_v41 = vadd.f32 %v4430_v22, %v4355_v37 }
 0xa12   : > { %v4483_v35 = vadd.f32 %v4481_v5, %v4473_v30  ;;  %v4490_v38 = vmax.f32 %v4486_v34, 0.0 }
 0xa13   : > { %v4485_v39 = vadd.f32 %v4481_v5, %v4475_v9  ;;  %v4484_v21 = vadd.f32 %v4481_v5, %v4474_v41 }
 0xa14   : > { %v4487_v40 = vmax.f32 %v4483_v35, 0.0  ;;  %4506 = vrot.lane.b32.xlu1 %v4490_v38, %s6086_s5 }
 0xa15   : > { %v4489_v42 = vmax.f32 %v4485_v39, 0.0  ;;  %v4488_v36 = vmax.f32 %v4484_v21, 0.0 }
 0xa16   : > { %4500 = vrot.lane.b32.xlu2 %v4487_v40, %s6086_s5 }
 0xa17   : > { %4504 = vrot.lane.b32.xlu0 %v4489_v42, %s6086_s5 }
 0xa1f   : > { %4502 = vrot.lane.b32.xlu0 %v4488_v36, %s6086_s5 }
 0xa70   : > { %v4501_v29 = vpop.permute.xlu2 %4500 }
 0xa71   : > { %4517 = vst.msk [vmem:[#allocation5] sm:$0xff] %vm4516_vm4, %v4501_v29 }
 0xa78   : > { %v7708_v44 = vld [vmem:[#allocation5] sm:$0xff] }
 0xa79   : > { %4547 = vmatpush.msra.mxu2 %v7708_v44 }
 0xa7a   : > { %5852 = vmatmul.msk.f32.vlgmr.msra.gmra.mxu2 %vm1844_vm10, %v5851_v2 }
 0xa86   : > { %v4507_v45 = vpop.permute.xlu1 %4506 }
 0xa89   : > { %v4505_v46 = vpop.permute.xlu0 %4504 }
 0xa8a   : > { %v4511_v47 = vsel %vm4508_vm5, %v4505_v46, %v4507_v45 }
 0xa8b   : > { %4521 = vst.msk [vmem:[#allocation5 + $0x18] sm:$0xff] %vm4520_vm6, %v4511_v47 }
 0xa91   : > { %v4503_v48 = vpop.permute.xlu0 %4502 }
 0xa92   : > { %v7711_v49 = vsel %vm4508_vm5, %v4501_v29, %v4503_v48  ;;  %v7713_v50 = vsel %vm4508_vm5, %v4503_v48, %v4505_v46  ;;  %v7715_v51 = vld [vmem:[#allocation5 + $0x18] sm:$0xff] }
 0xa93   : > { %4607 = vmatpush.msra.mxu3 %v7715_v51  ;;  %v6063_v52 = vpack.i.bf16 %v7708_v44, %v7715_v51  ;;  %4620 = vrot.lane.b32.xlu0 %v7713_v50, %s7972_s28 }
 0xa94   : > { %4587 = vmatpush.msra.mxu1 %v7713_v50  ;;  %4618 = vrot.lane.b32.xlu2 %v7711_v49, %s7972_s28 }
 0xa95   : > { %6064 = vrot.lane.b32.xlu1 %v6063_v52, %s7972_s28  ;;  %4567 = vmatpush.msra.mxu0 %v7711_v49 }
 0xa96   : > { %5855 = vmatmul.msk.f32.vlgmr.msra.gmra.mxu3 %vm1844_vm10, %v5851_v2  ;;  %5853 = vmatmul.msk.f32.vlgmr.msra.gmra.mxu0 %vm1844_vm10, %v5851_v2 }
 0xa97   : > { %5854 = vmatmul.msk.f32.vlgmr.msra.gmra.mxu1 %vm1844_vm10, %v5851_v2 }
 0xa9b   : > { %4969 = vperm.xlu0 %5910, %v4966_v53  }
 0xa9c   : > { %4731 = vperm.xlu2 %5912, %v4728_v54  }
 0xa9d   : > { %4717 = vperm.xlu1 %5911, %v4714_v55  }
 0xaa3   : > { %4983 = vperm.xlu0 %5910, %v4980_v57  }
 0xaa4   : > { %5293 = vperm.xlu2 %5912, %v5290_v58  }
 0xaa5   : > { %5215 = vperm.xlu1 %5911, %v5212_v59  }
 0xaab   : > { %4770 = vperm.xlu0 %5910, %v4767_v60  }
 0xaac   : > { %5386 = vperm.xlu2 %5912, %v5383_v61  }
 0xaad   : > { %5229 = vperm.xlu1 %5911, %v5226_v62  }
 0xab3   : > { %5424 = vperm.xlu0 %5910, %v5421_v63  }
 0xab4   : > { %5267 = vperm.xlu2 %5912, %v5264_v0  }
 0xab5   : > { %5021 = vperm.xlu1 %5911, %v5018_v1  }
 0xaee   : > { %v4619_v3 = vpop.permute.xlu2 %4618 }
 0xaf6   : > { %v4732_v30 = vpop.permute.xlu2 %4731 }
 0xafd   : > { %v4549_v26 = vpop.f32.mrf.mxu2 }
 0xb05   : > { %v4621_v6 = vpop.permute.xlu0 %4620 }
 0xb06   : > { %v4625_v7 = vsel %vm843_vm0, %v4619_v3, %v4621_v6 }
 0xb07   : > { %v6065_v10 = vpop.permute.xlu1 %6064  ;;  %4669 = vmatpush.msrb.mxu0 %v4625_v7 }
 0xb08   : > { %v6067_v11 = vunpack.i.h.bf16 %v6065_v10  ;;  %v6066_v12 = vunpack.i.l.bf16 %v6065_v10  ;;  %5857 = vmatmul.msk.f32.vlgmr.msrb.gmra.mxu0 %vm1844_vm10, %v4526_v4 }
 0xb09   : > { %4838 = vmatpush.msra.mxu0 %v7711_v49 }
 0xb0a   : > { %4709 = vmatpush.msrb.mxu3 %v6066_v12  ;;  %v4624_v13 = vsel %vm843_vm0, %v6067_v11, %v4619_v3  ;;  %v4626_v14 = vsel %vm843_vm0, %v4621_v6, %v6066_v12  ;;  %vm4759_vm0 = vcmask 519168  }
 0xb0b   : > { %4921 = vmatpush.msrb.mxu0 %v4625_v7  ;;  %4649 = vmatpush.msrb.mxu2 %v4624_v13 }
 0xb0c   : > { %5859 = vmatmul.msk.f32.vlgmr.msrb.gmra.mxu3 %vm1844_vm10, %v4526_v4  ;;  %5856 = vmatmul.msk.f32.vlgmr.msrb.gmra.mxu2 %vm1844_vm10, %v4526_v4 }
 0xb0d   : > { %4878 = vmatpush.msra.mxu3 %v7715_v51  ;;  %4818 = vmatpush.msra.mxu2 %v7708_v44  ;;  %v7811_v24 = vpop.permute.xlu0 %4969 }
 0xb0e   : > { %4689 = vmatpush.msrb.mxu1 %v4626_v14 }
 0xb0f   : > { %4961 = vmatpush.msrb.mxu3 %v6066_v12  ;;  %4901 = vmatpush.msrb.mxu2 %v4624_v13  ;;  %v4718_v20 = vpop.permute.xlu1 %4717 }
 0xb10   : > { %5858 = vmatmul.msk.f32.vlgmr.msrb.gmra.mxu1 %vm1844_vm10, %v4526_v4  ;;  %5863 = vmatmul.msk.f32.vlgmr.msra.gmra.mxu0 %vm1844_vm10, %v5861_v15 }
 0xb11   : > { %4858 = vmatpush.msra.mxu1 %v7713_v50  ;;  %5084 = vmatpush.msra.mxu0 %v7711_v49 }
 0xb13   : > { %4941 = vmatpush.msrb.mxu1 %v4626_v14  ;;  %v4569_v19 = vpop.f32.mrf.mxu0 }
 0xb14   : > { %5865 = vmatmul.msk.f32.vlgmr.msra.gmra.mxu3 %vm1844_vm10, %v5861_v15  ;;  %5862 = vmatmul.msk.f32.vlgmr.msra.gmra.mxu2 %vm1844_vm10, %v5861_v15  ;;  %v4589_v23 = vpop.f32.mrf.mxu1 }
 0xb15   : > { %5124 = vmatpush.msra.mxu3 %v7715_v51  ;;  %5064 = vmatpush.msra.mxu2 %v7708_v44  ;;  %v7815_v35 = vpop.permute.xlu0 %4983 }
 0xb17   : > { %v7813_v28 = vpop.permute.xlu1 %5215 }
 0xb18   : > { %5864 = vmatmul.msk.f32.vlgmr.msra.gmra.mxu1 %vm1844_vm10, %v5861_v15  ;;  %5867 = vmatmul.msk.f32.vlgmr.msrb.gmra.mxu0 %vm1844_vm10, %v5860_v16 }
 0xb19   : > { %5104 = vmatpush.msra.mxu1 %v7713_v50  ;;  %5167 = vmatpush.msrb.mxu0 %v4625_v7  ;;  %v4609_v25 = vpop.f32.mrf.mxu3 }
 0xb1c   : > { %5869 = vmatmul.msk.f32.vlgmr.msrb.gmra.mxu3 %vm1844_vm10, %v5860_v16  ;;  %5866 = vmatmul.msk.f32.vlgmr.msrb.gmra.mxu2 %vm1844_vm10, %v5860_v16 }
 0xb1d   : > { %5207 = vmatpush.msrb.mxu3 %v6066_v12  ;;  %5147 = vmatpush.msrb.mxu2 %v4624_v13  ;;  %v4771_v62 = vpop.permute.xlu0 %4770 }
 0xb1e   : > { %v4773_v11 = vperm.slane %v4771_v62, 0  ;;  %v7842_v62 = vpop.permute.xlu2 %5293 }
 0xb1f   : > { %v7818_v42 = vpop.permute.xlu1 %5229 }
 0xb20   : > { %5868 = vmatmul.msk.f32.vlgmr.msrb.gmra.mxu1 %vm1844_vm10, %v5860_v16  ;;  %5874 = vmatmul.msk.f32.vlgmr.msra.gmra.mxu0 %vm1844_vm10, %v5872_v56 }
 0xb21   : > { %5187 = vmatpush.msrb.mxu1 %v4626_v14  ;;  %5334 = vmatpush.msra.mxu0 %v4625_v7 }
 0xb24   : > { %5876 = vmatmul.msk.f32.vlgmr.msra.gmra.mxu3 %vm1844_vm10, %v5872_v56  ;;  %5873 = vmatmul.msk.f32.vlgmr.msra.gmra.mxu2 %vm1844_vm10, %v5872_v56 }
 0xb25   : > { %5374 = vmatpush.msra.mxu3 %v6066_v12  ;;  %5314 = vmatpush.msra.mxu2 %v4624_v13 }
 0xb27   : > { %v5022_v4 = vpop.permute.xlu1 %5021 }
 0xb28   : > { %5875 = vmatmul.msk.f32.vlgmr.msra.gmra.mxu1 %vm1844_vm10, %v5872_v56  ;;  %5878 = vmatmul.msk.f32.vlgmr.msrb.gmra.mxu0 %vm1844_vm10, %v5871_v8 }
 0xb29   : > { %5354 = vmatpush.msra.mxu1 %v4626_v14 }
 0xb2c   : > { %5880 = vmatmul.msk.f32.vlgmr.msrb.gmra.mxu3 %vm1844_vm10, %v5871_v8  ;;  %5877 = vmatmul.msk.f32.vlgmr.msrb.gmra.mxu2 %vm1844_vm10, %v5871_v8 }
 0xb30   : > { %5879 = vmatmul.msk.f32.vlgmr.msrb.gmra.mxu1 %vm1844_vm10, %v5871_v8  ;;  %5884 = vmatmul.msk.f32.vlgmr.msra.gmra.mxu0 %vm1844_vm10, %v5882_v18  ;;  %v7825_v8 = vperm.slane %v5022_v4, 0 }
 0xb34   : > { %5886 = vmatmul.msk.f32.vlgmr.msra.gmra.mxu3 %vm1844_vm10, %v5882_v18  ;;  %5883 = vmatmul.msk.f32.vlgmr.msra.gmra.mxu2 %vm1844_vm10, %v5882_v18 }
 0xb38   : > { %5885 = vmatmul.msk.f32.vlgmr.msra.gmra.mxu1 %vm1844_vm10, %v5882_v18  ;;  %vm4788_vm10 = vcmask 1041408  }
 0xb85   : > { %v4671_v27 = vpop.f32.mrf.mxu0 }
 0xb86   : > { %v4672_v31 = vadd.f32 %v4671_v27, %v4569_v19 }
 0xb88   : > { %v4721_v33 = vadd.f32 %v4718_v20, %v4672_v31 }
 0xb8a   : > { %v4725_v5 = vmax.f32 %v4721_v33, 0.0 }
 0xb8c   : > { %v4735_v17 = vmul.f32 %v4732_v30, %v4725_v5 }
 0xb8d   : > { %v4691_v32 = vpop.f32.mrf.mxu1  ;;  %v4840_v9 = vpop.f32.mrf.mxu0 }
 0xb8e   : > { %v4692_v34 = vadd.f32 %v4691_v32, %v4589_v23  ;;  %v4745_v22 = vsel %vm959_vm1, %v4735_v17, 0.0 }
 0xb8f   : > { %v4711_v37 = vpop.f32.mrf.mxu3  ;;  %v4746_v38 = vrot.slane %v4745_v22, 4  ;;  %v4651_v41 = vpop.f32.mrf.mxu2 }
 0xb90   : > { %v4722_v39 = vadd.f32 %v4718_v20, %v4692_v34  ;;  %v4712_v40 = vadd.f32 %v4711_v37, %v4609_v25  ;;  %v4652_v21 = vadd.f32 %v4651_v41, %v4549_v26 }
 0xb91   : > { %v4747_v36 = vadd.f32 %v4746_v38, %v4745_v22 }
 0xb92   : > { %v4726_v43 = vmax.f32 %v4722_v39, 0.0  ;;  %v4723_v29 = vadd.f32 %v4718_v20, %v4712_v40  ;;  %v4720_v44 = vadd.f32 %v4718_v20, %v4652_v21 }
 0xb93   : > { %v4748_v45 = vrot.slane %v4747_v36, 2 }
 0xb94   : > { %v4736_v46 = vmul.f32 %v4732_v30, %v4726_v43  ;;  %v4727_v47 = vmax.f32 %v4723_v29, 0.0  ;;  %v4724_v48 = vmax.f32 %v4720_v44, 0.0 }
 0xb95   : > { %v4860_v49 = vpop.f32.mrf.mxu1  ;;  %v4749_v50 = vadd.f32 %v4748_v45, %v4747_v36  ;;  %v4923_v53 = vpop.f32.mrf.mxu0  ;;  %v4791_v36 = vlaneseq }
 0xb96   : > { %v4752_v51 = vsel %vm959_vm1, %v4736_v46, 0.0  ;;  %v4737_v52 = vmul.f32 %v4732_v30, %v4727_v47  ;;  %v4734_v55 = vmul.f32 %v4732_v30, %v4724_v48  ;;  %v4924_v58 = vadd.f32 %v4923_v53, %v4840_v9 }
 0xb97   : > { %v4753_v54 = vrot.slane %v4752_v51, 4  ;;  %v4880_v57 = vpop.f32.mrf.mxu3  ;;  %v4750_v59 = vrot.slane %v4749_v50, 1  ;;  %v4820_v61 = vpop.f32.mrf.mxu2  ;;  %vm7845_vm11 = vcmp.lt.s32.totalorder %v4791_v36, 448 }
 0xb98   : > { %v4760_v60 = vsel %vm4759_vm0, %v4737_v52, 0.0  ;;  %v4738_v1 = vsel %vm959_vm1, %v4734_v55, 0.0  ;;  %v4973_v2 = vadd.f32 %v7811_v24, %v4924_v58  ;;  %v7862_v36 = vpop.permute.xlu2 %5386 }
 0xb99   : > { %v4754_v63 = vadd.f32 %v4753_v54, %v4752_v51  ;;  %v4761_v0 = vrot.slane %v4760_v60, 4  ;;  %v4739_v3 = vrot.slane %v4738_v1, 4  ;;  %v4751_v13 = vadd.f32 %v4750_v59, %v4749_v50 }
 0xb9a   : > { %v4977_v10 = vmax.f32 %v4973_v2, 0.0 }
 0xb9b   : > { %v4755_v6 = vrot.slane %v4754_v63, 2  ;;  %v4762_v7 = vadd.f32 %v4761_v0, %v4760_v60  ;;  %v4740_v12 = vadd.f32 %v4739_v3, %v4738_v1  ;;  %v4775_v32 = vadd.f32 %v4773_v11, %v4751_v13 }
 0xb9c   : > { %v4987_v16 = vmul.f32 %v7815_v35, %v4977_v10 }
 0xb9d   : > { %v4756_v14 = vadd.f32 %v4755_v6, %v4754_v63  ;;  %v4763_v15 = vrot.slane %v4762_v7, 2  ;;  %v4943_v56 = vpop.f32.mrf.mxu1  ;;  %v4741_v18 = vrot.slane %v4740_v12, 2  ;;  %v5086_v20 = vpop.f32.mrf.mxu0  ;;  %v4782_v47 = vrot.slane %v4775_v32, 7 }
 0xb9e   : > { %v4944_v19 = vadd.f32 %v4943_v56, %v4860_v49  ;;  %v4997_v26 = vsel %vm959_vm1, %v4987_v16, 0.0 }
 0xb9f   : > { %v4757_v23 = vrot.slane %v4756_v14, 1  ;;  %v4764_v25 = vadd.f32 %v4763_v15, %v4762_v7  ;;  %v4963_v27 = vpop.f32.mrf.mxu3  ;;  %v4742_v31 = vadd.f32 %v4741_v18, %v4740_v12  ;;  %v4998_v33 = vrot.slane %v4997_v26, 4  ;;  %v4903_v17 = vpop.f32.mrf.mxu2 }
 0xba0   : > { %v4974_v5 = vadd.f32 %v7811_v24, %v4944_v19  ;;  %v4964_v30 = vadd.f32 %v4963_v27, %v4880_v57  ;;  %v4904_v22 = vadd.f32 %v4903_v17, %v4820_v61 }
 0xba1   : > { %v4758_v34 = vadd.f32 %v4757_v23, %v4756_v14  ;;  %v4765_v9 = vrot.slane %v4764_v25, 1  ;;  %v4743_v37 = vrot.slane %v4742_v31, 1  ;;  %v4999_v38 = vadd.f32 %v4998_v33, %v4997_v26 }
 0xba2   : > { %v4978_v39 = vmax.f32 %v4974_v5, 0.0  ;;  %v4975_v40 = vadd.f32 %v7811_v24, %v4964_v30  ;;  %v4972_v43 = vadd.f32 %v7811_v24, %v4904_v22 }
 0xba3   : > { %v4776_v41 = vadd.f32 %v4773_v11, %v4758_v34  ;;  %v4766_v21 = vadd.f32 %v4765_v9, %v4764_v25  ;;  %v4744_v29 = vadd.f32 %v4743_v37, %v4742_v31  ;;  %v5000_v44 = vrot.slane %v4999_v38, 2 }
 0xba4   : > { %v4988_v45 = vmul.f32 %v7815_v35, %v4978_v39  ;;  %v4979_v46 = vmax.f32 %v4975_v40, 0.0  ;;  %v4976_v50 = vmax.f32 %v4972_v43, 0.0 }
 0xba5   : > { %v4783_v48 = vrot.slane %v4776_v41, 6  ;;  %v4777_v49 = vadd.f32 %v4773_v11, %v4766_v21  ;;  %v5106_v51 = vpop.f32.mrf.mxu1  ;;  %v4774_v52 = vadd.f32 %v4773_v11, %v4744_v29  ;;  %v5001_v53 = vadd.f32 %v5000_v44, %v4999_v38  ;;  %v5169_v57 = vpop.f32.mrf.mxu0 }
 0xba6   : > { %v5004_v54 = vsel %vm959_vm1, %v4988_v45, 0.0  ;;  %v4989_v55 = vmul.f32 %v7815_v35, %v4979_v46  ;;  %v4986_v59 = vmul.f32 %v7815_v35, %v4976_v50  ;;  %v5170_v61 = vadd.f32 %v5169_v57, %v5086_v20 }
 0xba7   : > { %v4784_v58 = vrot.slane %v4777_v49, 5  ;;  %v5005_v24 = vrot.slane %v5004_v54, 4  ;;  %v5126_v60 = vpop.f32.mrf.mxu3  ;;  %v4785_v63 = vsel %vm1750_vm8, %v4774_v52, %v4782_v47  ;;  %v5002_v1 = vrot.slane %v5001_v53, 1  ;;  %v5066_v2 = vpop.f32.mrf.mxu2 }
 0xba8   : > { %v5011_v35 = vsel %vm4759_vm0, %v4989_v55, 0.0  ;;  %v4990_v7 = vsel %vm959_vm1, %v4986_v59, 0.0  ;;  %v5219_v13 = vadd.f32 %v7813_v28, %v5170_v61 }
 0xba9   : > { %v4787_v3 = vsel %vm4786_vm7, %v4783_v48, %v4784_v58  ;;  %v5006_v4 = vadd.f32 %v5005_v24, %v5004_v54  ;;  %v5012_v6 = vrot.slane %v5011_v35, 4  ;;  %v5003_v11 = vadd.f32 %v5002_v1, %v5001_v53 }
 0xbaa   : > { %v4789_v10 = vsel %vm4788_vm10, %v4785_v63, %v4787_v3  ;;  %v4991_v12 = vrot.slane %v4990_v7, 4  ;;  %v5223_v18 = vmax.f32 %v5219_v13, 0.0 }
 0xbab   : > { %4795 = vst.msk [vmem:[%s7840_s6] ss:$4 sm:$0xf] %vm7845_vm11, %v4789_v10  ;;  %v5007_v14 = vrot.slane %v5006_v4, 2  ;;  %v5013_v15 = vadd.f32 %v5012_v6, %v5011_v35  ;;  %v5026_v16 = vadd.f32 %v7825_v8, %v5003_v11 }
 0xbac   : > { %v4992_v56 = vadd.f32 %v4991_v12, %v4990_v7  ;;  %v5233_v26 = vmul.f32 %v7818_v42, %v5223_v18 }
 0xbad   : > { %v5008_v19 = vadd.f32 %v5007_v14, %v5006_v4  ;;  %v5014_v20 = vrot.slane %v5013_v15, 2  ;;  %v5189_v23 = vpop.f32.mrf.mxu1  ;;  %v5336_v31 = vpop.f32.mrf.mxu0  ;;  %v5033_v33 = vrot.slane %v5026_v16, 7 }
 0xbae   : > { %v4993_v25 = vrot.slane %v4992_v56, 2  ;;  %v5190_v27 = vadd.f32 %v5189_v23, %v5106_v51  ;;  %v5337_v32 = vadd.f32 %v5336_v31, %v7842_v62  ;;  %v5243_v9 = vsel %vm959_vm1, %v5233_v26, 0.0  ;;  %v5268_v23 = vpop.permute.xlu2 %5267 }
 0xbaf   : > { %v5009_v5 = vrot.slane %v5008_v19, 1  ;;  %v5015_v30 = vadd.f32 %v5014_v20, %v5013_v15  ;;  %v5209_v17 = vpop.f32.mrf.mxu3  ;;  %v5149_v38 = vpop.f32.mrf.mxu2  ;;  %v5244_v41 = vrot.slane %v5243_v9, 4 }
 0xbb0   : > { %v4994_v34 = vadd.f32 %v4993_v25, %v4992_v56  ;;  %v5220_v22 = vadd.f32 %v7813_v28, %v5190_v27  ;;  %v5210_v37 = vadd.f32 %v5209_v17, %v5126_v60  ;;  %v5150_v21 = vadd.f32 %v5149_v38, %v5066_v2 }
 0xbb1   : > { %v5010_v39 = vadd.f32 %v5009_v5, %v5008_v19  ;;  %v5016_v40 = vrot.slane %v5015_v30, 1  ;;  %v5380_v45 = vmax.f32 %v5337_v32, 0.0  ;;  %v5245_v48 = vadd.f32 %v5244_v41, %v5243_v9 }
 0xbb2   : > { %v4995_v43 = vrot.slane %v4994_v34, 1  ;;  %v5224_v29 = vmax.f32 %v5220_v22, 0.0  ;;  %v5221_v44 = vadd.f32 %v7813_v28, %v5210_v37  ;;  %v5218_v49 = vadd.f32 %v7813_v28, %v5150_v21 }
 0xbb3   : > { %v5027_v46 = vadd.f32 %v7825_v8, %v5010_v39  ;;  %v5017_v47 = vadd.f32 %v5016_v40, %v5015_v30  ;;  %v5390_v53 = vmul.f32 %v7862_v36, %v5380_v45  ;;  %v5246_v57 = vrot.slane %v5245_v48, 2 }
 0xbb4   : > { %v4996_v50 = vadd.f32 %v4995_v43, %v4994_v34  ;;  %v5234_v51 = vmul.f32 %v7818_v42, %v5224_v29  ;;  %v5225_v52 = vmax.f32 %v5221_v44, 0.0  ;;  %v5222_v58 = vmax.f32 %v5218_v49, 0.0 }
 0xbb5   : > { %v5034_v54 = vrot.slane %v5027_v46, 6  ;;  %v5028_v55 = vadd.f32 %v7825_v8, %v5017_v47  ;;  %v5356_v24 = vpop.f32.mrf.mxu1  ;;  %v5400_v28 = vsel %vm959_vm1, %v5390_v53, 0.0  ;;  %v5247_v1 = vadd.f32 %v5246_v57, %v5245_v48 }
 0xbb6   : > { %v5025_v59 = vadd.f32 %v7825_v8, %v4996_v50  ;;  %v5250_v60 = vsel %vm959_vm1, %v5234_v51, 0.0  ;;  %v5235_v61 = vmul.f32 %v7818_v42, %v5225_v52  ;;  %v5232_v2 = vmul.f32 %v7818_v42, %v5222_v58 }
 0xbb7   : > { %v5035_v63 = vrot.slane %v5028_v55, 5  ;;  %v5251_v35 = vrot.slane %v5250_v60, 4  ;;  %v5401_v6 = vrot.slane %v5400_v28, 4  ;;  %v5357_v7 = vadd.f32 %v5356_v24, %v7842_v62  ;;  %v5376_v13 = vpop.f32.mrf.mxu3  ;;  %v5316_v14 = vpop.f32.mrf.mxu2 }
 0xbb8   : > { %v5036_v3 = vsel %vm1750_vm8, %v5025_v59, %v5033_v33  ;;  %v5257_v4 = vsel %vm4759_vm0, %v5235_v61, 0.0  ;;  %v5248_v10 = vrot.slane %v5247_v1, 1  ;;  %v5236_v16 = vsel %vm959_vm1, %v5232_v2, 0.0  ;;  %v5425_v61 = vpop.permute.xlu0 %5424 }
 0xbb9   : > { %v5037_v8 = vsel %vm4786_vm7, %v5034_v54, %v5035_v63  ;;  %v5252_v11 = vadd.f32 %v5251_v35, %v5250_v60  ;;  %v5258_v12 = vrot.slane %v5257_v4, 4  ;;  %v5402_v56 = vadd.f32 %v5401_v6, %v5400_v28 }
 0xbba   : > { %v5038_v15 = vsel %vm4788_vm10, %v5036_v3, %v5037_v8  ;;  %v5381_v42 = vmax.f32 %v5357_v7, 0.0  ;;  %v5237_v20 = vrot.slane %v5236_v16, 4  ;;  %v5377_v27 = vadd.f32 %v5376_v13, %v7842_v62 }
 0xbbb   : > { %5870 = vst.msk [vmem:[%s7840_s6 + $0x1] ss:$4 sm:$0xf] %vm7845_vm11, %v5038_v15  ;;  %v5253_v18 = vrot.slane %v5252_v11, 2  ;;  %v5259_v19 = vadd.f32 %v5258_v12, %v5257_v4  ;;  %v5403_v25 = vrot.slane %v5402_v56, 2  ;;  %v5317_v31 = vadd.f32 %v5316_v14, %v7842_v62 }
 0xbbc   : > { %v5391_v26 = vmul.f32 %v7862_v36, %v5381_v42  ;;  %v5238_v30 = vadd.f32 %v5237_v20, %v5236_v16  ;;  %v5249_v17 = vadd.f32 %v5248_v10, %v5247_v1  ;;  %v5382_v34 = vmax.f32 %v5377_v27, 0.0 }
 0xbbd   : > { %v5254_v33 = vadd.f32 %v5253_v18, %v5252_v11  ;;  %v5260_v5 = vrot.slane %v5259_v19, 2  ;;  %v5379_v9 = vmax.f32 %v5317_v31, 0.0  ;;  %v5270_v22 = vperm.slane %v5268_v23, 0 }
 0xbbe   : > { %v5407_v32 = vsel %vm959_vm1, %v5391_v26, 0.0  ;;  %v5239_v39 = vrot.slane %v5238_v30, 2  ;;  %v5404_v40 = vadd.f32 %v5403_v25, %v5402_v56  ;;  %v5392_v21 = vmul.f32 %v7862_v36, %v5382_v34 }
 0xbbf   : > { %v5255_v37 = vrot.slane %v5254_v33, 1  ;;  %v5261_v38 = vadd.f32 %v5260_v5, %v5259_v19  ;;  %v5408_v41 = vrot.slane %v5407_v32, 4  ;;  %v5389_v43 = vmul.f32 %v7862_v36, %v5379_v9 }
 0xbc0   : > { %v5240_v44 = vadd.f32 %v5239_v39, %v5238_v30  ;;  %v5272_v45 = vadd.f32 %v5270_v22, %v5249_v17  ;;  %v5414_v47 = vsel %vm4759_vm0, %v5392_v21, 0.0  ;;  %v5405_v53 = vrot.slane %v5404_v40, 1 }
 0xbc1   : > { %v5256_v29 = vadd.f32 %v5255_v37, %v5254_v33  ;;  %v5262_v62 = vrot.slane %v5261_v38, 1  ;;  %v5409_v46 = vadd.f32 %v5408_v41, %v5407_v32  ;;  %v5393_v48 = vsel %vm959_vm1, %v5389_v43, 0.0 }
 0xbc2   : > { %v5241_v51 = vrot.slane %v5240_v44, 1  ;;  %v5415_v52 = vrot.slane %v5414_v47, 4  ;;  %v5394_v55 = vrot.slane %v5393_v48, 4  ;;  %v5279_v36 = vrot.slane %v5272_v45, 7 }
 0xbc3   : > { %v5273_v49 = vadd.f32 %v5270_v22, %v5256_v29  ;;  %v5263_v50 = vadd.f32 %v5262_v62, %v5261_v38  ;;  %v5410_v54 = vrot.slane %v5409_v46, 2  ;;  %v5406_v2 = vadd.f32 %v5405_v53, %v5404_v40 }
 0xbc4   : > { %v5242_v58 = vadd.f32 %v5241_v51, %v5240_v44  ;;  %v5416_v24 = vadd.f32 %v5415_v52, %v5414_v47  ;;  %v5395_v60 = vadd.f32 %v5394_v55, %v5393_v48  ;;  %v5427_v10 = vperm.slane %v5425_v61, 0 }
 0xbc5   : > { %v5274_v57 = vadd.f32 %v5270_v22, %v5263_v50  ;;  %v5411_v59 = vadd.f32 %v5410_v54, %v5409_v46  ;;  %v5280_v28 = vrot.slane %v5273_v49, 6 }
 0xbc6   : > { %v5271_v1 = vadd.f32 %v5270_v22, %v5242_v58  ;;  %v5417_v35 = vrot.slane %v5416_v24, 2  ;;  %v5396_v4 = vrot.slane %v5395_v60, 2  ;;  %v5429_v15 = vadd.f32 %v5427_v10, %v5406_v2 }
 0xbc7   : > { %v5281_v63 = vrot.slane %v5274_v57, 5  ;;  %v5412_v3 = vrot.slane %v5411_v59, 1 }
 0xbc8   : > { %v5282_v7 = vsel %vm1750_vm8, %v5271_v1, %v5279_v36  ;;  %v5418_v8 = vadd.f32 %v5417_v35, %v5416_v24  ;;  %v5397_v13 = vadd.f32 %v5396_v4, %v5395_v60  ;;  %v5436_v20 = vrot.slane %v5429_v15, 7 }
 0xbc9   : > { %v5283_v6 = vsel %vm4786_vm7, %v5280_v28, %v5281_v63  ;;  %v5413_v12 = vadd.f32 %v5412_v3, %v5411_v59 }
 0xbca   : > { %v5284_v11 = vsel %vm4788_vm10, %v5282_v7, %v5283_v6  ;;  %v5419_v14 = vrot.slane %v5418_v8, 1  ;;  %v5398_v16 = vrot.slane %v5397_v13, 1 }
 0xbcb   : > { %5881 = vst.msk [vmem:[%s7840_s6 + $0x2] ss:$4 sm:$0xf] %vm7845_vm11, %v5284_v11  ;;  %v5430_v56 = vadd.f32 %v5427_v10, %v5413_v12 }
 0xbcc   : > { %v5420_v42 = vadd.f32 %v5419_v14, %v5418_v8  ;;  %v5399_v18 = vadd.f32 %v5398_v16, %v5397_v13 }
 0xbcd   : > { %v5437_v25 = vrot.slane %v5430_v56, 6 }
 0xbce   : > { %v5431_v19 = vadd.f32 %v5427_v10, %v5420_v42  ;;  %v5428_v23 = vadd.f32 %v5427_v10, %v5399_v18 }
 0xbd0   : > { %v5438_v26 = vrot.slane %v5431_v19, 5  ;;  %v5439_v27 = vsel %vm1750_vm8, %v5428_v23, %v5436_v20 }
 0xbd2   : > { %v5440_v31 = vsel %vm4786_vm7, %v5437_v25, %v5438_v26 }
 0xbd3   : > { %v5441_v33 = vsel %vm4788_vm10, %v5439_v27, %v5440_v31 }
 0xbd4   : > { %5887 = vst.msk [vmem:[%s7840_s6 + $0x3] ss:$4 sm:$0xf] %vm7845_vm11, %v5441_v33 }
 0xbd5 PF: > { %s35_s24 = sadd.s32 1, %s6075_s24  }
 0xbd6   : > { %p32_p4 = scmp.ge.s32.totalorder %s35_s24, 4  }
 0xbd8   :  { %34 = sbr.rel (!%p32_p4) target bundleno = 12 (0xc), region = 211 }

</bundles_post_ra>
